<compile_context>
chip_gen: v7x
topology: tpu7x:2x2x1
jax: 0.10.0
libtpu: 0.0.40
codegen_flags: <defaults>
</compile_context>

<pallas_src>
import functools

import jax
import jax.numpy as jnp
from jax.experimental import pallas as pl
from jax.experimental.pallas import tpu as pltpu


_VMEM_LIMIT = 32 * 1024 * 1024   # explicit scoped-VMEM limit; safe on v5e/v6e/v7x


def _pad_to(x, axis, mult):
    """Zero-pad `axis` of x up to a multiple of `mult`."""
    size = x.shape[axis]
    pad = (-size) % mult
    if pad == 0:
        return x
    widths = [(0, 0)] * x.ndim
    widths[axis] = (0, pad)
    return jnp.pad(x, widths)


# ----------------------------------------------------------------------------
# Pallas kernels
# ----------------------------------------------------------------------------
def _matmul_bias_relu_kernel(x_ref, w_ref, b_ref, o_ref):
    """(TM, K) bf16 @ (K, N) bf16 -> f32 accumulate; + bias; ReLU; cast at store."""
    acc = jnp.dot(x_ref[...], w_ref[...], preferred_element_type=jnp.float32)
    acc = acc + b_ref[...]
    acc = jnp.maximum(acc, 0.0)
    o_ref[...] = acc.astype(o_ref.dtype)


def _dueling_head_kernel(f_ref, w1_ref, b1_ref, w2_ref, b2_ref, q_ref,
                         *, batch, num_actions):
    # Fused value+advantage first layer: one K=3200, N=256 MXU pass.
    f = f_ref[...]                                                    # (Bp, Kp) bf16
    h = jnp.dot(f, w1_ref[...], preferred_element_type=jnp.float32) + b1_ref[...]
    h = jnp.maximum(h, 0.0)                                           # (Bp, 256) f32
    # Fused second layer (block-structured weights):
    #   out[:, 0:A]  = advantage  (driven by h[:, 128:256])
    #   out[:, A]    = value      (driven by h[:, 0:128])
    #   out[:, A+1:] = exactly 0 for valid rows (zero weights / zero bias)
    out = jnp.dot(h.astype(jnp.bfloat16), w2_ref[...],
                  preferred_element_type=jnp.float32) + b2_ref[...]   # (Bp, 128) f32
    rows = jax.lax.broadcasted_iota(jnp.int32, out.shape, 0)
    cols = jax.lax.broadcasted_iota(jnp.int32, out.shape, 1)
    adv_mask = (rows < batch) & (cols < num_actions)
    adv_mean = jnp.sum(jnp.where(adv_mask, out, 0.0)) * (1.0 / float(batch * num_actions))
    value = jnp.sum(jnp.where(cols == num_actions, out, 0.0), axis=1, keepdims=True)
    # Q = V + (A - mean(A));  valid entries live in [:batch, :num_actions].
    q_ref[...] = value + (out - adv_mean)


# ----------------------------------------------------------------------------
# wrappers
# ----------------------------------------------------------------------------
def _tiled_matmul_bias_relu(x, w, b, *, tm=256, out_dtype=jnp.bfloat16):
    """x:(M,K) bf16 @ w:(Kp,Np) bf16 + b:(1,Np) f32, ReLU.  M-tiled grid,
    weights/bias VMEM-resident across grid steps, activations pipelined."""
    xp = _pad_to(_pad_to(x, 1, 128), 0, tm)
    Mp, Kp = xp.shape
    Np = w.shape[1]
    assert Kp == w.shape[0], (Kp, w.shape)
    return pl.pallas_call(
        _matmul_bias_relu_kernel,
        grid=(Mp // tm,),
        in_specs=[
            pl.BlockSpec((tm, Kp), lambda i: (i, 0)),   # activation tiles stream
            pl.BlockSpec((Kp, Np), lambda i: (0, 0)),   # weights stay resident
            pl.BlockSpec((1, Np), lambda i: (0, 0)),    # bias stays resident
        ],
        out_specs=pl.BlockSpec((tm, Np), lambda i: (i, 0)),
        out_shape=jax.ShapeDtypeStruct((Mp, Np), out_dtype),
        compiler_params=pltpu.CompilerParams(
            dimension_semantics=("parallel",),
            vmem_limit_bytes=_VMEM_LIMIT),
    )(xp, w, b)


def _conv2d_relu(x, w_mat, b_row, *, k, s, out_ch, tm=256):
    """Valid conv (stride s) + ReLU on NHWC input via im2col + Pallas matmul.
    Returns NHWC (N, Ho, Wo, out_ch) bf16."""
    N, H, W, _ = x.shape
    Ho = (H - k) // s + 1
    Wo = (W - k) // s + 1
    # TODO(synk): patch extraction stays in XLA (pure data-movement glue);
    # building patches inside the kernel from a VMEM-resident NHWC tile needs
    # strided ref slicing that is not worth the lowering risk here.
    cols = [x[:, i:i + s * Ho:s, j:j + s * Wo:s, :] for i in range(k) for j in range(k)]
    patches = jnp.concatenate(cols, axis=-1)              # (N,Ho,Wo,k*k*C), (kh,kw,C) order
    patches = patches.reshape(N * Ho * Wo, -1).astype(jnp.bfloat16)
    out = _tiled_matmul_bias_relu(patches, w_mat, b_row, tm=tm)
    return out[:N * Ho * Wo, :out_ch].reshape(N, Ho, Wo, out_ch)


def _dueling_head(feats, p, *, num_actions):
    """feats: (B, 3136) bf16 (NHWC-flattened).  Returns Q: (B, num_actions) f32."""
    B = feats.shape[0]
    fp = _pad_to(_pad_to(feats.astype(jnp.bfloat16), 1, 128), 0, 16)
    Bp = fp.shape[0]
    q = pl.pallas_call(
        functools.partial(_dueling_head_kernel, batch=B, num_actions=num_actions),
        out_shape=jax.ShapeDtypeStruct((Bp, 128), jnp.float32),
        in_specs=[pl.BlockSpec(memory_space=pltpu.MemorySpace.VMEM)] * 5,
        out_specs=pl.BlockSpec(memory_space=pltpu.MemorySpace.VMEM),
        compiler_params=pltpu.CompilerParams(vmem_limit_bytes=_VMEM_LIMIT),
    )(fp, p["hw1"], p["hb1"], p["hw2"], p["hb2"])
    return q[:B, :num_actions]


@functools.partial(jax.jit, static_argnames=("num_actions",))
def dueling_forward(prepped, x, *, num_actions=4):
    """x: (B, 4, 84, 84) float32 with values in [0, 255]. Returns (B, num_actions) f32."""
    x = jnp.transpose(x, (0, 2, 3, 1))                    # NCHW -> NHWC once at the boundary
    # out_ch constants follow the nn.Module definition (32, 64, 64).
    h = _conv2d_relu(x, prepped["c1w"], prepped["c1b"], k=8, s=4, out_ch=32)
    h = _conv2d_relu(h, prepped["c2w"], prepped["c2b"], k=4, s=2, out_ch=64)
    h = _conv2d_relu(h, prepped["c3w"], prepped["c3b"], k=3, s=1, out_ch=64)
    feats = h.reshape(h.shape[0], -1)                     # NHWC flatten; head weights pre-permuted
    return _dueling_head(feats, prepped, num_actions=num_actions)


# ----------------------------------------------------------------------------
# one-time parameter preparation (layout + fusion + constant folding)
# ----------------------------------------------------------------------------
def prepare_params(p):
    """Convert PyTorch-layout params into kernel-ready (bf16 weights, f32 biases)."""
    A = p["a2w"].shape[0]
    assert A + 1 <= 128, "num_actions must fit alongside the value column"

    def conv_w(w, scale=None):
        # (O, C, kh, kw) -> (kh*kw*C, O) matching NHWC im2col (kh, kw, C) patch order.
        O, C, kh, kw = w.shape
        m = jnp.transpose(w, (2, 3, 1, 0)).reshape(kh * kw * C, O)
        if scale is not None:
            m = m * scale
        m = _pad_to(_pad_to(m, 0, 128), 1, 128)
        return m.astype(jnp.bfloat16)

    def conv_b(b):
        return _pad_to(b.reshape(1, -1), 1, 128).astype(jnp.float32)

    out = {
        "c1w": conv_w(p["c1w"], scale=1.0 / 255.0),   # fold the model's x/255 into conv1
        "c1b": conv_b(p["c1b"]),
        "c2w": conv_w(p["c2w"]), "c2b": conv_b(p["c2b"]),
        "c3w": conv_w(p["c3w"]), "c3b": conv_b(p["c3b"]),
    }

    # Fused head layer 1: (3136, 256); cols 0:128 = value head, 128:256 = advantage head.
    F = p["v1w"].shape[1]                     # 3136
    C3 = p["c3w"].shape[0]                    # 64
    HW = F // C3                              # 49
    Hf = int(round(HW ** 0.5))                # 7
    w1 = jnp.concatenate([p["v1w"], p["a1w"]], axis=0).T          # (F, 256), rows in (c,h,w) order
    # Permute rows so NHWC-flattened features index them correctly (replaces NCHW transposes).
    perm = jnp.arange(F).reshape(C3, Hf, Hf).transpose(1, 2, 0).reshape(-1)
    w1 = _pad_to(w1[perm, :], 0, 128).astype(jnp.bfloat16)        # (3200, 256)
    b1 = jnp.concatenate([p["v1b"], p["a1b"]]).reshape(1, -1).astype(jnp.float32)

    # Fused head layer 2 as block-structured (256, 128): cols [0,A)=advantage, col A=value.
    w2 = jnp.zeros((256, 128), jnp.float32)
    w2 = w2.at[128:256, 0:A].set(p["a2w"].T)
    w2 = w2.at[0:128, A:A + 1].set(p["v2w"].T)
    b2 = jnp.zeros((1, 128), jnp.float32)
    b2 = b2.at[0, 0:A].set(p["a2b"])
    b2 = b2.at[0, A].set(p["v2b"][0])

    out.update({"hw1": w1, "hb1": b1, "hw2": w2.astype(jnp.bfloat16), "hb2": b2})
    return out


# ----------------------------------------------------------------------------
# deterministic synthetic parameters (same shapes as the nn.Module)
# ----------------------------------------------------------------------------
def init_params(key, in_channels=4, num_actions=4, fc_input_dim=3136):
    ks = jax.random.split(key, 10)

    def w(k, shape, fan_in):
        return (jax.random.normal(k, shape, jnp.float32) / jnp.sqrt(fan_in)).astype(jnp.float32)

    def b(k, shape):
        return (0.01 * jax.random.normal(k, shape, jnp.float32)).astype(jnp.float32)

    return {
        "c1w": w(ks[0], (32, in_channels, 8, 8), in_channels * 64),
        "c1b": b(ks[1], (32,)),
        "c2w": w(ks[2], (64, 32, 4, 4), 32 * 16),
        "c2b": b(ks[3], (64,)),
        "c3w": w(ks[4], (64, 64, 3, 3), 64 * 9),
        "c3b": b(ks[5], (64,)),
        "v1w": w(ks[6], (128, fc_input_dim), fc_input_dim),
        "v1b": b(ks[6], (128,)),
        "v2w": w(ks[7], (1, 128), 128),
        "v2b": b(ks[7], (1,)),
        "a1w": w(ks[8], (128, fc_input_dim), fc_input_dim),
        "a1b": b(ks[8], (128,)),
        "a2w": w(ks[9], (num_actions, 128), 128),
        "a2b": b(ks[9], (num_actions,)),
    }


if __name__ == "__main__":
    key = jax.random.PRNGKey(0)
    k_x, k_p = jax.random.split(key)
    # fc_input_dim = 3136 = 64*7*7 in the module forces an 84x84 spatial input; batch kept small.
    x = jax.random.uniform(k_x, (2, 4, 84, 84), jnp.float32, 0.0, 255.0)
    params = init_params(k_p, in_channels=4, num_actions=4)
    prepped = prepare_params(params)

    q = dueling_forward(prepped, x, num_actions=4)
    q = jax.block_until_ready(q)
    assert q.shape == (2, 4) and q.dtype == jnp.float32
    assert bool(jnp.all(jnp.isfinite(q)))
    print("KERNEL_OK")
</pallas_src>

<mosaic_0001>
module attributes {stable_mosaic.version = 11 : i64} {
  func.func @_matmul_bias_relu_kernel(%arg0: i32, %arg1: memref<256x256xbf16, #tpu.memory_space<vmem>>, %arg2: memref<256x128xbf16, #tpu.memory_space<vmem>>, %arg3: memref<1x128xf32, #tpu.memory_space<vmem>>, %arg4: memref<256x128xbf16, #tpu.memory_space<vmem>>) attributes {dimension_semantics = [#tpu.dimension_semantics<parallel>], iteration_bounds = array<i64: 4>, scalar_prefetch = 0 : i64, scratch_operands = 0 : i64, tpu.core_type = #tpu.core_type<tc>, window_params = [{transform_indices = @transform_0, window_bounds = array<i64: 256, 256>}, {pipeline_mode = #tpu.pipeline_mode<synchronous>, transform_indices = @transform_1, window_bounds = array<i64: 256, 128>}, {pipeline_mode = #tpu.pipeline_mode<synchronous>, transform_indices = @transform_2, window_bounds = array<i64: 1, 128>}, {transform_indices = @transform_3, window_bounds = array<i64: 256, 128>}]} {
    %c0 = arith.constant 0 : index
    %c0_0 = arith.constant 0 : index
    %0 = vector.load %arg1[%c0, %c0_0] : memref<256x256xbf16, #tpu.memory_space<vmem>>, vector<256x256xbf16>
    %c0_1 = arith.constant 0 : index
    %c0_2 = arith.constant 0 : index
    %1 = vector.load %arg2[%c0_1, %c0_2] : memref<256x128xbf16, #tpu.memory_space<vmem>>, vector<256x128xbf16>
    %cst = arith.constant dense<0.000000e+00> : vector<256x128xf32>
    %2 = tpu.matmul %0, %1, %cst {dimension_numbers = #tpu.dot_dimension_numbers<[1], [0], [0], [1], [0, 0, 1, 1], [], []>} : vector<256x256xbf16>, vector<256x128xbf16>, vector<256x128xf32> -> vector<256x128xf32>
    %c0_3 = arith.constant 0 : index
    %c0_4 = arith.constant 0 : index
    %3 = vector.load %arg3[%c0_3, %c0_4] : memref<1x128xf32, #tpu.memory_space<vmem>>, vector<1x128xf32>
    %4 = vector.broadcast %3 : vector<1x128xf32> to vector<256x128xf32>
    %5 = arith.addf %2, %4 : vector<256x128xf32>
    %cst_5 = arith.constant 0.000000e+00 : f32
    %6 = vector.broadcast %cst_5 : f32 to vector<256x128xf32>
    %7 = arith.maximumf %5, %6 : vector<256x128xf32>
    %8 = arith.truncf %7 : vector<256x128xf32> to vector<256x128xbf16>
    %c0_6 = arith.constant 0 : index
    %c0_7 = arith.constant 0 : index
    %9 = vector.load %arg4[%c0_6, %c0_7] : memref<256x128xbf16, #tpu.memory_space<vmem>>, vector<256x128xbf16>
    tpu.vector_store %arg4[%c0_6, %c0_7], %8 {strides = array<i32>} : memref<256x128xbf16, #tpu.memory_space<vmem>>, vector<256x128xbf16>,
    return
  }
  func.func @transform_0(%arg0: i32) -> (i32, i32) {
    %c0_i32 = arith.constant 0 : i32
    %c0_i32_0 = arith.constant 0 : i32
    return %arg0, %c0_i32 : i32, i32
  }
  func.func @transform_1(%arg0: i32) -> (i32, i32) {
    %c0_i32 = arith.constant 0 : i32
    %c0_i32_0 = arith.constant 0 : i32
    %c0_i32_1 = arith.constant 0 : i32
    return %c0_i32, %c0_i32_0 : i32, i32
  }
  func.func @transform_2(%arg0: i32) -> (i32, i32) {
    %c0_i32 = arith.constant 0 : i32
    %c0_i32_0 = arith.constant 0 : i32
    %c0_i32_1 = arith.constant 0 : i32
    return %c0_i32, %c0_i32_0 : i32, i32
  }
  func.func @transform_3(%arg0: i32) -> (i32, i32) {
    %c0_i32 = arith.constant 0 : i32
    %c0_i32_0 = arith.constant 0 : i32
    return %arg0, %c0_i32 : i32, i32
  }
}

module attributes {stable_mosaic.version = 11 : i64} {
  func.func @_matmul_bias_relu_kernel(%arg0: i32, %arg1: memref<256x512xbf16, #tpu.memory_space<vmem>>, %arg2: memref<512x128xbf16, #tpu.memory_space<vmem>>, %arg3: memref<1x128xf32, #tpu.memory_space<vmem>>, %arg4: memref<256x128xbf16, #tpu.memory_space<vmem>>) attributes {dimension_semantics = [#tpu.dimension_semantics<parallel>], iteration_bounds = array<i64: 1>, scalar_prefetch = 0 : i64, scratch_operands = 0 : i64, tpu.core_type = #tpu.core_type<tc>, window_params = [{transform_indices = @transform_0, window_bounds = array<i64: 256, 512>}, {pipeline_mode = #tpu.pipeline_mode<synchronous>, transform_indices = @transform_1, window_bounds = array<i64: 512, 128>}, {pipeline_mode = #tpu.pipeline_mode<synchronous>, transform_indices = @transform_2, window_bounds = array<i64: 1, 128>}, {transform_indices = @transform_3, window_bounds = array<i64: 256, 128>}]} {
    %c0 = arith.constant 0 : index
    %c0_0 = arith.constant 0 : index
    %0 = vector.load %arg1[%c0, %c0_0] : memref<256x512xbf16, #tpu.memory_space<vmem>>, vector<256x512xbf16>
    %c0_1 = arith.constant 0 : index
    %c0_2 = arith.constant 0 : index
    %1 = vector.load %arg2[%c0_1, %c0_2] : memref<512x128xbf16, #tpu.memory_space<vmem>>, vector<512x128xbf16>
    %cst = arith.constant dense<0.000000e+00> : vector<256x128xf32>
    %2 = tpu.matmul %0, %1, %cst {dimension_numbers = #tpu.dot_dimension_numbers<[1], [0], [0], [1], [0, 0, 1, 1], [], []>} : vector<256x512xbf16>, vector<512x128xbf16>, vector<256x128xf32> -> vector<256x128xf32>
    %c0_3 = arith.constant 0 : index
    %c0_4 = arith.constant 0 : index
    %3 = vector.load %arg3[%c0_3, %c0_4] : memref<1x128xf32, #tpu.memory_space<vmem>>, vector<1x128xf32>
    %4 = vector.broadcast %3 : vector<1x128xf32> to vector<256x128xf32>
    %5 = arith.addf %2, %4 : vector<256x128xf32>
    %cst_5 = arith.constant 0.000000e+00 : f32
    %6 = vector.broadcast %cst_5 : f32 to vector<256x128xf32>
    %7 = arith.maximumf %5, %6 : vector<256x128xf32>
    %8 = arith.truncf %7 : vector<256x128xf32> to vector<256x128xbf16>
    %c0_6 = arith.constant 0 : index
    %c0_7 = arith.constant 0 : index
    %9 = vector.load %arg4[%c0_6, %c0_7] : memref<256x128xbf16, #tpu.memory_space<vmem>>, vector<256x128xbf16>
    tpu.vector_store %arg4[%c0_6, %c0_7], %8 {strides = array<i32>} : memref<256x128xbf16, #tpu.memory_space<vmem>>, vector<256x128xbf16>,
    return
  }
  func.func @transform_0(%arg0: i32) -> (i32, i32) {
    %c0_i32 = arith.constant 0 : i32
    %c0_i32_0 = arith.constant 0 : i32
    return %arg0, %c0_i32 : i32, i32
  }
  func.func @transform_1(%arg0: i32) -> (i32, i32) {
    %c0_i32 = arith.constant 0 : i32
    %c0_i32_0 = arith.constant 0 : i32
    %c0_i32_1 = arith.constant 0 : i32
    return %c0_i32, %c0_i32_0 : i32, i32
  }
  func.func @transform_2(%arg0: i32) -> (i32, i32) {
    %c0_i32 = arith.constant 0 : i32
    %c0_i32_0 = arith.constant 0 : i32
    %c0_i32_1 = arith.constant 0 : i32
    return %c0_i32, %c0_i32_0 : i32, i32
  }
  func.func @transform_3(%arg0: i32) -> (i32, i32) {
    %c0_i32 = arith.constant 0 : i32
    %c0_i32_0 = arith.constant 0 : i32
    return %arg0, %c0_i32 : i32, i32
  }
}

module attributes {stable_mosaic.version = 11 : i64} {
  func.func @_matmul_bias_relu_kernel(%arg0: i32, %arg1: memref<256x640xbf16, #tpu.memory_space<vmem>>, %arg2: memref<640x128xbf16, #tpu.memory_space<vmem>>, %arg3: memref<1x128xf32, #tpu.memory_space<vmem>>, %arg4: memref<256x128xbf16, #tpu.memory_space<vmem>>) attributes {dimension_semantics = [#tpu.dimension_semantics<parallel>], iteration_bounds = array<i64: 1>, scalar_prefetch = 0 : i64, scratch_operands = 0 : i64, tpu.core_type = #tpu.core_type<tc>, window_params = [{transform_indices = @transform_0, window_bounds = array<i64: 256, 640>}, {pipeline_mode = #tpu.pipeline_mode<synchronous>, transform_indices = @transform_1, window_bounds = array<i64: 640, 128>}, {pipeline_mode = #tpu.pipeline_mode<synchronous>, transform_indices = @transform_2, window_bounds = array<i64: 1, 128>}, {transform_indices = @transform_3, window_bounds = array<i64: 256, 128>}]} {
    %c0 = arith.constant 0 : index
    %c0_0 = arith.constant 0 : index
    %0 = vector.load %arg1[%c0, %c0_0] : memref<256x640xbf16, #tpu.memory_space<vmem>>, vector<256x640xbf16>
    %c0_1 = arith.constant 0 : index
    %c0_2 = arith.constant 0 : index
    %1 = vector.load %arg2[%c0_1, %c0_2] : memref<640x128xbf16, #tpu.memory_space<vmem>>, vector<640x128xbf16>
    %cst = arith.constant dense<0.000000e+00> : vector<256x128xf32>
    %2 = tpu.matmul %0, %1, %cst {dimension_numbers = #tpu.dot_dimension_numbers<[1], [0], [0], [1], [0, 0, 1, 1], [], []>} : vector<256x640xbf16>, vector<640x128xbf16>, vector<256x128xf32> -> vector<256x128xf32>
    %c0_3 = arith.constant 0 : index
    %c0_4 = arith.constant 0 : index
    %3 = vector.load %arg3[%c0_3, %c0_4] : memref<1x128xf32, #tpu.memory_space<vmem>>, vector<1x128xf32>
    %4 = vector.broadcast %3 : vector<1x128xf32> to vector<256x128xf32>
    %5 = arith.addf %2, %4 : vector<256x128xf32>
    %cst_5 = arith.constant 0.000000e+00 : f32
    %6 = vector.broadcast %cst_5 : f32 to vector<256x128xf32>
    %7 = arith.maximumf %5, %6 : vector<256x128xf32>
    %8 = arith.truncf %7 : vector<256x128xf32> to vector<256x128xbf16>
    %c0_6 = arith.constant 0 : index
    %c0_7 = arith.constant 0 : index
    %9 = vector.load %arg4[%c0_6, %c0_7] : memref<256x128xbf16, #tpu.memory_space<vmem>>, vector<256x128xbf16>
    tpu.vector_store %arg4[%c0_6, %c0_7], %8 {strides = array<i32>} : memref<256x128xbf16, #tpu.memory_space<vmem>>, vector<256x128xbf16>,
    return
  }
  func.func @transform_0(%arg0: i32) -> (i32, i32) {
    %c0_i32 = arith.constant 0 : i32
    %c0_i32_0 = arith.constant 0 : i32
    return %arg0, %c0_i32 : i32, i32
  }
  func.func @transform_1(%arg0: i32) -> (i32, i32) {
    %c0_i32 = arith.constant 0 : i32
    %c0_i32_0 = arith.constant 0 : i32
    %c0_i32_1 = arith.constant 0 : i32
    return %c0_i32, %c0_i32_0 : i32, i32
  }
  func.func @transform_2(%arg0: i32) -> (i32, i32) {
    %c0_i32 = arith.constant 0 : i32
    %c0_i32_0 = arith.constant 0 : i32
    %c0_i32_1 = arith.constant 0 : i32
    return %c0_i32, %c0_i32_0 : i32, i32
  }
  func.func @transform_3(%arg0: i32) -> (i32, i32) {
    %c0_i32 = arith.constant 0 : i32
    %c0_i32_0 = arith.constant 0 : i32
    return %arg0, %c0_i32 : i32, i32
  }
}

module attributes {stable_mosaic.version = 11 : i64} {
  func.func @_dueling_head_kernel(%arg0: memref<16x3200xbf16, #tpu.memory_space<vmem>>, %arg1: memref<3200x256xbf16, #tpu.memory_space<vmem>>, %arg2: memref<1x256xf32, #tpu.memory_space<vmem>>, %arg3: memref<256x128xbf16, #tpu.memory_space<vmem>>, %arg4: memref<1x128xf32, #tpu.memory_space<vmem>>, %arg5: memref<16x128xf32, #tpu.memory_space<vmem>>) attributes {dimension_semantics = [], scalar_prefetch = 0 : i64, scratch_operands = 0 : i64, tpu.core_type = #tpu.core_type<tc>} {
    %c0 = arith.constant 0 : index
    %c0_0 = arith.constant 0 : index
    %0 = vector.load %arg0[%c0, %c0_0] : memref<16x3200xbf16, #tpu.memory_space<vmem>>, vector<16x3200xbf16>
    %c0_1 = arith.constant 0 : index
    %c0_2 = arith.constant 0 : index
    %1 = vector.load %arg1[%c0_1, %c0_2] : memref<3200x256xbf16, #tpu.memory_space<vmem>>, vector<3200x256xbf16>
    %cst = arith.constant dense<0.000000e+00> : vector<16x256xf32>
    %2 = tpu.matmul %0, %1, %cst {dimension_numbers = #tpu.dot_dimension_numbers<[1], [0], [0], [1], [0, 0, 1, 1], [], []>} : vector<16x3200xbf16>, vector<3200x256xbf16>, vector<16x256xf32> -> vector<16x256xf32>
    %c0_3 = arith.constant 0 : index
    %c0_4 = arith.constant 0 : index
    %3 = vector.load %arg2[%c0_3, %c0_4] : memref<1x256xf32, #tpu.memory_space<vmem>>, vector<1x256xf32>
    %4 = vector.broadcast %3 : vector<1x256xf32> to vector<16x256xf32>
    %5 = arith.addf %2, %4 : vector<16x256xf32>
    %cst_5 = arith.constant 0.000000e+00 : f32
    %6 = vector.broadcast %cst_5 : f32 to vector<16x256xf32>
    %7 = arith.maximumf %5, %6 : vector<16x256xf32>
    %8 = arith.truncf %7 : vector<16x256xf32> to vector<16x256xbf16>
    %c0_6 = arith.constant 0 : index
    %c0_7 = arith.constant 0 : index
    %9 = vector.load %arg3[%c0_6, %c0_7] : memref<256x128xbf16, #tpu.memory_space<vmem>>, vector<256x128xbf16>
    %cst_8 = arith.constant dense<0.000000e+00> : vector<16x128xf32>
    %10 = tpu.matmul %8, %9, %cst_8 {dimension_numbers = #tpu.dot_dimension_numbers<[1], [0], [0], [1], [0, 0, 1, 1], [], []>} : vector<16x256xbf16>, vector<256x128xbf16>, vector<16x128xf32> -> vector<16x128xf32>
    %c0_9 = arith.constant 0 : index
    %c0_10 = arith.constant 0 : index
    %11 = vector.load %arg4[%c0_9, %c0_10] : memref<1x128xf32, #tpu.memory_space<vmem>>, vector<1x128xf32>
    %12 = vector.broadcast %11 : vector<1x128xf32> to vector<16x128xf32>
    %13 = arith.addf %10, %12 : vector<16x128xf32>
    %14 = tpu.iota {dimensions = array<i32: 0>} : vector<16x128xi32>
    %15 = tpu.iota {dimensions = array<i32: 1>} : vector<16x128xi32>
    %c2_i32 = arith.constant 2 : i32
    %16 = vector.broadcast %c2_i32 : i32 to vector<16x128xi32>
    %17 = arith.cmpi slt, %14, %16 : vector<16x128xi32>
    %c4_i32 = arith.constant 4 : i32
    %18 = vector.broadcast %c4_i32 : i32 to vector<16x128xi32>
    %19 = arith.cmpi slt, %15, %18 : vector<16x128xi32>
    %20 = arith.andi %17, %19 : vector<16x128xi1>
    %cst_11 = arith.constant 0.000000e+00 : f32
    %21 = vector.broadcast %cst_11 : f32 to vector<16x128xf32>
    %22 = arith.select %20, %13, %21 : vector<16x128xi1>, vector<16x128xf32>
    %23 = vector.shape_cast %22 : vector<16x128xf32> to vector<1x16x128xf32>
    %cst_12 = arith.constant dense<0.000000e+00> : vector<1xf32>
    %24 = vector.multi_reduction <add>, %23, %cst_12 [1, 2] : vector<1x16x128xf32> to vector<1xf32>
    %25 = vector.shape_cast %24 : vector<1xf32> to vector<1x1x1xf32>
    %26 = vector.extract %25[0, 0, 0] : f32 from vector<1x1x1xf32>
    %cst_13 = arith.constant 1.250000e-01 : f32
    %27 = arith.mulf %26, %cst_13 : f32
    %c4_i32_14 = arith.constant 4 : i32
    %28 = vector.broadcast %c4_i32_14 : i32 to vector<16x128xi32>
    %29 = arith.cmpi eq, %15, %28 : vector<16x128xi32>
    %cst_15 = arith.constant 0.000000e+00 : f32
    %30 = vector.broadcast %cst_15 : f32 to vector<16x128xf32>
    %31 = arith.select %29, %13, %30 : vector<16x128xi1>, vector<16x128xf32>
    %cst_16 = arith.constant dense<0.000000e+00> : vector<16xf32>
    %32 = vector.multi_reduction <add>, %31, %cst_16 [1] : vector<16x128xf32> to vector<16xf32>
    %33 = vector.shape_cast %32 : vector<16xf32> to vector<16x1xf32>
    %34 = vector.broadcast %27 : f32 to vector<16x128xf32>
    %35 = arith.subf %13, %34 : vector<16x128xf32>
    %36 = vector.broadcast %33 : vector<16x1xf32> to vector<16x128xf32>
    %37 = arith.addf %36, %35 : vector<16x128xf32>
    %c0_17 = arith.constant 0 : index
    %c0_18 = arith.constant 0 : index
    %38 = vector.load %arg5[%c0_17, %c0_18] : memref<16x128xf32, #tpu.memory_space<vmem>>, vector<16x128xf32>
    tpu.vector_store %arg5[%c0_17, %c0_18], %37 {strides = array<i32>} : memref<16x128xf32, #tpu.memory_space<vmem>>, vector<16x128xf32>,
    return
  }
}

</mosaic_0001>

<bundles_post_ra>
// kernel: dueling_forward.4
= control target key start
LH: loop header
LB: loop body
LE: loop exit
PB: predicated region body
PF: predicated region fallthrough
CT: control target
= control target key end

     0   :  { %s1363_s12 = smov 0   ;;  %s1521_s0 = inlined_call_operand.vmem [shape: bf16[1024,256], index: 0, kind: input, shape index: {}]   ;;  %s1522_s1 = inlined_call_operand.vmem [shape: bf16[256,128], index: 1, kind: input, shape index: {}]   ;;  %s1523_s2 = inlined_call_operand.vmem [shape: f32[1,128], index: 2, kind: input, shape index: {}]   ;;  %s1524_s3 = inlined_call_operand.vmem [shape: bf16[1024,128], index: 3, kind: output, shape index: {}]  }
   0x1 LB: > { %s914_s13 = sadd.s32 4294967295, %s1341_s12   ;;  %p918_p0 = scmp.ge.s32.totalorder %s1341_s12, 1  ;;  %s1341_s12 = sphi %s1363_s12, %s13_s12  }
   0x2   : > { %p139_p1 = scmp.lt.s32.totalorder %s1341_s12, 5 }
   0x4   : > { %p140_p2 = pnand %p918_p0, %p139_p1 }
   0x5   : > { %v1271_v0 = vld [vmem:[%s1522_s1 + $0x40] sm:$0xff] (!%p140_p2)   ;;  %s919_s16 = sshll.u32 (!%p140_p2), %s914_s13, 5  ;;  %v1273_v2 = vld [vmem:[%s1522_s1 + $0x48] sm:$0xff] (!%p140_p2)   ;;  %v1275_v4 = vld [vmem:[%s1522_s1 + $0x50] sm:$0xff] (!%p140_p2)  }
   0x6   : > { %143 = sbr.rel (%p140_p2) target bundleno = 319 (0x13f), region = 32  ;;  %v1272_v1 = vld [vmem:[%s1522_s1] sm:$0xff] (!%p140_p2)   ;;  %1135 = vmatprep.subr.bf16.mxu0 (!%p140_p2), %v1271_v0  ;;  %1247 = vmatprep.subr.bf16.mxu1 (!%p140_p2), %v1271_v0  ;;  %v1274_v3 = vld [vmem:[%s1522_s1 + $0x8] sm:$0xff] (!%p140_p2)   ;;  %p165_p3 = scmp.lt.s32.totalorder (!%p140_p2), %s919_s16, 127  ;;  %v1276_v5 = vld [vmem:[%s1522_s1 + $0x10] sm:$0xff] (!%p140_p2)  }
   0x7   : > { %1136 = vmatpush3.bf16.msra.mxu0 (!%p140_p2), %v1272_v1  ;;  %1255 = vmatpush3.bf16.msra.mxu1 (!%p140_p2), %v1272_v1  ;;  %v1277_v6 = vld [vmem:[%s1522_s1 + $0x58] sm:$0xff] (!%p140_p2)   ;;  %v1279_v8 = vld [vmem:[%s1522_s1 + $0x60] sm:$0xff] (!%p140_p2)   ;;  %v1281_v10 = vld [vmem:[%s1522_s1 + $0x68] sm:$0xff] (!%p140_p2)  }
   0x8   : > { %1137 = vmatprep.subr.bf16.mxu0 (!%p140_p2), %v1273_v2  ;;  %1248 = vmatprep.subr.bf16.mxu1 (!%p140_p2), %v1273_v2  ;;  %v1278_v7 = vld [vmem:[%s1522_s1 + $0x18] sm:$0xff] (!%p140_p2)   ;;  %v1280_v9 = vld [vmem:[%s1522_s1 + $0x20] sm:$0xff] (!%p140_p2)   ;;  %v1282_v13 = vld [vmem:[%s1522_s1 + $0x28] sm:$0xff] (!%p140_p2)  }
   0x9   : > { %v1283_v14 = vld [vmem:[%s1522_s1 + $0x70] sm:$0xff] (!%p140_p2)   ;;  %v1285_v16 = vld [vmem:[%s1522_s1 + $0x78] sm:$0xff] (!%p140_p2)   ;;  %v1462_v50 = vld [vmem:[%s1523_s2] ss:$0 sm:$0xff] (!%p140_p2) }
   0xa   : > { %v1284_v15 = vld [vmem:[%s1522_s1 + $0x30] sm:$0xff] (!%p140_p2)   ;;  %v1286_v17 = vld [vmem:[%s1522_s1 + $0x38] sm:$0xff] (!%p140_p2)  }
   0xb   : > { %1138 = vmatpush3.bf16.msra.mxu0 (!%p140_p2), %v1274_v3  ;;  %1256 = vmatpush3.bf16.msra.mxu1 (!%p140_p2), %v1274_v3 }
   0xc   : > { %1139 = vmatprep.subr.bf16.mxu0 (!%p140_p2), %v1275_v4  ;;  %1249 = vmatprep.subr.bf16.mxu1 (!%p140_p2), %v1275_v4 }
   0xd   : > { %s1526_s16 = smov (!%p165_p3, %s919_s16), 127 }
   0xe   : > { %s1007_s4 = sshll.u32 %s1526_s16, 3  ;;  %s923_s28 = sshll.u32 %s1526_s16, 2 }
   0xf   : > { %1140 = vmatpush3.bf16.msra.mxu0 %v1276_v5  ;;  %1257 = vmatpush3.bf16.msra.mxu1 %v1276_v5  ;;  %s1404_s9 = scalar_lea.vmem %s1521_s0, %s1007_s4  ;;  %s1472_s4 = scalar_lea.vmem %s1524_s3, %s923_s28 }
  0x10   : > { %1141 = vmatprep.subr.bf16.mxu0 %v1277_v6  ;;  %1250 = vmatprep.subr.bf16.mxu1 %v1277_v6  ;;  %v1289_v11 = vld [vmem:[%s1404_s9 + $0x4] ss:$8 sps:$4 sm:$0xff]   ;;  %v1287_v18 = vld [vmem:[%s1404_s9] ss:$8 sps:$4 sm:$0xff]   ;;  %v1293_v20 = vld [vmem:[%s1404_s9 + $0x14] ss:$8 sps:$4 sm:$0xff]  }
  0x11   : > { %v1292_v12 = vld [vmem:[%s1404_s9 + $0x84] ss:$8 sps:$4 sm:$0xff]   ;;  %537 = vmatprep.mubr.bf16.mxu0 %v1289_v11  ;;  %v1290_v19 = vld [vmem:[%s1404_s9 + $0x80] ss:$8 sps:$4 sm:$0xff]   ;;  %v1295_v21 = vld [vmem:[%s1404_s9 + $0x94] ss:$8 sps:$4 sm:$0xff]  }
  0x12   : > { %601 = vmatprep.mubr.bf16.mxu1 %v1292_v12  ;;  %v1297_v22 = vld [vmem:[%s1404_s9 + $0x10] ss:$8 sps:$4 sm:$0xff]   ;;  %v1299_v24 = vld [vmem:[%s1404_s9 + $0x24] ss:$8 sps:$4 sm:$0xff]   ;;  %v1303_v26 = vld [vmem:[%s1404_s9 + $0x20] ss:$8 sps:$4 sm:$0xff]  }
  0x13   : > { %1142 = vmatpush3.bf16.msra.mxu0 %v1278_v7  ;;  %1258 = vmatpush3.bf16.msra.mxu1 %v1278_v7  ;;  %v1298_v23 = vld [vmem:[%s1404_s9 + $0x90] ss:$8 sps:$4 sm:$0xff]   ;;  %v1301_v25 = vld [vmem:[%s1404_s9 + $0xa4] ss:$8 sps:$4 sm:$0xff]   ;;  %v1304_v27 = vld [vmem:[%s1404_s9 + $0xa0] ss:$8 sps:$4 sm:$0xff]  }
  0x14   : > { %1143 = vmatprep.subr.bf16.mxu0 %v1279_v8  ;;  %1251 = vmatprep.subr.bf16.mxu1 %v1279_v8  ;;  %v1305_v28 = vld [vmem:[%s1404_s9 + $0x34] ss:$8 sps:$4 sm:$0xff]   ;;  %v1309_v30 = vld [vmem:[%s1404_s9 + $0x30] ss:$8 sps:$4 sm:$0xff]   ;;  %v1311_v32 = vld [vmem:[%s1404_s9 + $0x44] ss:$8 sps:$4 sm:$0xff]  }
  0x15   : > { %v1307_v29 = vld [vmem:[%s1404_s9 + $0xb4] ss:$8 sps:$4 sm:$0xff]   ;;  %v1310_v31 = vld [vmem:[%s1404_s9 + $0xb0] ss:$8 sps:$4 sm:$0xff]   ;;  %v1313_v33 = vld [vmem:[%s1404_s9 + $0xc4] ss:$8 sps:$4 sm:$0xff]  }
  0x16   : > { %v1315_v34 = vld [vmem:[%s1404_s9 + $0x40] ss:$8 sps:$4 sm:$0xff]   ;;  %v1317_v36 = vld [vmem:[%s1404_s9 + $0x54] ss:$8 sps:$4 sm:$0xff]   ;;  %v1321_v38 = vld [vmem:[%s1404_s9 + $0x50] ss:$8 sps:$4 sm:$0xff]  }
  0x17   : > { %1144 = vmatpush3.bf16.msra.mxu0 %v1280_v9  ;;  %1259 = vmatpush3.bf16.msra.mxu1 %v1280_v9  ;;  %v1316_v35 = vld [vmem:[%s1404_s9 + $0xc0] ss:$8 sps:$4 sm:$0xff]   ;;  %v1319_v37 = vld [vmem:[%s1404_s9 + $0xd4] ss:$8 sps:$4 sm:$0xff]   ;;  %v1322_v39 = vld [vmem:[%s1404_s9 + $0xd0] ss:$8 sps:$4 sm:$0xff]  }
  0x18   : > { %1145 = vmatprep.subr.bf16.mxu0 %v1281_v10  ;;  %1252 = vmatprep.subr.bf16.mxu1 %v1281_v10  ;;  %v1323_v40 = vld [vmem:[%s1404_s9 + $0x64] ss:$8 sps:$4 sm:$0xff]   ;;  %v1327_v42 = vld [vmem:[%s1404_s9 + $0x60] ss:$8 sps:$4 sm:$0xff]   ;;  %v1329_v44 = vld [vmem:[%s1404_s9 + $0x74] ss:$8 sps:$4 sm:$0xff]  }
  0x19   : > { %v1325_v41 = vld [vmem:[%s1404_s9 + $0xe4] ss:$8 sps:$4 sm:$0xff]   ;;  %v1328_v43 = vld [vmem:[%s1404_s9 + $0xe0] ss:$8 sps:$4 sm:$0xff]   ;;  %v1331_v45 = vld [vmem:[%s1404_s9 + $0xf4] ss:$8 sps:$4 sm:$0xff]  }
  0x1a   : > { %v1333_v46 = vld [vmem:[%s1404_s9 + $0x70] ss:$8 sps:$4 sm:$0xff]  }
  0x1b   : > { %1146 = vmatpush3.bf16.msra.mxu0 %v1282_v13  ;;  %1260 = vmatpush3.bf16.msra.mxu1 %v1282_v13  ;;  %v1334_v47 = vld [vmem:[%s1404_s9 + $0xf0] ss:$8 sps:$4 sm:$0xff]  }
  0x1c   : > { %1147 = vmatprep.subr.bf16.mxu0 %v1283_v14  ;;  %1253 = vmatprep.subr.bf16.mxu1 %v1283_v14 }
  0x1f   : > { %1148 = vmatpush3.bf16.msra.mxu0 %v1284_v15  ;;  %1261 = vmatpush3.bf16.msra.mxu1 %v1284_v15 }
  0x20   : > { %1149 = vmatprep.subr.bf16.mxu0 %v1285_v16  ;;  %1254 = vmatprep.subr.bf16.mxu1 %v1285_v16 }
  0x23   : > { %1150 = vmatpush3.bf16.msra.mxu0 %v1286_v17  ;;  %1262 = vmatpush3.bf16.msra.mxu1 %v1286_v17 }
  0x26   : > { %538 = vmatmul.mubr.bf16.vlgmr.msra.gmra.mrb[0].mxu0 %v1287_v18  ;;  %602 = vmatmul.mubr.bf16.vlgmr.msra.gmra.mrb[0].mxu1 %v1290_v19 }
  0x27   : > { %545 = vmatprep.mubr.bf16.mxu0 %v1293_v20  ;;  %609 = vmatprep.mubr.bf16.mxu1 %v1295_v21 }
  0x2e   : > { %546 = vmatmul.mubr.bf16.gmra.mrb[4].mxu0 %v1297_v22  ;;  %610 = vmatmul.mubr.bf16.gmra.mrb[4].mxu1 %v1298_v23 }
  0x2f   : > { %553 = vmatprep.mubr.bf16.mxu0 %v1299_v24  ;;  %617 = vmatprep.mubr.bf16.mxu1 %v1301_v25 }
  0x36   : > { %554 = vmatmul.mubr.bf16.gmra.mrb[8].mxu0 %v1303_v26  ;;  %618 = vmatmul.mubr.bf16.gmra.mrb[8].mxu1 %v1304_v27 }
  0x37   : > { %561 = vmatprep.mubr.bf16.mxu0 %v1305_v28  ;;  %625 = vmatprep.mubr.bf16.mxu1 %v1307_v29 }
  0x3e   : > { %562 = vmatmul.mubr.bf16.gmra.mrb[12].mxu0 %v1309_v30  ;;  %626 = vmatmul.mubr.bf16.gmra.mrb[12].mxu1 %v1310_v31 }
  0x3f   : > { %569 = vmatprep.mubr.bf16.mxu0 %v1311_v32  ;;  %633 = vmatprep.mubr.bf16.mxu1 %v1313_v33 }
  0x46   : > { %570 = vmatmul.mubr.bf16.gmra.mrb[16].mxu0 %v1315_v34  ;;  %634 = vmatmul.mubr.bf16.gmra.mrb[16].mxu1 %v1316_v35 }
  0x47   : > { %577 = vmatprep.mubr.bf16.mxu0 %v1317_v36  ;;  %641 = vmatprep.mubr.bf16.mxu1 %v1319_v37 }
  0x4e   : > { %578 = vmatmul.mubr.bf16.gmra.mrb[20].mxu0 %v1321_v38  ;;  %642 = vmatmul.mubr.bf16.gmra.mrb[20].mxu1 %v1322_v39 }
  0x4f   : > { %585 = vmatprep.mubr.bf16.mxu0 %v1323_v40  ;;  %649 = vmatprep.mubr.bf16.mxu1 %v1325_v41 }
  0x56   : > { %586 = vmatmul.mubr.bf16.gmra.mrb[24].mxu0 %v1327_v42  ;;  %650 = vmatmul.mubr.bf16.gmra.mrb[24].mxu1 %v1328_v43 }
  0x57   : > { %593 = vmatprep.mubr.bf16.mxu0 %v1329_v44  ;;  %657 = vmatprep.mubr.bf16.mxu1 %v1331_v45 }
  0x5e   : > { %594 = vmatmul.mubr.bf16.gmra.mrb[28].mxu0 %v1333_v46  ;;  %658 = vmatmul.mubr.bf16.gmra.mrb[28].mxu1 %v1334_v47 }
  0xf9   : > { %v1151_v48 = vpop.f32.mrb[0].mxu0  ;;  %v1199_v49 = vpop.f32.mrb[0].mxu1 }
  0xfa   : > { %v1152_v51 = vpop.f32.mrb[1].mxu0  ;;  %v1200_v52 = vpop.f32.mrb[1].mxu1 }
  0xfb   : > { %v1153_v53 = vadd.f32 %v1152_v51, %v1151_v48  ;;  %v1201_v54 = vadd.f32 %v1200_v52, %v1199_v49  ;;  %v1154_v55 = vpop.f32.mrb[2].mxu0  ;;  %v1202_v56 = vpop.f32.mrb[2].mxu1 }
  0xfc   : > { %v1155_v57 = vpop.f32.mrb[3].mxu0  ;;  %v1203_v58 = vpop.f32.mrb[3].mxu1 }
  0xfd   : > { %v540_v59 = vadd.f32 %v1153_v53, %v1462_v50  ;;  %v604_v60 = vadd.f32 %v1201_v54, %v1462_v50  ;;  %v1156_v61 = vadd.f32 %v1155_v57, %v1154_v55  ;;  %v1204_v62 = vadd.f32 %v1203_v58, %v1202_v56 }
  0xff   : > { %v543_v63 = vadd.f32 %v1156_v61, %v1462_v50  ;;  %v607_v0 = vadd.f32 %v1204_v62, %v1462_v50  ;;  %v666_v1 = vmax.f32 %v540_v59, 0.0  ;;  %v682_v2 = vmax.f32 %v604_v60, 0.0 }
 0x101   : > { %v667_v3 = vmax.f32 %v543_v63, 0.0  ;;  %v683_v4 = vmax.f32 %v607_v0, 0.0  ;;  %v1157_v5 = vpop.f32.mrb[4].mxu0  ;;  %v1205_v6 = vpop.f32.mrb[4].mxu1 }
 0x102   : > { %v1158_v7 = vpop.f32.mrb[5].mxu0  ;;  %v1206_v8 = vpop.f32.mrb[5].mxu1 }
 0x103   : > { %v1043_v9 = vpack.c.bf16 %v667_v3, %v666_v1  ;;  %v1083_v10 = vpack.c.bf16 %v683_v4, %v682_v2  ;;  %v1159_v11 = vadd.f32 %v1158_v7, %v1157_v5  ;;  %v1207_v12 = vadd.f32 %v1206_v8, %v1205_v6  ;;  %v1160_v13 = vpop.f32.mrb[6].mxu0  ;;  %v1208_v14 = vpop.f32.mrb[6].mxu1 }
 0x104   : > { %v1161_v15 = vpop.f32.mrb[7].mxu0  ;;  %v1209_v16 = vpop.f32.mrb[7].mxu1 }
 0x105   : > { %1044 = vst [vmem:[%s1472_s4] sm:$0xff] %v1043_v9   ;;  %1127 = vst [vmem:[%s1472_s4 + $0x40] sm:$0xff] %v1083_v10   ;;  %v548_v17 = vadd.f32 %v1159_v11, %v1462_v50  ;;  %v612_v18 = vadd.f32 %v1207_v12, %v1462_v50  ;;  %v1162_v19 = vadd.f32 %v1161_v15, %v1160_v13 }
 0x106   : > { %v1210_v20 = vadd.f32 %v1209_v16, %v1208_v14 }
 0x107   : > { %v551_v21 = vadd.f32 %v1162_v19, %v1462_v50  ;;  %v668_v23 = vmax.f32 %v548_v17, 0.0  ;;  %v684_v24 = vmax.f32 %v612_v18, 0.0 }
 0x108   : > { %v615_v22 = vadd.f32 %v1210_v20, %v1462_v50 }
 0x109   : > { %v669_v25 = vmax.f32 %v551_v21, 0.0  ;;  %v1163_v27 = vpop.f32.mrb[8].mxu0  ;;  %v1211_v28 = vpop.f32.mrb[8].mxu1 }
 0x10a   : > { %v685_v26 = vmax.f32 %v615_v22, 0.0  ;;  %v1164_v29 = vpop.f32.mrb[9].mxu0  ;;  %v1212_v30 = vpop.f32.mrb[9].mxu1 }
 0x10b   : > { %v1048_v31 = vpack.c.bf16 %v669_v25, %v668_v23  ;;  %v1165_v33 = vadd.f32 %v1164_v29, %v1163_v27  ;;  %v1213_v34 = vadd.f32 %v1212_v30, %v1211_v28  ;;  %v1166_v35 = vpop.f32.mrb[10].mxu0  ;;  %v1214_v36 = vpop.f32.mrb[10].mxu1 }
 0x10c   : > { %v1088_v32 = vpack.c.bf16 %v685_v26, %v684_v24  ;;  %v1167_v37 = vpop.f32.mrb[11].mxu0  ;;  %v1215_v38 = vpop.f32.mrb[11].mxu1 }
 0x10d   : > { %1120 = vst [vmem:[%s1472_s4 + $0x8] sm:$0xff] %v1048_v31   ;;  %v556_v39 = vadd.f32 %v1165_v33, %v1462_v50  ;;  %v620_v40 = vadd.f32 %v1213_v34, %v1462_v50  ;;  %v1168_v41 = vadd.f32 %v1167_v37, %v1166_v35  ;;  %v1216_v42 = vadd.f32 %v1215_v38, %v1214_v36 }
 0x10e   : > { %1128 = vst [vmem:[%s1472_s4 + $0x48] sm:$0xff] %v1088_v32  }
 0x10f   : > { %v559_v43 = vadd.f32 %v1168_v41, %v1462_v50  ;;  %v623_v44 = vadd.f32 %v1216_v42, %v1462_v50  ;;  %v670_v45 = vmax.f32 %v556_v39, 0.0  ;;  %v686_v46 = vmax.f32 %v620_v40, 0.0 }
 0x111   : > { %v671_v47 = vmax.f32 %v559_v43, 0.0  ;;  %v687_v48 = vmax.f32 %v623_v44, 0.0  ;;  %v1169_v49 = vpop.f32.mrb[12].mxu0  ;;  %v1217_v51 = vpop.f32.mrb[12].mxu1 }
 0x112   : > { %v1170_v52 = vpop.f32.mrb[13].mxu0  ;;  %v1218_v53 = vpop.f32.mrb[13].mxu1 }
 0x113   : > { %v1053_v54 = vpack.c.bf16 %v671_v47, %v670_v45  ;;  %v1093_v55 = vpack.c.bf16 %v687_v48, %v686_v46  ;;  %v1171_v56 = vadd.f32 %v1170_v52, %v1169_v49  ;;  %v1219_v57 = vadd.f32 %v1218_v53, %v1217_v51  ;;  %v1172_v58 = vpop.f32.mrb[14].mxu0  ;;  %v1220_v59 = vpop.f32.mrb[14].mxu1 }
 0x114   : > { %v1173_v60 = vpop.f32.mrb[15].mxu0  ;;  %v1221_v61 = vpop.f32.mrb[15].mxu1 }
 0x115   : > { %1121 = vst [vmem:[%s1472_s4 + $0x10] sm:$0xff] %v1053_v54   ;;  %1129 = vst [vmem:[%s1472_s4 + $0x50] sm:$0xff] %v1093_v55   ;;  %v564_v62 = vadd.f32 %v1171_v56, %v1462_v50  ;;  %v628_v63 = vadd.f32 %v1219_v57, %v1462_v50  ;;  %v1174_v0 = vadd.f32 %v1173_v60, %v1172_v58 }
 0x116   : > { %v1222_v1 = vadd.f32 %v1221_v61, %v1220_v59 }
 0x117   : > { %v567_v2 = vadd.f32 %v1174_v0, %v1462_v50  ;;  %v672_v4 = vmax.f32 %v564_v62, 0.0  ;;  %v688_v5 = vmax.f32 %v628_v63, 0.0 }
 0x118   : > { %v631_v3 = vadd.f32 %v1222_v1, %v1462_v50 }
 0x119   : > { %v673_v6 = vmax.f32 %v567_v2, 0.0  ;;  %v1175_v8 = vpop.f32.mrb[16].mxu0  ;;  %v1223_v9 = vpop.f32.mrb[16].mxu1 }
 0x11a   : > { %v689_v7 = vmax.f32 %v631_v3, 0.0  ;;  %v1176_v10 = vpop.f32.mrb[17].mxu0  ;;  %v1224_v11 = vpop.f32.mrb[17].mxu1 }
 0x11b   : > { %v1058_v12 = vpack.c.bf16 %v673_v6, %v672_v4  ;;  %v1177_v14 = vadd.f32 %v1176_v10, %v1175_v8  ;;  %v1225_v15 = vadd.f32 %v1224_v11, %v1223_v9  ;;  %v1178_v16 = vpop.f32.mrb[18].mxu0  ;;  %v1226_v17 = vpop.f32.mrb[18].mxu1 }
 0x11c   : > { %v1098_v13 = vpack.c.bf16 %v689_v7, %v688_v5  ;;  %v1179_v18 = vpop.f32.mrb[19].mxu0  ;;  %v1227_v19 = vpop.f32.mrb[19].mxu1 }
 0x11d   : > { %1122 = vst [vmem:[%s1472_s4 + $0x18] sm:$0xff] %v1058_v12   ;;  %v572_v20 = vadd.f32 %v1177_v14, %v1462_v50  ;;  %v636_v21 = vadd.f32 %v1225_v15, %v1462_v50  ;;  %v1180_v22 = vadd.f32 %v1179_v18, %v1178_v16  ;;  %v1228_v23 = vadd.f32 %v1227_v19, %v1226_v17 }
 0x11e   : > { %1130 = vst [vmem:[%s1472_s4 + $0x58] sm:$0xff] %v1098_v13  }
 0x11f   : > { %v575_v24 = vadd.f32 %v1180_v22, %v1462_v50  ;;  %v639_v25 = vadd.f32 %v1228_v23, %v1462_v50  ;;  %v674_v26 = vmax.f32 %v572_v20, 0.0  ;;  %v690_v27 = vmax.f32 %v636_v21, 0.0 }
 0x121   : > { %v675_v28 = vmax.f32 %v575_v24, 0.0  ;;  %v691_v29 = vmax.f32 %v639_v25, 0.0  ;;  %v1181_v30 = vpop.f32.mrb[20].mxu0  ;;  %v1229_v31 = vpop.f32.mrb[20].mxu1 }
 0x122   : > { %v1182_v32 = vpop.f32.mrb[21].mxu0  ;;  %v1230_v33 = vpop.f32.mrb[21].mxu1 }
 0x123   : > { %v1063_v34 = vpack.c.bf16 %v675_v28, %v674_v26  ;;  %v1103_v35 = vpack.c.bf16 %v691_v29, %v690_v27  ;;  %v1183_v36 = vadd.f32 %v1182_v32, %v1181_v30  ;;  %v1231_v37 = vadd.f32 %v1230_v33, %v1229_v31  ;;  %v1184_v38 = vpop.f32.mrb[22].mxu0  ;;  %v1232_v39 = vpop.f32.mrb[22].mxu1 }
 0x124   : > { %v1185_v40 = vpop.f32.mrb[23].mxu0  ;;  %v1233_v41 = vpop.f32.mrb[23].mxu1 }
 0x125   : > { %1123 = vst [vmem:[%s1472_s4 + $0x20] sm:$0xff] %v1063_v34   ;;  %1131 = vst [vmem:[%s1472_s4 + $0x60] sm:$0xff] %v1103_v35   ;;  %v580_v42 = vadd.f32 %v1183_v36, %v1462_v50  ;;  %v644_v43 = vadd.f32 %v1231_v37, %v1462_v50  ;;  %v1186_v44 = vadd.f32 %v1185_v40, %v1184_v38 }
 0x126   : > { %v1234_v45 = vadd.f32 %v1233_v41, %v1232_v39 }
 0x127   : > { %v583_v46 = vadd.f32 %v1186_v44, %v1462_v50  ;;  %v676_v48 = vmax.f32 %v580_v42, 0.0  ;;  %v692_v49 = vmax.f32 %v644_v43, 0.0 }
 0x128   : > { %v647_v47 = vadd.f32 %v1234_v45, %v1462_v50 }
 0x129   : > { %v677_v51 = vmax.f32 %v583_v46, 0.0  ;;  %v1187_v53 = vpop.f32.mrb[24].mxu0  ;;  %v1235_v54 = vpop.f32.mrb[24].mxu1 }
 0x12a   : > { %v693_v52 = vmax.f32 %v647_v47, 0.0  ;;  %v1188_v55 = vpop.f32.mrb[25].mxu0  ;;  %v1236_v56 = vpop.f32.mrb[25].mxu1 }
 0x12b   : > { %v1068_v57 = vpack.c.bf16 %v677_v51, %v676_v48  ;;  %v1189_v59 = vadd.f32 %v1188_v55, %v1187_v53  ;;  %v1237_v60 = vadd.f32 %v1236_v56, %v1235_v54  ;;  %v1190_v61 = vpop.f32.mrb[26].mxu0  ;;  %v1238_v62 = vpop.f32.mrb[26].mxu1 }
 0x12c   : > { %v1108_v58 = vpack.c.bf16 %v693_v52, %v692_v49  ;;  %v1191_v63 = vpop.f32.mrb[27].mxu0  ;;  %v1239_v0 = vpop.f32.mrb[27].mxu1 }
 0x12d   : > { %1124 = vst [vmem:[%s1472_s4 + $0x28] sm:$0xff] %v1068_v57   ;;  %v588_v1 = vadd.f32 %v1189_v59, %v1462_v50  ;;  %v652_v2 = vadd.f32 %v1237_v60, %v1462_v50  ;;  %v1192_v3 = vadd.f32 %v1191_v63, %v1190_v61  ;;  %v1240_v4 = vadd.f32 %v1239_v0, %v1238_v62 }
 0x12e   : > { %1132 = vst [vmem:[%s1472_s4 + $0x68] sm:$0xff] %v1108_v58  }
 0x12f   : > { %v591_v5 = vadd.f32 %v1192_v3, %v1462_v50  ;;  %v655_v6 = vadd.f32 %v1240_v4, %v1462_v50  ;;  %v678_v7 = vmax.f32 %v588_v1, 0.0  ;;  %v694_v8 = vmax.f32 %v652_v2, 0.0 }
 0x131   : > { %v679_v9 = vmax.f32 %v591_v5, 0.0  ;;  %v695_v10 = vmax.f32 %v655_v6, 0.0  ;;  %v1193_v11 = vpop.f32.mrb[28].mxu0  ;;  %v1241_v12 = vpop.f32.mrb[28].mxu1 }
 0x132   : > { %v1194_v13 = vpop.f32.mrb[29].mxu0  ;;  %v1242_v14 = vpop.f32.mrb[29].mxu1 }
 0x133   : > { %v1073_v15 = vpack.c.bf16 %v679_v9, %v678_v7  ;;  %v1113_v16 = vpack.c.bf16 %v695_v10, %v694_v8  ;;  %v1195_v17 = vadd.f32 %v1194_v13, %v1193_v11  ;;  %v1243_v18 = vadd.f32 %v1242_v14, %v1241_v12  ;;  %v1196_v19 = vpop.f32.mrb[30].mxu0  ;;  %v1244_v20 = vpop.f32.mrb[30].mxu1 }
 0x134   : > { %v1197_v21 = vpop.f32.mrb[31].mxu0  ;;  %v1245_v22 = vpop.f32.mrb[31].mxu1 }
 0x135   : > { %1125 = vst [vmem:[%s1472_s4 + $0x30] sm:$0xff] %v1073_v15   ;;  %1133 = vst [vmem:[%s1472_s4 + $0x70] sm:$0xff] %v1113_v16   ;;  %v596_v23 = vadd.f32 %v1195_v17, %v1462_v50  ;;  %v660_v24 = vadd.f32 %v1243_v18, %v1462_v50  ;;  %v1198_v25 = vadd.f32 %v1197_v21, %v1196_v19 }
 0x136   : > { %v1246_v26 = vadd.f32 %v1245_v22, %v1244_v20 }
 0x137   : > { %v599_v27 = vadd.f32 %v1198_v25, %v1462_v50  ;;  %v680_v29 = vmax.f32 %v596_v23, 0.0  ;;  %v696_v30 = vmax.f32 %v660_v24, 0.0 }
 0x138   : > { %v663_v28 = vadd.f32 %v1246_v26, %v1462_v50 }
 0x139   : > { %v681_v31 = vmax.f32 %v599_v27, 0.0 }
 0x13a   : > { %v697_v32 = vmax.f32 %v663_v28, 0.0 }
 0x13b   : > { %v1078_v33 = vpack.c.bf16 %v681_v31, %v680_v29 }
 0x13c   : > { %v1118_v34 = vpack.c.bf16 %v697_v32, %v696_v30 }
 0x13d   : > { %1126 = vst [vmem:[%s1472_s4 + $0x38] sm:$0xff] %v1078_v33  }
 0x13e   : > { %1134 = vst [vmem:[%s1472_s4 + $0x78] sm:$0xff] %v1118_v34  }
 0x13f PF: > { %s13_s12 = sadd.s32 1, %s1341_s12  }
 0x140   : > { %p10_p4 = scmp.ge.s32.totalorder %s13_s12, 6  }
 0x142   :  { %12 = sbr.rel (!%p10_p4) target bundleno = 1 (0x1), region = 62 }

// kernel: dueling_forward.5
= control target key start
LH: loop header
LB: loop body
LE: loop exit
PB: predicated region body
PF: predicated region fallthrough
CT: control target
= control target key end

     0   :  { %s2181_s1 = inlined_call_operand.vmem [shape: bf16[512,128], index: 1, kind: input, shape index: {}]   ;;  %s2182_s0 = inlined_call_operand.vmem [shape: bf16[256,512], index: 0, kind: input, shape index: {}]   ;;  %s2183_s2 = inlined_call_operand.vmem [shape: f32[1,128], index: 2, kind: input, shape index: {}]   ;;  %s2184_s3 = inlined_call_operand.vmem [shape: bf16[256,128], index: 3, kind: output, shape index: {}]  }
   0x1   :  { %v1660_v0 = vld [vmem:[%s2181_s1 + $0x40] sm:$0xff]   ;;  %v1664_v4 = vld [vmem:[%s2181_s1 + $0x48] sm:$0xff]   ;;  %v1668_v8 = vld [vmem:[%s2181_s1 + $0x50] sm:$0xff]  }
   0x2   :  { %v1661_v1 = vld [vmem:[%s2181_s1 + $0xc0] sm:$0xff]   ;;  %1436 = vmatprep.subr.bf16.mxu0 %v1660_v0  ;;  %v1665_v5 = vld [vmem:[%s2181_s1 + $0xc8] sm:$0xff]   ;;  %v1669_v9 = vld [vmem:[%s2181_s1 + $0xd0] sm:$0xff]  }
   0x3   :  { %v1662_v2 = vld [vmem:[%s2181_s1] sm:$0xff]   ;;  %1548 = vmatprep.subr.bf16.mxu1 %v1661_v1  ;;  %v1666_v6 = vld [vmem:[%s2181_s1 + $0x8] sm:$0xff]   ;;  %v1670_v10 = vld [vmem:[%s2181_s1 + $0x10] sm:$0xff]  }
   0x4   :  { %v1663_v3 = vld [vmem:[%s2181_s1 + $0x80] sm:$0xff]   ;;  %1437 = vmatpush3.bf16.msra.mxu0 %v1662_v2  ;;  %v1667_v7 = vld [vmem:[%s2181_s1 + $0x88] sm:$0xff]   ;;  %v1671_v11 = vld [vmem:[%s2181_s1 + $0x90] sm:$0xff]  }
   0x5   :  { %1549 = vmatpush3.bf16.msra.mxu1 %v1663_v3  ;;  %1438 = vmatprep.subr.bf16.mxu0 %v1664_v4  ;;  %v1672_v12 = vld [vmem:[%s2181_s1 + $0x58] sm:$0xff]   ;;  %v1676_v16 = vld [vmem:[%s2181_s1 + $0x60] sm:$0xff]   ;;  %v1680_v20 = vld [vmem:[%s2181_s1 + $0x68] sm:$0xff]  }
   0x6   :  { %1550 = vmatprep.subr.bf16.mxu1 %v1665_v5  ;;  %v1673_v13 = vld [vmem:[%s2181_s1 + $0xd8] sm:$0xff]   ;;  %v1677_v17 = vld [vmem:[%s2181_s1 + $0xe0] sm:$0xff]   ;;  %v1681_v21 = vld [vmem:[%s2181_s1 + $0xe8] sm:$0xff]  }
   0x7   :  { %v1674_v14 = vld [vmem:[%s2181_s1 + $0x18] sm:$0xff]   ;;  %v1678_v18 = vld [vmem:[%s2181_s1 + $0x20] sm:$0xff]   ;;  %v1682_v22 = vld [vmem:[%s2181_s1 + $0x28] sm:$0xff]  }
   0x8   :  { %1439 = vmatpush3.bf16.msra.mxu0 %v1666_v6  ;;  %v1675_v15 = vld [vmem:[%s2181_s1 + $0x98] sm:$0xff]   ;;  %v1679_v19 = vld [vmem:[%s2181_s1 + $0xa0] sm:$0xff]   ;;  %v1683_v23 = vld [vmem:[%s2181_s1 + $0xa8] sm:$0xff]  }
   0x9   :  { %1551 = vmatpush3.bf16.msra.mxu1 %v1667_v7  ;;  %1440 = vmatprep.subr.bf16.mxu0 %v1668_v8  ;;  %v1684_v24 = vld [vmem:[%s2181_s1 + $0x70] sm:$0xff]   ;;  %v1688_v28 = vld [vmem:[%s2181_s1 + $0x78] sm:$0xff]  }
   0xa   :  { %1552 = vmatprep.subr.bf16.mxu1 %v1669_v9  ;;  %v1685_v25 = vld [vmem:[%s2181_s1 + $0xf0] sm:$0xff]   ;;  %v1689_v29 = vld [vmem:[%s2181_s1 + $0xf8] sm:$0xff]  }
   0xb   :  { %v1686_v26 = vld [vmem:[%s2181_s1 + $0x30] sm:$0xff]   ;;  %v1690_v30 = vld [vmem:[%s2181_s1 + $0x38] sm:$0xff]  }
   0xc   :  { %1441 = vmatpush3.bf16.msra.mxu0 %v1670_v10  ;;  %v1687_v27 = vld [vmem:[%s2181_s1 + $0xb0] sm:$0xff]   ;;  %v1691_v31 = vld [vmem:[%s2181_s1 + $0xb8] sm:$0xff]  }
   0xd   :  { %1553 = vmatpush3.bf16.msra.mxu1 %v1671_v11  ;;  %1442 = vmatprep.subr.bf16.mxu0 %v1672_v12  ;;  %v1692_v32 = vld [vmem:[%s2182_s0] ss:$16 sps:$4 sm:$0xff]   ;;  %v1694_v33 = vld [vmem:[%s2182_s0 + $0x4] ss:$16 sps:$4 sm:$0xff]   ;;  %v1695_v34 = vld [vmem:[%s2182_s0 + $0x8] ss:$16 sps:$4 sm:$0xff]  }
   0xe   :  { %1554 = vmatprep.subr.bf16.mxu1 %v1673_v13  ;;  %v1697_v35 = vld [vmem:[%s2182_s0 + $0xc] ss:$16 sps:$4 sm:$0xff]   ;;  %694 = vmatprep.mubr.bf16.mxu0 %v1694_v33  ;;  %v1698_v36 = vld [vmem:[%s2182_s0 + $0x24] ss:$16 sps:$4 sm:$0xff]   ;;  %v1702_v38 = vld [vmem:[%s2182_s0 + $0x20] ss:$16 sps:$4 sm:$0xff]  }
   0xf   :  { %855 = vmatprep.mubr.bf16.mxu1 %v1697_v35  ;;  %v1700_v37 = vld [vmem:[%s2182_s0 + $0x2c] ss:$16 sps:$4 sm:$0xff]   ;;  %v1703_v39 = vld [vmem:[%s2182_s0 + $0x28] ss:$16 sps:$4 sm:$0xff]   ;;  %v1704_v40 = vld [vmem:[%s2182_s0 + $0x44] ss:$16 sps:$4 sm:$0xff]  }
  0x10   :  { %1443 = vmatpush3.bf16.msra.mxu0 %v1674_v14  ;;  %v1706_v41 = vld [vmem:[%s2182_s0 + $0x4c] ss:$16 sps:$4 sm:$0xff]   ;;  %v1708_v42 = vld [vmem:[%s2182_s0 + $0x40] ss:$16 sps:$4 sm:$0xff]   ;;  %v1709_v43 = vld [vmem:[%s2182_s0 + $0x48] ss:$16 sps:$4 sm:$0xff]  }
  0x11   :  { %1555 = vmatpush3.bf16.msra.mxu1 %v1675_v15  ;;  %1444 = vmatprep.subr.bf16.mxu0 %v1676_v16  ;;  %v1710_v44 = vld [vmem:[%s2182_s0 + $0x64] ss:$16 sps:$4 sm:$0xff]   ;;  %v1712_v45 = vld [vmem:[%s2182_s0 + $0x6c] ss:$16 sps:$4 sm:$0xff]   ;;  %v1714_v46 = vld [vmem:[%s2182_s0 + $0x60] ss:$16 sps:$4 sm:$0xff]  }
  0x12   :  { %1556 = vmatprep.subr.bf16.mxu1 %v1677_v17  ;;  %v1715_v47 = vld [vmem:[%s2182_s0 + $0x68] ss:$16 sps:$4 sm:$0xff]   ;;  %v1716_v48 = vld [vmem:[%s2182_s0 + $0x84] ss:$16 sps:$4 sm:$0xff]   ;;  %v1718_v49 = vld [vmem:[%s2182_s0 + $0x8c] ss:$16 sps:$4 sm:$0xff]  }
  0x13   :  { %v1720_v50 = vld [vmem:[%s2182_s0 + $0x80] ss:$16 sps:$4 sm:$0xff]   ;;  %v1721_v51 = vld [vmem:[%s2182_s0 + $0x88] ss:$16 sps:$4 sm:$0xff]   ;;  %v1722_v52 = vld [vmem:[%s2182_s0 + $0xa4] ss:$16 sps:$4 sm:$0xff]  }
  0x14   :  { %1445 = vmatpush3.bf16.msra.mxu0 %v1678_v18  ;;  %v1724_v53 = vld [vmem:[%s2182_s0 + $0xac] ss:$16 sps:$4 sm:$0xff]   ;;  %v1726_v54 = vld [vmem:[%s2182_s0 + $0xa0] ss:$16 sps:$4 sm:$0xff]   ;;  %v1727_v55 = vld [vmem:[%s2182_s0 + $0xa8] ss:$16 sps:$4 sm:$0xff]  }
  0x15   :  { %1557 = vmatpush3.bf16.msra.mxu1 %v1679_v19  ;;  %1446 = vmatprep.subr.bf16.mxu0 %v1680_v20  ;;  %v1728_v56 = vld [vmem:[%s2182_s0 + $0xc4] ss:$16 sps:$4 sm:$0xff]   ;;  %v1730_v57 = vld [vmem:[%s2182_s0 + $0xcc] ss:$16 sps:$4 sm:$0xff]   ;;  %v1732_v58 = vld [vmem:[%s2182_s0 + $0xc0] ss:$16 sps:$4 sm:$0xff]  }
  0x16   :  { %1558 = vmatprep.subr.bf16.mxu1 %v1681_v21  ;;  %v1733_v59 = vld [vmem:[%s2182_s0 + $0xc8] ss:$16 sps:$4 sm:$0xff]   ;;  %v1734_v60 = vld [vmem:[%s2182_s0 + $0xe4] ss:$16 sps:$4 sm:$0xff]   ;;  %v1736_v61 = vld [vmem:[%s2182_s0 + $0xec] ss:$16 sps:$4 sm:$0xff]  }
  0x17   :  { %v1738_v62 = vld [vmem:[%s2182_s0 + $0xe0] ss:$16 sps:$4 sm:$0xff]   ;;  %v1739_v63 = vld [vmem:[%s2182_s0 + $0xe8] ss:$16 sps:$4 sm:$0xff]   ;;  %v1740_v0 = vld [vmem:[%s2182_s0 + $0x104] ss:$16 sps:$4 sm:$0xff]  }
  0x18   :  { %1447 = vmatpush3.bf16.msra.mxu0 %v1682_v22  ;;  %v1742_v1 = vld [vmem:[%s2182_s0 + $0x10c] ss:$16 sps:$4 sm:$0xff]   ;;  %v1744_v2 = vld [vmem:[%s2182_s0 + $0x100] ss:$16 sps:$4 sm:$0xff]   ;;  %v1745_v3 = vld [vmem:[%s2182_s0 + $0x108] ss:$16 sps:$4 sm:$0xff]  }
  0x19   :  { %1559 = vmatpush3.bf16.msra.mxu1 %v1683_v23  ;;  %1448 = vmatprep.subr.bf16.mxu0 %v1684_v24  ;;  %v1746_v4 = vld [vmem:[%s2182_s0 + $0x124] ss:$16 sps:$4 sm:$0xff]   ;;  %v1748_v5 = vld [vmem:[%s2182_s0 + $0x12c] ss:$16 sps:$4 sm:$0xff]   ;;  %v1750_v6 = vld [vmem:[%s2182_s0 + $0x120] ss:$16 sps:$4 sm:$0xff]  }
  0x1a   :  { %1560 = vmatprep.subr.bf16.mxu1 %v1685_v25  ;;  %v1751_v7 = vld [vmem:[%s2182_s0 + $0x128] ss:$16 sps:$4 sm:$0xff]   ;;  %v1752_v8 = vld [vmem:[%s2182_s0 + $0x144] ss:$16 sps:$4 sm:$0xff]   ;;  %v1754_v9 = vld [vmem:[%s2182_s0 + $0x14c] ss:$16 sps:$4 sm:$0xff]  }
  0x1b   :  { %v1756_v10 = vld [vmem:[%s2182_s0 + $0x140] ss:$16 sps:$4 sm:$0xff]   ;;  %v1757_v11 = vld [vmem:[%s2182_s0 + $0x148] ss:$16 sps:$4 sm:$0xff]   ;;  %v1758_v12 = vld [vmem:[%s2182_s0 + $0x164] ss:$16 sps:$4 sm:$0xff]  }
  0x1c   :  { %1449 = vmatpush3.bf16.msra.mxu0 %v1686_v26  ;;  %v1760_v13 = vld [vmem:[%s2182_s0 + $0x16c] ss:$16 sps:$4 sm:$0xff]   ;;  %v1762_v14 = vld [vmem:[%s2182_s0 + $0x160] ss:$16 sps:$4 sm:$0xff]   ;;  %v1763_v15 = vld [vmem:[%s2182_s0 + $0x168] ss:$16 sps:$4 sm:$0xff]  }
  0x1d   :  { %1561 = vmatpush3.bf16.msra.mxu1 %v1687_v27  ;;  %1450 = vmatprep.subr.bf16.mxu0 %v1688_v28  ;;  %v1764_v16 = vld [vmem:[%s2182_s0 + $0x184] ss:$16 sps:$4 sm:$0xff]   ;;  %v1766_v17 = vld [vmem:[%s2182_s0 + $0x18c] ss:$16 sps:$4 sm:$0xff]   ;;  %v1768_v18 = vld [vmem:[%s2182_s0 + $0x180] ss:$16 sps:$4 sm:$0xff]  }
  0x1e   :  { %1562 = vmatprep.subr.bf16.mxu1 %v1689_v29  ;;  %v1769_v19 = vld [vmem:[%s2182_s0 + $0x188] ss:$16 sps:$4 sm:$0xff]   ;;  %v1770_v20 = vld [vmem:[%s2182_s0 + $0x1a4] ss:$16 sps:$4 sm:$0xff]   ;;  %v1772_v21 = vld [vmem:[%s2182_s0 + $0x1ac] ss:$16 sps:$4 sm:$0xff]  }
  0x1f   :  { %v1774_v22 = vld [vmem:[%s2182_s0 + $0x1a0] ss:$16 sps:$4 sm:$0xff]   ;;  %v1775_v23 = vld [vmem:[%s2182_s0 + $0x1a8] ss:$16 sps:$4 sm:$0xff]   ;;  %v1776_v24 = vld [vmem:[%s2182_s0 + $0x1c4] ss:$16 sps:$4 sm:$0xff]  }
  0x20   :  { %1451 = vmatpush3.bf16.msra.mxu0 %v1690_v30  ;;  %v1778_v25 = vld [vmem:[%s2182_s0 + $0x1cc] ss:$16 sps:$4 sm:$0xff]   ;;  %v1780_v26 = vld [vmem:[%s2182_s0 + $0x1c0] ss:$16 sps:$4 sm:$0xff]   ;;  %v1781_v27 = vld [vmem:[%s2182_s0 + $0x1c8] ss:$16 sps:$4 sm:$0xff]  }
  0x21   :  { %1563 = vmatpush3.bf16.msra.mxu1 %v1691_v31  ;;  %v1782_v28 = vld [vmem:[%s2182_s0 + $0x1e4] ss:$16 sps:$4 sm:$0xff]   ;;  %v1784_v29 = vld [vmem:[%s2182_s0 + $0x1ec] ss:$16 sps:$4 sm:$0xff]   ;;  %v1786_v30 = vld [vmem:[%s2182_s0 + $0x1e0] ss:$16 sps:$4 sm:$0xff]  }
  0x22   :  { %v1787_v31 = vld [vmem:[%s2182_s0 + $0x1e8] ss:$16 sps:$4 sm:$0xff]  }
  0x23   :  { %695 = vmatmul.mubr.bf16.vlgmr.msra.gmra.mrb[0].mxu0 %v1692_v32 }
  0x24   :  { %856 = vmatmul.mubr.bf16.vlgmr.msra.gmra.mrb[0].mxu1 %v1695_v34  ;;  %702 = vmatprep.mubr.bf16.mxu0 %v1698_v36  ;;  %v2099_v34 = vld [vmem:[%s2183_s2] ss:$0 sm:$0xff] }
  0x25   :  { %863 = vmatprep.mubr.bf16.mxu1 %v1700_v37 }
  0x2b   :  { %703 = vmatmul.mubr.bf16.gmra.mrb[4].mxu0 %v1702_v38 }
  0x2c   :  { %864 = vmatmul.mubr.bf16.gmra.mrb[4].mxu1 %v1703_v39  ;;  %710 = vmatprep.mubr.bf16.mxu0 %v1704_v40 }
  0x2d   :  { %871 = vmatprep.mubr.bf16.mxu1 %v1706_v41 }
  0x33   :  { %711 = vmatmul.mubr.bf16.gmra.mrb[8].mxu0 %v1708_v42 }
  0x34   :  { %872 = vmatmul.mubr.bf16.gmra.mrb[8].mxu1 %v1709_v43  ;;  %718 = vmatprep.mubr.bf16.mxu0 %v1710_v44 }
  0x35   :  { %879 = vmatprep.mubr.bf16.mxu1 %v1712_v45 }
  0x3b   :  { %719 = vmatmul.mubr.bf16.gmra.mrb[12].mxu0 %v1714_v46 }
  0x3c   :  { %880 = vmatmul.mubr.bf16.gmra.mrb[12].mxu1 %v1715_v47  ;;  %726 = vmatprep.mubr.bf16.mxu0 %v1716_v48 }
  0x3d   :  { %887 = vmatprep.mubr.bf16.mxu1 %v1718_v49 }
  0x43   :  { %727 = vmatmul.mubr.bf16.gmra.mrb[16].mxu0 %v1720_v50 }
  0x44   :  { %888 = vmatmul.mubr.bf16.gmra.mrb[16].mxu1 %v1721_v51  ;;  %734 = vmatprep.mubr.bf16.mxu0 %v1722_v52 }
  0x45   :  { %895 = vmatprep.mubr.bf16.mxu1 %v1724_v53 }
  0x4b   :  { %735 = vmatmul.mubr.bf16.gmra.mrb[20].mxu0 %v1726_v54 }
  0x4c   :  { %896 = vmatmul.mubr.bf16.gmra.mrb[20].mxu1 %v1727_v55  ;;  %742 = vmatprep.mubr.bf16.mxu0 %v1728_v56 }
  0x4d   :  { %903 = vmatprep.mubr.bf16.mxu1 %v1730_v57 }
  0x53   :  { %743 = vmatmul.mubr.bf16.gmra.mrb[24].mxu0 %v1732_v58 }
  0x54   :  { %904 = vmatmul.mubr.bf16.gmra.mrb[24].mxu1 %v1733_v59  ;;  %750 = vmatprep.mubr.bf16.mxu0 %v1734_v60 }
  0x55   :  { %911 = vmatprep.mubr.bf16.mxu1 %v1736_v61 }
  0x5b   :  { %751 = vmatmul.mubr.bf16.gmra.mrb[28].mxu0 %v1738_v62 }
  0x5c   :  { %912 = vmatmul.mubr.bf16.gmra.mrb[28].mxu1 %v1739_v63  ;;  %758 = vmatprep.mubr.bf16.mxu0 %v1740_v0 }
  0x5d   :  { %919 = vmatprep.mubr.bf16.mxu1 %v1742_v1 }
  0x63   :  { %759 = vmatmul.mubr.bf16.gmra.mrb[32].mxu0 %v1744_v2 }
  0x64   :  { %920 = vmatmul.mubr.bf16.gmra.mrb[32].mxu1 %v1745_v3  ;;  %766 = vmatprep.mubr.bf16.mxu0 %v1746_v4 }
  0x65   :  { %927 = vmatprep.mubr.bf16.mxu1 %v1748_v5 }
  0x6b   :  { %767 = vmatmul.mubr.bf16.gmra.mrb[36].mxu0 %v1750_v6 }
  0x6c   :  { %928 = vmatmul.mubr.bf16.gmra.mrb[36].mxu1 %v1751_v7  ;;  %774 = vmatprep.mubr.bf16.mxu0 %v1752_v8 }
  0x6d   :  { %935 = vmatprep.mubr.bf16.mxu1 %v1754_v9 }
  0x73   :  { %775 = vmatmul.mubr.bf16.gmra.mrb[40].mxu0 %v1756_v10 }
  0x74   :  { %936 = vmatmul.mubr.bf16.gmra.mrb[40].mxu1 %v1757_v11  ;;  %782 = vmatprep.mubr.bf16.mxu0 %v1758_v12 }
  0x75   :  { %943 = vmatprep.mubr.bf16.mxu1 %v1760_v13 }
  0x7b   :  { %783 = vmatmul.mubr.bf16.gmra.mrb[44].mxu0 %v1762_v14 }
  0x7c   :  { %944 = vmatmul.mubr.bf16.gmra.mrb[44].mxu1 %v1763_v15  ;;  %790 = vmatprep.mubr.bf16.mxu0 %v1764_v16 }
  0x7d   :  { %951 = vmatprep.mubr.bf16.mxu1 %v1766_v17 }
  0x83   :  { %791 = vmatmul.mubr.bf16.gmra.mrb[48].mxu0 %v1768_v18 }
  0x84   :  { %952 = vmatmul.mubr.bf16.gmra.mrb[48].mxu1 %v1769_v19  ;;  %798 = vmatprep.mubr.bf16.mxu0 %v1770_v20 }
  0x85   :  { %959 = vmatprep.mubr.bf16.mxu1 %v1772_v21 }
  0x8b   :  { %799 = vmatmul.mubr.bf16.gmra.mrb[52].mxu0 %v1774_v22 }
  0x8c   :  { %960 = vmatmul.mubr.bf16.gmra.mrb[52].mxu1 %v1775_v23  ;;  %806 = vmatprep.mubr.bf16.mxu0 %v1776_v24 }
  0x8d   :  { %967 = vmatprep.mubr.bf16.mxu1 %v1778_v25 }
  0x93   :  { %807 = vmatmul.mubr.bf16.gmra.mrb[56].mxu0 %v1780_v26 }
  0x94   :  { %968 = vmatmul.mubr.bf16.gmra.mrb[56].mxu1 %v1781_v27  ;;  %814 = vmatprep.mubr.bf16.mxu0 %v1782_v28 }
  0x95   :  { %975 = vmatprep.mubr.bf16.mxu1 %v1784_v29 }
  0x9b   :  { %815 = vmatmul.mubr.bf16.gmra.mrb[60].mxu0 %v1786_v30 }
  0x9c   :  { %976 = vmatmul.mubr.bf16.gmra.mrb[60].mxu1 %v1787_v31 }
  0xf6   :  { %v1452_v32 = vpop.f32.mrb[0].mxu0 }
  0xf7   :  { %v1564_v33 = vpop.f32.mrb[0].mxu1  ;;  %v1453_v35 = vpop.f32.mrb[1].mxu0 }
  0xf8   :  { %v1454_v36 = vadd.f32 %v1453_v35, %v1452_v32  ;;  %v1565_v37 = vpop.f32.mrb[1].mxu1  ;;  %v1455_v38 = vpop.f32.mrb[2].mxu0 }
  0xf9   :  { %v1566_v39 = vadd.f32 %v1565_v37, %v1564_v33  ;;  %v1567_v40 = vpop.f32.mrb[2].mxu1  ;;  %v1456_v41 = vpop.f32.mrb[3].mxu0 }
  0xfa   :  { %v697_v42 = vadd.f32 %v1454_v36, %v2099_v34  ;;  %v1457_v43 = vadd.f32 %v1456_v41, %v1455_v38  ;;  %v1568_v44 = vpop.f32.mrb[3].mxu1 }
  0xfb   :  { %v1569_v45 = vadd.f32 %v1568_v44, %v1567_v40 }
  0xfc   :  { %v858_v46 = vadd.f32 %v1566_v39, %v697_v42  ;;  %v700_v47 = vadd.f32 %v1457_v43, %v2099_v34 }
  0xfe   :  { %v861_v48 = vadd.f32 %v1569_v45, %v700_v47  ;;  %v1458_v49 = vpop.f32.mrb[4].mxu0  ;;  %v984_v52 = vmax.f32 %v858_v46, 0.0 }
  0xff   :  { %v1570_v50 = vpop.f32.mrb[4].mxu1  ;;  %v1459_v51 = vpop.f32.mrb[5].mxu0 }
 0x100   :  { %v985_v53 = vmax.f32 %v861_v48, 0.0  ;;  %v1460_v54 = vadd.f32 %v1459_v51, %v1458_v49  ;;  %v1571_v55 = vpop.f32.mrb[5].mxu1  ;;  %v1461_v56 = vpop.f32.mrb[6].mxu0 }
 0x101   :  { %v1572_v57 = vadd.f32 %v1571_v55, %v1570_v50  ;;  %v1573_v58 = vpop.f32.mrb[6].mxu1  ;;  %v1462_v59 = vpop.f32.mrb[7].mxu0 }
 0x102   :  { %v1344_v60 = vpack.c.bf16 %v985_v53, %v984_v52  ;;  %v705_v61 = vadd.f32 %v1460_v54, %v2099_v34  ;;  %v1463_v62 = vadd.f32 %v1462_v59, %v1461_v56  ;;  %v1574_v63 = vpop.f32.mrb[7].mxu1 }
 0x103   :  { %v1575_v0 = vadd.f32 %v1574_v63, %v1573_v58 }
 0x104   :  { %1345 = vst [vmem:[%s2184_s3] sm:$0xff] %v1344_v60   ;;  %v866_v1 = vadd.f32 %v1572_v57, %v705_v61  ;;  %v708_v2 = vadd.f32 %v1463_v62, %v2099_v34 }
 0x106   :  { %v869_v3 = vadd.f32 %v1575_v0, %v708_v2  ;;  %v1464_v4 = vpop.f32.mrb[8].mxu0  ;;  %v986_v7 = vmax.f32 %v866_v1, 0.0 }
 0x107   :  { %v1576_v5 = vpop.f32.mrb[8].mxu1  ;;  %v1465_v6 = vpop.f32.mrb[9].mxu0 }
 0x108   :  { %v987_v8 = vmax.f32 %v869_v3, 0.0  ;;  %v1466_v9 = vadd.f32 %v1465_v6, %v1464_v4  ;;  %v1577_v10 = vpop.f32.mrb[9].mxu1  ;;  %v1467_v11 = vpop.f32.mrb[10].mxu0 }
 0x109   :  { %v1578_v12 = vadd.f32 %v1577_v10, %v1576_v5  ;;  %v1579_v13 = vpop.f32.mrb[10].mxu1  ;;  %v1468_v14 = vpop.f32.mrb[11].mxu0 }
 0x10a   :  { %v1349_v15 = vpack.c.bf16 %v987_v8, %v986_v7  ;;  %v713_v16 = vadd.f32 %v1466_v9, %v2099_v34  ;;  %v1469_v17 = vadd.f32 %v1468_v14, %v1467_v11  ;;  %v1580_v18 = vpop.f32.mrb[11].mxu1 }
 0x10b   :  { %v1581_v19 = vadd.f32 %v1580_v18, %v1579_v13 }
 0x10c   :  { %1421 = vst [vmem:[%s2184_s3 + $0x8] sm:$0xff] %v1349_v15   ;;  %v874_v20 = vadd.f32 %v1578_v12, %v713_v16  ;;  %v716_v21 = vadd.f32 %v1469_v17, %v2099_v34 }
 0x10e   :  { %v877_v22 = vadd.f32 %v1581_v19, %v716_v21  ;;  %v1470_v23 = vpop.f32.mrb[12].mxu0  ;;  %v988_v26 = vmax.f32 %v874_v20, 0.0 }
 0x10f   :  { %v1582_v24 = vpop.f32.mrb[12].mxu1  ;;  %v1471_v25 = vpop.f32.mrb[13].mxu0 }
 0x110   :  { %v989_v27 = vmax.f32 %v877_v22, 0.0  ;;  %v1472_v28 = vadd.f32 %v1471_v25, %v1470_v23  ;;  %v1583_v29 = vpop.f32.mrb[13].mxu1  ;;  %v1473_v30 = vpop.f32.mrb[14].mxu0 }
 0x111   :  { %v1584_v31 = vadd.f32 %v1583_v29, %v1582_v24  ;;  %v1585_v32 = vpop.f32.mrb[14].mxu1  ;;  %v1474_v33 = vpop.f32.mrb[15].mxu0 }
 0x112   :  { %v1354_v35 = vpack.c.bf16 %v989_v27, %v988_v26  ;;  %v721_v36 = vadd.f32 %v1472_v28, %v2099_v34  ;;  %v1475_v37 = vadd.f32 %v1474_v33, %v1473_v30  ;;  %v1586_v38 = vpop.f32.mrb[15].mxu1 }
 0x113   :  { %v1587_v39 = vadd.f32 %v1586_v38, %v1585_v32 }
 0x114   :  { %1422 = vst [vmem:[%s2184_s3 + $0x10] sm:$0xff] %v1354_v35   ;;  %v882_v40 = vadd.f32 %v1584_v31, %v721_v36  ;;  %v724_v41 = vadd.f32 %v1475_v37, %v2099_v34 }
 0x116   :  { %v885_v42 = vadd.f32 %v1587_v39, %v724_v41  ;;  %v1476_v43 = vpop.f32.mrb[16].mxu0  ;;  %v990_v46 = vmax.f32 %v882_v40, 0.0 }
 0x117   :  { %v1588_v44 = vpop.f32.mrb[16].mxu1  ;;  %v1477_v45 = vpop.f32.mrb[17].mxu0 }
 0x118   :  { %v991_v47 = vmax.f32 %v885_v42, 0.0  ;;  %v1478_v48 = vadd.f32 %v1477_v45, %v1476_v43  ;;  %v1589_v49 = vpop.f32.mrb[17].mxu1  ;;  %v1479_v50 = vpop.f32.mrb[18].mxu0 }
 0x119   :  { %v1590_v51 = vadd.f32 %v1589_v49, %v1588_v44  ;;  %v1591_v52 = vpop.f32.mrb[18].mxu1  ;;  %v1480_v53 = vpop.f32.mrb[19].mxu0 }
 0x11a   :  { %v1359_v54 = vpack.c.bf16 %v991_v47, %v990_v46  ;;  %v729_v55 = vadd.f32 %v1478_v48, %v2099_v34  ;;  %v1481_v56 = vadd.f32 %v1480_v53, %v1479_v50  ;;  %v1592_v57 = vpop.f32.mrb[19].mxu1 }
 0x11b   :  { %v1593_v58 = vadd.f32 %v1592_v57, %v1591_v52 }
 0x11c   :  { %1423 = vst [vmem:[%s2184_s3 + $0x18] sm:$0xff] %v1359_v54   ;;  %v890_v59 = vadd.f32 %v1590_v51, %v729_v55  ;;  %v732_v60 = vadd.f32 %v1481_v56, %v2099_v34 }
 0x11e   :  { %v893_v61 = vadd.f32 %v1593_v58, %v732_v60  ;;  %v1482_v62 = vpop.f32.mrb[20].mxu0  ;;  %v992_v1 = vmax.f32 %v890_v59, 0.0 }
 0x11f   :  { %v1594_v63 = vpop.f32.mrb[20].mxu1  ;;  %v1483_v0 = vpop.f32.mrb[21].mxu0 }
 0x120   :  { %v993_v2 = vmax.f32 %v893_v61, 0.0  ;;  %v1484_v3 = vadd.f32 %v1483_v0, %v1482_v62  ;;  %v1595_v4 = vpop.f32.mrb[21].mxu1  ;;  %v1485_v5 = vpop.f32.mrb[22].mxu0 }
 0x121   :  { %v1596_v6 = vadd.f32 %v1595_v4, %v1594_v63  ;;  %v1597_v7 = vpop.f32.mrb[22].mxu1  ;;  %v1486_v8 = vpop.f32.mrb[23].mxu0 }
 0x122   :  { %v1364_v9 = vpack.c.bf16 %v993_v2, %v992_v1  ;;  %v737_v10 = vadd.f32 %v1484_v3, %v2099_v34  ;;  %v1487_v11 = vadd.f32 %v1486_v8, %v1485_v5  ;;  %v1598_v12 = vpop.f32.mrb[23].mxu1 }
 0x123   :  { %v1599_v13 = vadd.f32 %v1598_v12, %v1597_v7 }
 0x124   :  { %1424 = vst [vmem:[%s2184_s3 + $0x20] sm:$0xff] %v1364_v9   ;;  %v898_v14 = vadd.f32 %v1596_v6, %v737_v10  ;;  %v740_v15 = vadd.f32 %v1487_v11, %v2099_v34 }
 0x126   :  { %v901_v16 = vadd.f32 %v1599_v13, %v740_v15  ;;  %v1488_v17 = vpop.f32.mrb[24].mxu0  ;;  %v994_v20 = vmax.f32 %v898_v14, 0.0 }
 0x127   :  { %v1600_v18 = vpop.f32.mrb[24].mxu1  ;;  %v1489_v19 = vpop.f32.mrb[25].mxu0 }
 0x128   :  { %v995_v21 = vmax.f32 %v901_v16, 0.0  ;;  %v1490_v22 = vadd.f32 %v1489_v19, %v1488_v17  ;;  %v1601_v23 = vpop.f32.mrb[25].mxu1  ;;  %v1491_v24 = vpop.f32.mrb[26].mxu0 }
 0x129   :  { %v1602_v25 = vadd.f32 %v1601_v23, %v1600_v18  ;;  %v1603_v26 = vpop.f32.mrb[26].mxu1  ;;  %v1492_v27 = vpop.f32.mrb[27].mxu0 }
 0x12a   :  { %v1369_v28 = vpack.c.bf16 %v995_v21, %v994_v20  ;;  %v745_v29 = vadd.f32 %v1490_v22, %v2099_v34  ;;  %v1493_v30 = vadd.f32 %v1492_v27, %v1491_v24  ;;  %v1604_v31 = vpop.f32.mrb[27].mxu1 }
 0x12b   :  { %v1605_v32 = vadd.f32 %v1604_v31, %v1603_v26 }
 0x12c   :  { %1425 = vst [vmem:[%s2184_s3 + $0x28] sm:$0xff] %v1369_v28   ;;  %v906_v33 = vadd.f32 %v1602_v25, %v745_v29  ;;  %v748_v35 = vadd.f32 %v1493_v30, %v2099_v34 }
 0x12e   :  { %v909_v36 = vadd.f32 %v1605_v32, %v748_v35  ;;  %v1494_v37 = vpop.f32.mrb[28].mxu0  ;;  %v996_v40 = vmax.f32 %v906_v33, 0.0 }
 0x12f   :  { %v1606_v38 = vpop.f32.mrb[28].mxu1  ;;  %v1495_v39 = vpop.f32.mrb[29].mxu0 }
 0x130   :  { %v997_v41 = vmax.f32 %v909_v36, 0.0  ;;  %v1496_v42 = vadd.f32 %v1495_v39, %v1494_v37  ;;  %v1607_v43 = vpop.f32.mrb[29].mxu1  ;;  %v1497_v44 = vpop.f32.mrb[30].mxu0 }
 0x131   :  { %v1608_v45 = vadd.f32 %v1607_v43, %v1606_v38  ;;  %v1609_v46 = vpop.f32.mrb[30].mxu1  ;;  %v1498_v47 = vpop.f32.mrb[31].mxu0 }
 0x132   :  { %v1374_v48 = vpack.c.bf16 %v997_v41, %v996_v40  ;;  %v753_v49 = vadd.f32 %v1496_v42, %v2099_v34  ;;  %v1499_v50 = vadd.f32 %v1498_v47, %v1497_v44  ;;  %v1610_v51 = vpop.f32.mrb[31].mxu1 }
 0x133   :  { %v1611_v52 = vadd.f32 %v1610_v51, %v1609_v46 }
 0x134   :  { %1426 = vst [vmem:[%s2184_s3 + $0x30] sm:$0xff] %v1374_v48   ;;  %v914_v53 = vadd.f32 %v1608_v45, %v753_v49  ;;  %v756_v54 = vadd.f32 %v1499_v50, %v2099_v34 }
 0x136   :  { %v917_v55 = vadd.f32 %v1611_v52, %v756_v54  ;;  %v1500_v56 = vpop.f32.mrb[32].mxu0  ;;  %v998_v59 = vmax.f32 %v914_v53, 0.0 }
 0x137   :  { %v1612_v57 = vpop.f32.mrb[32].mxu1  ;;  %v1501_v58 = vpop.f32.mrb[33].mxu0 }
 0x138   :  { %v999_v60 = vmax.f32 %v917_v55, 0.0  ;;  %v1502_v61 = vadd.f32 %v1501_v58, %v1500_v56  ;;  %v1613_v62 = vpop.f32.mrb[33].mxu1  ;;  %v1503_v63 = vpop.f32.mrb[34].mxu0 }
 0x139   :  { %v1614_v0 = vadd.f32 %v1613_v62, %v1612_v57  ;;  %v1615_v1 = vpop.f32.mrb[34].mxu1  ;;  %v1504_v2 = vpop.f32.mrb[35].mxu0 }
 0x13a   :  { %v1379_v3 = vpack.c.bf16 %v999_v60, %v998_v59  ;;  %v761_v4 = vadd.f32 %v1502_v61, %v2099_v34  ;;  %v1505_v5 = vadd.f32 %v1504_v2, %v1503_v63  ;;  %v1616_v6 = vpop.f32.mrb[35].mxu1 }
 0x13b   :  { %v1617_v7 = vadd.f32 %v1616_v6, %v1615_v1 }
 0x13c   :  { %1427 = vst [vmem:[%s2184_s3 + $0x38] sm:$0xff] %v1379_v3   ;;  %v922_v8 = vadd.f32 %v1614_v0, %v761_v4  ;;  %v764_v9 = vadd.f32 %v1505_v5, %v2099_v34 }
 0x13e   :  { %v925_v10 = vadd.f32 %v1617_v7, %v764_v9  ;;  %v1506_v11 = vpop.f32.mrb[36].mxu0  ;;  %v1000_v14 = vmax.f32 %v922_v8, 0.0 }
 0x13f   :  { %v1618_v12 = vpop.f32.mrb[36].mxu1  ;;  %v1507_v13 = vpop.f32.mrb[37].mxu0 }
 0x140   :  { %v1001_v15 = vmax.f32 %v925_v10, 0.0  ;;  %v1508_v16 = vadd.f32 %v1507_v13, %v1506_v11  ;;  %v1619_v17 = vpop.f32.mrb[37].mxu1  ;;  %v1509_v18 = vpop.f32.mrb[38].mxu0 }
 0x141   :  { %v1620_v19 = vadd.f32 %v1619_v17, %v1618_v12  ;;  %v1621_v20 = vpop.f32.mrb[38].mxu1  ;;  %v1510_v21 = vpop.f32.mrb[39].mxu0 }
 0x142   :  { %v1384_v22 = vpack.c.bf16 %v1001_v15, %v1000_v14  ;;  %v769_v23 = vadd.f32 %v1508_v16, %v2099_v34  ;;  %v1511_v24 = vadd.f32 %v1510_v21, %v1509_v18  ;;  %v1622_v25 = vpop.f32.mrb[39].mxu1 }
 0x143   :  { %v1623_v26 = vadd.f32 %v1622_v25, %v1621_v20 }
 0x144   :  { %1428 = vst [vmem:[%s2184_s3 + $0x40] sm:$0xff] %v1384_v22   ;;  %v930_v27 = vadd.f32 %v1620_v19, %v769_v23  ;;  %v772_v28 = vadd.f32 %v1511_v24, %v2099_v34 }
 0x146   :  { %v933_v29 = vadd.f32 %v1623_v26, %v772_v28  ;;  %v1512_v30 = vpop.f32.mrb[40].mxu0  ;;  %v1002_v33 = vmax.f32 %v930_v27, 0.0 }
 0x147   :  { %v1624_v31 = vpop.f32.mrb[40].mxu1  ;;  %v1513_v32 = vpop.f32.mrb[41].mxu0 }
 0x148   :  { %v1003_v35 = vmax.f32 %v933_v29, 0.0  ;;  %v1514_v36 = vadd.f32 %v1513_v32, %v1512_v30  ;;  %v1625_v37 = vpop.f32.mrb[41].mxu1  ;;  %v1515_v38 = vpop.f32.mrb[42].mxu0 }
 0x149   :  { %v1626_v39 = vadd.f32 %v1625_v37, %v1624_v31  ;;  %v1627_v40 = vpop.f32.mrb[42].mxu1  ;;  %v1516_v41 = vpop.f32.mrb[43].mxu0 }
 0x14a   :  { %v1389_v42 = vpack.c.bf16 %v1003_v35, %v1002_v33  ;;  %v777_v43 = vadd.f32 %v1514_v36, %v2099_v34  ;;  %v1517_v44 = vadd.f32 %v1516_v41, %v1515_v38  ;;  %v1628_v45 = vpop.f32.mrb[43].mxu1 }
 0x14b   :  { %v1629_v46 = vadd.f32 %v1628_v45, %v1627_v40 }
 0x14c   :  { %1429 = vst [vmem:[%s2184_s3 + $0x48] sm:$0xff] %v1389_v42   ;;  %v938_v47 = vadd.f32 %v1626_v39, %v777_v43  ;;  %v780_v48 = vadd.f32 %v1517_v44, %v2099_v34 }
 0x14e   :  { %v941_v49 = vadd.f32 %v1629_v46, %v780_v48  ;;  %v1518_v50 = vpop.f32.mrb[44].mxu0  ;;  %v1004_v53 = vmax.f32 %v938_v47, 0.0 }
 0x14f   :  { %v1630_v51 = vpop.f32.mrb[44].mxu1  ;;  %v1519_v52 = vpop.f32.mrb[45].mxu0 }
 0x150   :  { %v1005_v54 = vmax.f32 %v941_v49, 0.0  ;;  %v1520_v55 = vadd.f32 %v1519_v52, %v1518_v50  ;;  %v1631_v56 = vpop.f32.mrb[45].mxu1  ;;  %v1521_v57 = vpop.f32.mrb[46].mxu0 }
 0x151   :  { %v1632_v58 = vadd.f32 %v1631_v56, %v1630_v51  ;;  %v1633_v59 = vpop.f32.mrb[46].mxu1  ;;  %v1522_v60 = vpop.f32.mrb[47].mxu0 }
 0x152   :  { %v1394_v61 = vpack.c.bf16 %v1005_v54, %v1004_v53  ;;  %v785_v62 = vadd.f32 %v1520_v55, %v2099_v34  ;;  %v1523_v63 = vadd.f32 %v1522_v60, %v1521_v57  ;;  %v1634_v0 = vpop.f32.mrb[47].mxu1 }
 0x153   :  { %v1635_v1 = vadd.f32 %v1634_v0, %v1633_v59 }
 0x154   :  { %1430 = vst [vmem:[%s2184_s3 + $0x50] sm:$0xff] %v1394_v61   ;;  %v946_v2 = vadd.f32 %v1632_v58, %v785_v62  ;;  %v788_v3 = vadd.f32 %v1523_v63, %v2099_v34 }
 0x156   :  { %v949_v4 = vadd.f32 %v1635_v1, %v788_v3  ;;  %v1524_v5 = vpop.f32.mrb[48].mxu0  ;;  %v1006_v8 = vmax.f32 %v946_v2, 0.0 }
 0x157   :  { %v1636_v6 = vpop.f32.mrb[48].mxu1  ;;  %v1525_v7 = vpop.f32.mrb[49].mxu0 }
 0x158   :  { %v1007_v9 = vmax.f32 %v949_v4, 0.0  ;;  %v1526_v10 = vadd.f32 %v1525_v7, %v1524_v5  ;;  %v1637_v11 = vpop.f32.mrb[49].mxu1  ;;  %v1527_v12 = vpop.f32.mrb[50].mxu0 }
 0x159   :  { %v1638_v13 = vadd.f32 %v1637_v11, %v1636_v6  ;;  %v1639_v14 = vpop.f32.mrb[50].mxu1  ;;  %v1528_v15 = vpop.f32.mrb[51].mxu0 }
 0x15a   :  { %v1399_v16 = vpack.c.bf16 %v1007_v9, %v1006_v8  ;;  %v793_v17 = vadd.f32 %v1526_v10, %v2099_v34  ;;  %v1529_v18 = vadd.f32 %v1528_v15, %v1527_v12  ;;  %v1640_v19 = vpop.f32.mrb[51].mxu1 }
 0x15b   :  { %v1641_v20 = vadd.f32 %v1640_v19, %v1639_v14 }
 0x15c   :  { %1431 = vst [vmem:[%s2184_s3 + $0x58] sm:$0xff] %v1399_v16   ;;  %v954_v21 = vadd.f32 %v1638_v13, %v793_v17  ;;  %v796_v22 = vadd.f32 %v1529_v18, %v2099_v34 }
 0x15e   :  { %v957_v23 = vadd.f32 %v1641_v20, %v796_v22  ;;  %v1530_v24 = vpop.f32.mrb[52].mxu0  ;;  %v1008_v27 = vmax.f32 %v954_v21, 0.0 }
 0x15f   :  { %v1642_v25 = vpop.f32.mrb[52].mxu1  ;;  %v1531_v26 = vpop.f32.mrb[53].mxu0 }
 0x160   :  { %v1009_v28 = vmax.f32 %v957_v23, 0.0  ;;  %v1532_v29 = vadd.f32 %v1531_v26, %v1530_v24  ;;  %v1643_v30 = vpop.f32.mrb[53].mxu1  ;;  %v1533_v31 = vpop.f32.mrb[54].mxu0 }
 0x161   :  { %v1644_v32 = vadd.f32 %v1643_v30, %v1642_v25  ;;  %v1645_v33 = vpop.f32.mrb[54].mxu1  ;;  %v1534_v35 = vpop.f32.mrb[55].mxu0 }
 0x162   :  { %v1404_v36 = vpack.c.bf16 %v1009_v28, %v1008_v27  ;;  %v801_v37 = vadd.f32 %v1532_v29, %v2099_v34  ;;  %v1535_v38 = vadd.f32 %v1534_v35, %v1533_v31  ;;  %v1646_v39 = vpop.f32.mrb[55].mxu1 }
 0x163   :  { %v1647_v40 = vadd.f32 %v1646_v39, %v1645_v33 }
 0x164   :  { %1432 = vst [vmem:[%s2184_s3 + $0x60] sm:$0xff] %v1404_v36   ;;  %v962_v41 = vadd.f32 %v1644_v32, %v801_v37  ;;  %v804_v42 = vadd.f32 %v1535_v38, %v2099_v34 }
 0x166   :  { %v965_v43 = vadd.f32 %v1647_v40, %v804_v42  ;;  %v1536_v44 = vpop.f32.mrb[56].mxu0  ;;  %v1010_v47 = vmax.f32 %v962_v41, 0.0 }
 0x167   :  { %v1648_v45 = vpop.f32.mrb[56].mxu1  ;;  %v1537_v46 = vpop.f32.mrb[57].mxu0 }
 0x168   :  { %v1011_v48 = vmax.f32 %v965_v43, 0.0  ;;  %v1538_v49 = vadd.f32 %v1537_v46, %v1536_v44  ;;  %v1649_v50 = vpop.f32.mrb[57].mxu1  ;;  %v1539_v51 = vpop.f32.mrb[58].mxu0 }
 0x169   :  { %v1650_v52 = vadd.f32 %v1649_v50, %v1648_v45  ;;  %v1651_v53 = vpop.f32.mrb[58].mxu1  ;;  %v1540_v54 = vpop.f32.mrb[59].mxu0 }
 0x16a   :  { %v1409_v55 = vpack.c.bf16 %v1011_v48, %v1010_v47  ;;  %v809_v56 = vadd.f32 %v1538_v49, %v2099_v34  ;;  %v1541_v57 = vadd.f32 %v1540_v54, %v1539_v51  ;;  %v1652_v58 = vpop.f32.mrb[59].mxu1 }
 0x16b   :  { %v1653_v59 = vadd.f32 %v1652_v58, %v1651_v53 }
 0x16c   :  { %1433 = vst [vmem:[%s2184_s3 + $0x68] sm:$0xff] %v1409_v55   ;;  %v970_v60 = vadd.f32 %v1650_v52, %v809_v56  ;;  %v812_v61 = vadd.f32 %v1541_v57, %v2099_v34 }
 0x16e   :  { %v973_v62 = vadd.f32 %v1653_v59, %v812_v61  ;;  %v1542_v63 = vpop.f32.mrb[60].mxu0  ;;  %v1012_v2 = vmax.f32 %v970_v60, 0.0 }
 0x16f   :  { %v1654_v0 = vpop.f32.mrb[60].mxu1  ;;  %v1543_v1 = vpop.f32.mrb[61].mxu0 }
 0x170   :  { %v1013_v3 = vmax.f32 %v973_v62, 0.0  ;;  %v1544_v4 = vadd.f32 %v1543_v1, %v1542_v63  ;;  %v1655_v5 = vpop.f32.mrb[61].mxu1  ;;  %v1545_v6 = vpop.f32.mrb[62].mxu0 }
 0x171   :  { %v1656_v7 = vadd.f32 %v1655_v5, %v1654_v0  ;;  %v1657_v8 = vpop.f32.mrb[62].mxu1  ;;  %v1546_v9 = vpop.f32.mrb[63].mxu0 }
 0x172   :  { %v1414_v10 = vpack.c.bf16 %v1013_v3, %v1012_v2  ;;  %v817_v11 = vadd.f32 %v1544_v4, %v2099_v34  ;;  %v1547_v12 = vadd.f32 %v1546_v9, %v1545_v6  ;;  %v1658_v13 = vpop.f32.mrb[63].mxu1 }
 0x173   :  { %v1659_v14 = vadd.f32 %v1658_v13, %v1657_v8 }
 0x174   :  { %1434 = vst [vmem:[%s2184_s3 + $0x70] sm:$0xff] %v1414_v10   ;;  %v978_v15 = vadd.f32 %v1656_v7, %v817_v11  ;;  %v820_v16 = vadd.f32 %v1547_v12, %v2099_v34 }
 0x176   :  { %v981_v17 = vadd.f32 %v1659_v14, %v820_v16  ;;  %v1014_v18 = vmax.f32 %v978_v15, 0.0 }
 0x178   :  { %v1015_v19 = vmax.f32 %v981_v17, 0.0 }
 0x17a   :  { %v1419_v20 = vpack.c.bf16 %v1015_v19, %v1014_v18 }
 0x17c   :  { %1435 = vst [vmem:[%s2184_s3 + $0x78] sm:$0xff] %v1419_v20  }

// kernel: dueling_forward.6
= control target key start
LH: loop header
LB: loop body
LE: loop exit
PB: predicated region body
PF: predicated region fallthrough
CT: control target
= control target key end

     0   :  { %s2853_s1 = inlined_call_operand.vmem [shape: bf16[640,128], index: 1, kind: input, shape index: {}]   ;;  %s2854_s0 = inlined_call_operand.vmem [shape: bf16[256,640], index: 0, kind: input, shape index: {}]   ;;  %s2855_s2 = inlined_call_operand.vmem [shape: f32[1,128], index: 2, kind: input, shape index: {}]   ;;  %s2856_s3 = inlined_call_operand.vmem [shape: bf16[256,128], index: 3, kind: output, shape index: {}]  }
   0x1   :  { %v2125_v0 = vld [vmem:[%s2853_s1 + $0x40] sm:$0xff]   ;;  %v2127_v2 = vld [vmem:[%s2853_s1 + $0x48] sm:$0xff]   ;;  %v2129_v4 = vld [vmem:[%s2853_s1 + $0x50] sm:$0xff]  }
   0x2   :  { %v2126_v1 = vld [vmem:[%s2853_s1] sm:$0xff]   ;;  %1813 = vmatprep.subr.bf16.mxu0 %v2125_v0  ;;  %2109 = vmatprep.subr.bf16.mxu1 %v2125_v0  ;;  %v2128_v3 = vld [vmem:[%s2853_s1 + $0x8] sm:$0xff]   ;;  %v2130_v5 = vld [vmem:[%s2853_s1 + $0x10] sm:$0xff]  }
   0x3   :  { %1814 = vmatpush3.bf16.msra.mxu0 %v2126_v1  ;;  %2117 = vmatpush3.bf16.msra.mxu1 %v2126_v1  ;;  %v2131_v6 = vld [vmem:[%s2853_s1 + $0x58] sm:$0xff]   ;;  %v2133_v8 = vld [vmem:[%s2853_s1 + $0x60] sm:$0xff]   ;;  %v2135_v10 = vld [vmem:[%s2853_s1 + $0x68] sm:$0xff]  }
   0x4   :  { %1815 = vmatprep.subr.bf16.mxu0 %v2127_v2  ;;  %2110 = vmatprep.subr.bf16.mxu1 %v2127_v2  ;;  %v2132_v7 = vld [vmem:[%s2853_s1 + $0x18] sm:$0xff]   ;;  %v2134_v9 = vld [vmem:[%s2853_s1 + $0x20] sm:$0xff]   ;;  %v2136_v13 = vld [vmem:[%s2853_s1 + $0x28] sm:$0xff]  }
   0x5   :  { %v2143_v11 = vld [vmem:[%s2854_s0 + $0x4] ss:$20 sps:$4 sm:$0xff]   ;;  %v2137_v14 = vld [vmem:[%s2853_s1 + $0x70] sm:$0xff]   ;;  %v2149_v23 = vld [vmem:[%s2853_s1 + $0xc8] sm:$0xff]  }
   0x6   :  { %v2146_v12 = vld [vmem:[%s2854_s0 + $0x1e4] ss:$20 sps:$4 sm:$0xff]   ;;  %886 = vmatprep.mubr.bf16.mxu0 %v2143_v11  ;;  %v2138_v15 = vld [vmem:[%s2853_s1 + $0x30] sm:$0xff]   ;;  %v2152_v24 = vld [vmem:[%s2854_s0 + $0x2c] ss:$20 sps:$4 sm:$0xff]  }
   0x7   :  { %1816 = vmatpush3.bf16.msra.mxu0 %v2128_v3  ;;  %2118 = vmatpush3.bf16.msra.mxu1 %v2128_v3  ;;  %v2139_v16 = vld [vmem:[%s2853_s1 + $0x78] sm:$0xff]   ;;  %v2147_v18 = vld [vmem:[%s2853_s1 + $0xc0] sm:$0xff]   ;;  %v2169_v26 = vld [vmem:[%s2853_s1 + $0x108] sm:$0xff]  }
   0x8   :  { %1817 = vmatprep.subr.bf16.mxu0 %v2129_v4  ;;  %2111 = vmatprep.subr.bf16.mxu1 %v2129_v4  ;;  %v2140_v17 = vld [vmem:[%s2853_s1 + $0x38] sm:$0xff]   ;;  %v2150_v19 = vld [vmem:[%s2853_s1 + $0x100] sm:$0xff]   ;;  %v2151_v27 = vld [vmem:[%s2853_s1 + $0x88] sm:$0xff]  }
   0x9   :  { %982 = vmatprep.mubr.bf16.mxu1 %v2146_v12  ;;  %v2141_v20 = vld [vmem:[%s2854_s0] ss:$20 sps:$4 sm:$0xff]   ;;  %v2156_v28 = vld [vmem:[%s2854_s0 + $0x28] ss:$20 sps:$4 sm:$0xff]   ;;  %v2166_v37 = vld [vmem:[%s2854_s0 + $0x50] ss:$20 sps:$4 sm:$0xff]  }
   0xa   :  { %v2144_v21 = vld [vmem:[%s2854_s0 + $0x1e0] ss:$20 sps:$4 sm:$0xff]   ;;  %v2157_v30 = vld [vmem:[%s2854_s0 + $0x208] ss:$20 sps:$4 sm:$0xff]   ;;  %v2167_v39 = vld [vmem:[%s2854_s0 + $0x230] ss:$20 sps:$4 sm:$0xff]  }
   0xb   :  { %1818 = vmatpush3.bf16.msra.mxu0 %v2130_v5  ;;  %2119 = vmatpush3.bf16.msra.mxu1 %v2130_v5  ;;  %v2148_v22 = vld [vmem:[%s2853_s1 + $0x80] sm:$0xff]   ;;  %v2158_v29 = vld [vmem:[%s2853_s1 + $0xd0] sm:$0xff]   ;;  %v2160_v33 = vld [vmem:[%s2853_s1 + $0xd8] sm:$0xff]  }
   0xc   :  { %1819 = vmatprep.subr.bf16.mxu0 %v2131_v6  ;;  %2112 = vmatprep.subr.bf16.mxu1 %v2131_v6  ;;  %v2154_v25 = vld [vmem:[%s2854_s0 + $0x20c] ss:$20 sps:$4 sm:$0xff]   ;;  %v2159_v31 = vld [vmem:[%s2853_s1 + $0x90] sm:$0xff]   ;;  %v2161_v35 = vld [vmem:[%s2853_s1 + $0x98] sm:$0xff]  }
   0xd   :  { %v2162_v32 = vld [vmem:[%s2854_s0 + $0x54] ss:$20 sps:$4 sm:$0xff]   ;;  %v2168_v36 = vld [vmem:[%s2853_s1 + $0xe0] sm:$0xff]   ;;  %v2173_v42 = vld [vmem:[%s2854_s0 + $0x7c] ss:$20 sps:$4 sm:$0xff]  }
   0xe   :  { %v2164_v34 = vld [vmem:[%s2854_s0 + $0x234] ss:$20 sps:$4 sm:$0xff]   ;;  %v2170_v40 = vld [vmem:[%s2853_s1 + $0xa0] sm:$0xff]   ;;  %v2175_v43 = vld [vmem:[%s2854_s0 + $0x25c] ss:$20 sps:$4 sm:$0xff]  }
   0xf   :  { %1820 = vmatpush3.bf16.msra.mxu0 %v2132_v7  ;;  %2120 = vmatpush3.bf16.msra.mxu1 %v2132_v7  ;;  %v2182_v38 = vld [vmem:[%s2853_s1 + $0x110] sm:$0xff]   ;;  %v2171_v41 = vld [vmem:[%s2853_s1 + $0xe8] sm:$0xff]   ;;  %v2196_v45 = vld [vmem:[%s2853_s1 + $0x118] sm:$0xff]  }
  0x10   :  { %1821 = vmatprep.subr.bf16.mxu0 %v2133_v8  ;;  %2113 = vmatprep.subr.bf16.mxu1 %v2133_v8  ;;  %v2172_v44 = vld [vmem:[%s2853_s1 + $0xa8] sm:$0xff]   ;;  %v2179_v48 = vld [vmem:[%s2853_s1 + $0xf0] sm:$0xff]   ;;  %v2181_v50 = vld [vmem:[%s2853_s1 + $0xf8] sm:$0xff]  }
  0x11   :  { %v2177_v46 = vld [vmem:[%s2854_s0 + $0x78] ss:$20 sps:$4 sm:$0xff]   ;;  %v2180_v49 = vld [vmem:[%s2853_s1 + $0xb0] sm:$0xff]   ;;  %v2203_v52 = vld [vmem:[%s2853_s1 + $0x120] sm:$0xff]  }
  0x12   :  { %v2178_v47 = vld [vmem:[%s2854_s0 + $0x258] ss:$20 sps:$4 sm:$0xff]   ;;  %v2186_v55 = vld [vmem:[%s2854_s0 + $0x8] ss:$20 sps:$4 sm:$0xff]   ;;  %v2189_v56 = vld [vmem:[%s2854_s0 + $0xa0] ss:$20 sps:$4 sm:$0xff]  }
  0x13   :  { %1822 = vmatpush3.bf16.msra.mxu0 %v2134_v9  ;;  %2121 = vmatpush3.bf16.msra.mxu1 %v2134_v9  ;;  %v2184_v51 = vld [vmem:[%s2854_s0 + $0xa4] ss:$20 sps:$4 sm:$0xff]   ;;  %v2188_v53 = vld [vmem:[%s2854_s0 + $0xc] ss:$20 sps:$4 sm:$0xff]   ;;  %v2192_v59 = vld [vmem:[%s2854_s0 + $0x34] ss:$20 sps:$4 sm:$0xff]  }
  0x14   :  { %1823 = vmatprep.subr.bf16.mxu0 %v2135_v10  ;;  %2114 = vmatprep.subr.bf16.mxu1 %v2135_v10  ;;  %v2183_v54 = vld [vmem:[%s2853_s1 + $0xb8] sm:$0xff]   ;;  %v2216_v57 = vld [vmem:[%s2853_s1 + $0x128] sm:$0xff]   ;;  %v2223_v60 = vld [vmem:[%s2853_s1 + $0x130] sm:$0xff]  }
  0x15   :  { %v2190_v58 = vld [vmem:[%s2854_s0 + $0xcc] ss:$20 sps:$4 sm:$0xff]   ;;  %v2194_v61 = vld [vmem:[%s2854_s0 + $0xc8] ss:$20 sps:$4 sm:$0xff]   ;;  %v2195_v62 = vld [vmem:[%s2854_s0 + $0x30] ss:$20 sps:$4 sm:$0xff]  }
  0x16   :  { %v2197_v63 = vld [vmem:[%s2854_s0 + $0xf4] ss:$20 sps:$4 sm:$0xff]   ;;  %v2199_v0 = vld [vmem:[%s2854_s0 + $0x5c] ss:$20 sps:$4 sm:$0xff]   ;;  %v2202_v3 = vld [vmem:[%s2854_s0 + $0x58] ss:$20 sps:$4 sm:$0xff]  }
  0x17   :  { %1824 = vmatpush3.bf16.msra.mxu0 %v2136_v13  ;;  %2122 = vmatpush3.bf16.msra.mxu1 %v2136_v13  ;;  %v2236_v1 = vld [vmem:[%s2853_s1 + $0x138] sm:$0xff]   ;;  %v2201_v2 = vld [vmem:[%s2854_s0 + $0xf0] ss:$20 sps:$4 sm:$0xff]   ;;  %v2209_v7 = vld [vmem:[%s2854_s0 + $0x80] ss:$20 sps:$4 sm:$0xff]  }
  0x18   :  { %1825 = vmatprep.subr.bf16.mxu0 %v2137_v14  ;;  %2115 = vmatprep.subr.bf16.mxu1 %v2137_v14  ;;  %v2204_v4 = vld [vmem:[%s2854_s0 + $0x11c] ss:$20 sps:$4 sm:$0xff]   ;;  %v2206_v5 = vld [vmem:[%s2854_s0 + $0x84] ss:$20 sps:$4 sm:$0xff]   ;;  %v2212_v9 = vld [vmem:[%s2854_s0 + $0xac] ss:$20 sps:$4 sm:$0xff]  }
  0x19   :  { %v2208_v6 = vld [vmem:[%s2854_s0 + $0x118] ss:$20 sps:$4 sm:$0xff]   ;;  %v2214_v10 = vld [vmem:[%s2854_s0 + $0x140] ss:$20 sps:$4 sm:$0xff]   ;;  %v2215_v11 = vld [vmem:[%s2854_s0 + $0xa8] ss:$20 sps:$4 sm:$0xff]  }
  0x1a   :  { %v2210_v8 = vld [vmem:[%s2854_s0 + $0x144] ss:$20 sps:$4 sm:$0xff]   ;;  %v2217_v12 = vld [vmem:[%s2854_s0 + $0x16c] ss:$20 sps:$4 sm:$0xff]   ;;  %v2219_v13 = vld [vmem:[%s2854_s0 + $0xd4] ss:$20 sps:$4 sm:$0xff]  }
  0x1b   :  { %1826 = vmatpush3.bf16.msra.mxu0 %v2138_v15  ;;  %2123 = vmatpush3.bf16.msra.mxu1 %v2138_v15  ;;  %v2221_v14 = vld [vmem:[%s2854_s0 + $0x168] ss:$20 sps:$4 sm:$0xff]   ;;  %v2222_v15 = vld [vmem:[%s2854_s0 + $0xd0] ss:$20 sps:$4 sm:$0xff]  }
  0x1c   :  { %1827 = vmatprep.subr.bf16.mxu0 %v2139_v16  ;;  %2116 = vmatprep.subr.bf16.mxu1 %v2139_v16  ;;  %v2224_v16 = vld [vmem:[%s2854_s0 + $0x194] ss:$20 sps:$4 sm:$0xff]  }
  0x1f   :  { %1828 = vmatpush3.bf16.msra.mxu0 %v2140_v17  ;;  %2124 = vmatpush3.bf16.msra.mxu1 %v2140_v17  ;;  %v2226_v17 = vld [vmem:[%s2854_s0 + $0xfc] ss:$20 sps:$4 sm:$0xff]  }
  0x20   :  { %1925 = vmatprep.subr.bf16.mxu1 %v2147_v18  ;;  %2061 = vmatprep.subr.bf16.mxu0 %v2150_v19  ;;  %v2228_v18 = vld [vmem:[%s2854_s0 + $0x190] ss:$20 sps:$4 sm:$0xff]  }
  0x22   :  { %887 = vmatmul.mubr.bf16.vlgmr.msra.gmra.mrb[0].mxu0 %v2141_v20  ;;  %983 = vmatmul.mubr.bf16.vlgmr.msra.gmra.mrb[0].mxu1 %v2144_v21  ;;  %v2230_v20 = vld [vmem:[%s2854_s0 + $0x1bc] ss:$20 sps:$4 sm:$0xff]   ;;  %v2232_v21 = vld [vmem:[%s2854_s0 + $0x124] ss:$20 sps:$4 sm:$0xff]  }
  0x23   :  { %1926 = vmatpush3.bf16.msra.mxu1 %v2148_v22  ;;  %2062 = vmatpush3.bf16.msra.mxu0 %v2150_v19  ;;  %v2229_v19 = vld [vmem:[%s2854_s0 + $0xf8] ss:$20 sps:$4 sm:$0xff]  }
  0x24   :  { %1927 = vmatprep.subr.bf16.mxu1 %v2149_v23  ;;  %894 = vmatprep.mubr.bf16.mxu0 %v2152_v24  ;;  %v2234_v22 = vld [vmem:[%s2854_s0 + $0x1b8] ss:$20 sps:$4 sm:$0xff]   ;;  %v2235_v23 = vld [vmem:[%s2854_s0 + $0x120] ss:$20 sps:$4 sm:$0xff]  }
  0x25   :  { %990 = vmatprep.mubr.bf16.mxu1 %v2154_v25  ;;  %2063 = vmatprep.subr.bf16.mxu0 %v2169_v26  ;;  %v2237_v24 = vld [vmem:[%s2854_s0 + $0x14c] ss:$20 sps:$4 sm:$0xff]   ;;  %v2239_v25 = vld [vmem:[%s2854_s0 + $0x10] ss:$20 sps:$4 sm:$0xff]  }
  0x27   :  { %1928 = vmatpush3.bf16.msra.mxu1 %v2151_v27  ;;  %2064 = vmatpush3.bf16.msra.mxu0 %v2169_v26  ;;  %v2240_v26 = vld [vmem:[%s2854_s0 + $0x148] ss:$20 sps:$4 sm:$0xff]   ;;  %v2241_v27 = vld [vmem:[%s2854_s0 + $0x38] ss:$20 sps:$4 sm:$0xff]  }
  0x28   :  { %1929 = vmatprep.subr.bf16.mxu1 %v2158_v29  ;;  %2065 = vmatprep.subr.bf16.mxu0 %v2182_v38  ;;  %v2244_v29 = vld [vmem:[%s2854_s0 + $0x60] ss:$20 sps:$4 sm:$0xff]  }
  0x2a   :  { %895 = vmatmul.mubr.bf16.gmra.mrb[4].mxu0 %v2156_v28  ;;  %991 = vmatmul.mubr.bf16.gmra.mrb[4].mxu1 %v2157_v30  ;;  %v2242_v28 = vld [vmem:[%s2854_s0 + $0x174] ss:$20 sps:$4 sm:$0xff]   ;;  %v2245_v30 = vld [vmem:[%s2854_s0 + $0x170] ss:$20 sps:$4 sm:$0xff]  }
  0x2b   :  { %1930 = vmatpush3.bf16.msra.mxu1 %v2159_v31  ;;  %902 = vmatprep.mubr.bf16.mxu0 %v2162_v32  ;;  %v2246_v31 = vld [vmem:[%s2854_s0 + $0x88] ss:$20 sps:$4 sm:$0xff]  }
  0x2c   :  { %1931 = vmatprep.subr.bf16.mxu1 %v2160_v33  ;;  %998 = vmatprep.mubr.bf16.mxu1 %v2164_v34  ;;  %v2247_v32 = vld [vmem:[%s2854_s0 + $0x19c] ss:$20 sps:$4 sm:$0xff]   ;;  %v2250_v34 = vld [vmem:[%s2854_s0 + $0x198] ss:$20 sps:$4 sm:$0xff]  }
  0x2d   :  { %2066 = vmatpush3.bf16.msra.mxu0 %v2182_v38  ;;  %v2249_v33 = vld [vmem:[%s2854_s0 + $0xb0] ss:$20 sps:$4 sm:$0xff]   ;;  %v2255_v38 = vld [vmem:[%s2854_s0 + $0x1c0] ss:$20 sps:$4 sm:$0xff]  }
  0x2e   :  { %2067 = vmatprep.subr.bf16.mxu0 %v2196_v45 }
  0x2f   :  { %1932 = vmatpush3.bf16.msra.mxu1 %v2161_v35  ;;  %v2251_v35 = vld [vmem:[%s2854_s0 + $0xd8] ss:$20 sps:$4 sm:$0xff]  }
  0x30   :  { %1933 = vmatprep.subr.bf16.mxu1 %v2168_v36  ;;  %v2252_v36 = vld [vmem:[%s2854_s0 + $0x1c4] ss:$20 sps:$4 sm:$0xff]  }
  0x31   :  { %2068 = vmatpush3.bf16.msra.mxu0 %v2196_v45  ;;  %v2264_v45 = vld [vmem:[%s2854_s0 + $0x1a0] ss:$20 sps:$4 sm:$0xff]  }
  0x32   :  { %903 = vmatmul.mubr.bf16.gmra.mrb[8].mxu0 %v2166_v37  ;;  %999 = vmatmul.mubr.bf16.gmra.mrb[8].mxu1 %v2167_v39  ;;  %v2254_v37 = vld [vmem:[%s2854_s0 + $0x100] ss:$20 sps:$4 sm:$0xff]   ;;  %v2256_v39 = vld [vmem:[%s2854_s0 + $0x128] ss:$20 sps:$4 sm:$0xff]  }
  0x33   :  { %1934 = vmatpush3.bf16.msra.mxu1 %v2170_v40  ;;  %910 = vmatprep.mubr.bf16.mxu0 %v2173_v42  ;;  %v2257_v40 = vld [vmem:[%s2854_s0 + $0x1ec] ss:$20 sps:$4 sm:$0xff]   ;;  %v2260_v42 = vld [vmem:[%s2854_s0 + $0x1e8] ss:$20 sps:$4 sm:$0xff]  }
  0x34   :  { %1935 = vmatprep.subr.bf16.mxu1 %v2171_v41  ;;  %1006 = vmatprep.mubr.bf16.mxu1 %v2175_v43  ;;  %v2259_v41 = vld [vmem:[%s2854_s0 + $0x150] ss:$20 sps:$4 sm:$0xff]   ;;  %v2261_v43 = vld [vmem:[%s2854_s0 + $0x178] ss:$20 sps:$4 sm:$0xff]  }
  0x35   :  { %2069 = vmatprep.subr.bf16.mxu0 %v2203_v52 }
  0x36   :  { %2070 = vmatpush3.bf16.msra.mxu0 %v2203_v52  ;;  %v2272_v52 = vld [vmem:[%s2854_s0 + $0x264] ss:$20 sps:$4 sm:$0xff]  }
  0x37   :  { %1936 = vmatpush3.bf16.msra.mxu1 %v2172_v44  ;;  %2071 = vmatprep.subr.bf16.mxu0 %v2216_v57  ;;  %v2262_v44 = vld [vmem:[%s2854_s0 + $0x214] ss:$20 sps:$4 sm:$0xff]  }
  0x38   :  { %1937 = vmatprep.subr.bf16.mxu1 %v2179_v48  ;;  %v2267_v48 = vld [vmem:[%s2854_s0 + $0x23c] ss:$20 sps:$4 sm:$0xff]  }
  0x3a   :  { %911 = vmatmul.mubr.bf16.gmra.mrb[12].mxu0 %v2177_v46  ;;  %1007 = vmatmul.mubr.bf16.gmra.mrb[12].mxu1 %v2178_v47  ;;  %v2265_v46 = vld [vmem:[%s2854_s0 + $0x210] ss:$20 sps:$4 sm:$0xff]   ;;  %v2266_v47 = vld [vmem:[%s2854_s0 + $0x1c8] ss:$20 sps:$4 sm:$0xff]  }
  0x3b   :  { %1938 = vmatpush3.bf16.msra.mxu1 %v2180_v49  ;;  %918 = vmatprep.mubr.bf16.mxu0 %v2184_v51  ;;  %v2269_v49 = vld [vmem:[%s2854_s0 + $0x1f0] ss:$20 sps:$4 sm:$0xff]   ;;  %v2271_v51 = vld [vmem:[%s2854_s0 + $0x218] ss:$20 sps:$4 sm:$0xff]  }
  0x3c   :  { %1939 = vmatprep.subr.bf16.mxu1 %v2181_v50  ;;  %1047 = vmatprep.mubr.bf16.mxu1 %v2188_v53  ;;  %v2270_v50 = vld [vmem:[%s2854_s0 + $0x238] ss:$20 sps:$4 sm:$0xff]   ;;  %v2274_v53 = vld [vmem:[%s2854_s0 + $0x240] ss:$20 sps:$4 sm:$0xff]  }
  0x3d   :  { %2072 = vmatpush3.bf16.msra.mxu0 %v2216_v57 }
  0x3e   :  { %2073 = vmatprep.subr.bf16.mxu0 %v2223_v60 }
  0x3f   :  { %1940 = vmatpush3.bf16.msra.mxu1 %v2183_v54  ;;  %v2275_v54 = vld [vmem:[%s2854_s0 + $0x260] ss:$20 sps:$4 sm:$0xff]  }
  0x41   :  { %2074 = vmatpush3.bf16.msra.mxu0 %v2223_v60 }
  0x42   :  { %919 = vmatmul.mubr.bf16.gmra.mrb[16].mxu0 %v2189_v56  ;;  %1048 = vmatmul.mubr.bf16.vlgmr.msra.gmra.mrb[16].mxu1 %v2186_v55  ;;  %v2276_v55 = vld [vmem:[%s2854_s0 + $0x268] ss:$20 sps:$4 sm:$0xff]  }
  0x43   :  { %926 = vmatprep.mubr.bf16.mxu0 %v2190_v58  ;;  %1055 = vmatprep.mubr.bf16.mxu1 %v2192_v59 }
  0x44   :  { %2075 = vmatprep.subr.bf16.mxu0 %v2236_v1 }
  0x45   :  { %2076 = vmatpush3.bf16.msra.mxu0 %v2236_v1 }
  0x4a   :  { %927 = vmatmul.mubr.bf16.gmra.mrb[20].mxu0 %v2194_v61  ;;  %1056 = vmatmul.mubr.bf16.gmra.mrb[20].mxu1 %v2195_v62 }
  0x4b   :  { %934 = vmatprep.mubr.bf16.mxu0 %v2197_v63  ;;  %1063 = vmatprep.mubr.bf16.mxu1 %v2199_v0 }
  0x52   :  { %935 = vmatmul.mubr.bf16.gmra.mrb[24].mxu0 %v2201_v2  ;;  %1064 = vmatmul.mubr.bf16.gmra.mrb[24].mxu1 %v2202_v3 }
  0x53   :  { %942 = vmatprep.mubr.bf16.mxu0 %v2204_v4  ;;  %1071 = vmatprep.mubr.bf16.mxu1 %v2206_v5 }
  0x5a   :  { %943 = vmatmul.mubr.bf16.gmra.mrb[28].mxu0 %v2208_v6  ;;  %1072 = vmatmul.mubr.bf16.gmra.mrb[28].mxu1 %v2209_v7 }
  0x5b   :  { %950 = vmatprep.mubr.bf16.mxu0 %v2210_v8  ;;  %1079 = vmatprep.mubr.bf16.mxu1 %v2212_v9 }
  0x62   :  { %951 = vmatmul.mubr.bf16.gmra.mrb[32].mxu0 %v2214_v10  ;;  %1080 = vmatmul.mubr.bf16.gmra.mrb[32].mxu1 %v2215_v11 }
  0x63   :  { %958 = vmatprep.mubr.bf16.mxu0 %v2217_v12  ;;  %1087 = vmatprep.mubr.bf16.mxu1 %v2219_v13 }
  0x6a   :  { %959 = vmatmul.mubr.bf16.gmra.mrb[36].mxu0 %v2221_v14  ;;  %1088 = vmatmul.mubr.bf16.gmra.mrb[36].mxu1 %v2222_v15 }
  0x6b   :  { %966 = vmatprep.mubr.bf16.mxu0 %v2224_v16  ;;  %1095 = vmatprep.mubr.bf16.mxu1 %v2226_v17 }
  0x72   :  { %967 = vmatmul.mubr.bf16.gmra.mrb[40].mxu0 %v2228_v18  ;;  %1096 = vmatmul.mubr.bf16.gmra.mrb[40].mxu1 %v2229_v19 }
  0x73   :  { %974 = vmatprep.mubr.bf16.mxu0 %v2230_v20  ;;  %1103 = vmatprep.mubr.bf16.mxu1 %v2232_v21 }
  0x7a   :  { %975 = vmatmul.mubr.bf16.gmra.mrb[44].mxu0 %v2234_v22  ;;  %1104 = vmatmul.mubr.bf16.gmra.mrb[44].mxu1 %v2235_v23 }
  0x7b   :  { %1111 = vmatprep.mubr.bf16.mxu1 %v2237_v24  ;;  %2077 = vmatprep.mubr.bf16.mxu0 %v2239_v25 }
  0x82   :  { %1112 = vmatmul.mubr.bf16.gmra.mrb[48].mxu1 %v2240_v26  ;;  %2078 = vmatmul.mubr.bf16.vlgmr.msra.gmra.mrb[48].mxu0 %v2241_v27 }
  0x83   :  { %1119 = vmatprep.mubr.bf16.mxu1 %v2242_v28  ;;  %2081 = vmatprep.mubr.bf16.mxu0 %v2244_v29 }
  0x8a   :  { %1120 = vmatmul.mubr.bf16.gmra.mrb[52].mxu1 %v2245_v30  ;;  %2082 = vmatmul.mubr.bf16.gmra.mrb[52].mxu0 %v2246_v31 }
  0x8b   :  { %1127 = vmatprep.mubr.bf16.mxu1 %v2247_v32  ;;  %2085 = vmatprep.mubr.bf16.mxu0 %v2249_v33 }
  0x92   :  { %1128 = vmatmul.mubr.bf16.gmra.mrb[56].mxu1 %v2250_v34  ;;  %2086 = vmatmul.mubr.bf16.gmra.mrb[56].mxu0 %v2251_v35 }
  0x93   :  { %1135 = vmatprep.mubr.bf16.mxu1 %v2252_v36  ;;  %2089 = vmatprep.mubr.bf16.mxu0 %v2254_v37 }
  0x9a   :  { %1136 = vmatmul.mubr.bf16.gmra.mrb[60].mxu1 %v2255_v38  ;;  %2090 = vmatmul.mubr.bf16.gmra.mrb[60].mxu0 %v2256_v39 }
  0x9b   :  { %1143 = vmatprep.mubr.bf16.mxu1 %v2257_v40  ;;  %2093 = vmatprep.mubr.bf16.mxu0 %v2259_v41 }
  0xa2   :  { %1144 = vmatmul.mubr.bf16.gmra.mrb[64].mxu1 %v2260_v42  ;;  %2094 = vmatmul.mubr.bf16.gmra.mrb[64].mxu0 %v2261_v43  ;;  %v2676_v42 = vld [vmem:[%s2855_s2] ss:$0 sm:$0xff] }
  0xa3   :  { %1151 = vmatprep.mubr.bf16.mxu1 %v2262_v44  ;;  %2097 = vmatprep.mubr.bf16.mxu0 %v2264_v45 }
  0xaa   :  { %1152 = vmatmul.mubr.bf16.gmra.mrb[68].mxu1 %v2265_v46  ;;  %2098 = vmatmul.mubr.bf16.gmra.mrb[68].mxu0 %v2266_v47 }
  0xab   :  { %1159 = vmatprep.mubr.bf16.mxu1 %v2267_v48  ;;  %2101 = vmatprep.mubr.bf16.mxu0 %v2269_v49 }
  0xb2   :  { %1160 = vmatmul.mubr.bf16.gmra.mrb[72].mxu1 %v2270_v50  ;;  %2102 = vmatmul.mubr.bf16.gmra.mrb[72].mxu0 %v2271_v51 }
  0xb3   :  { %1167 = vmatprep.mubr.bf16.mxu1 %v2272_v52  ;;  %2105 = vmatprep.mubr.bf16.mxu0 %v2274_v53 }
  0xba   :  { %1168 = vmatmul.mubr.bf16.gmra.mrb[76].mxu1 %v2275_v54  ;;  %2106 = vmatmul.mubr.bf16.gmra.mrb[76].mxu0 %v2276_v55 }
  0xf5   :  { %v1901_v56 = vpop.f32.mrb[0].mxu1  ;;  %v1829_v57 = vpop.f32.mrb[0].mxu0 }
  0xf6   :  { %v1902_v58 = vpop.f32.mrb[1].mxu1  ;;  %v1830_v59 = vpop.f32.mrb[1].mxu0 }
  0xf7   :  { %v2657_v60 = vadd.f32 %v1902_v58, %v1901_v56  ;;  %v1904_v61 = vpop.f32.mrb[2].mxu1  ;;  %v1831_v62 = vadd.f32 %v1830_v59, %v1829_v57  ;;  %v1832_v63 = vpop.f32.mrb[2].mxu0 }
  0xf8   :  { %v1905_v0 = vpop.f32.mrb[3].mxu1  ;;  %v1833_v1 = vpop.f32.mrb[3].mxu0 }
  0xf9   :  { %v2659_v2 = vadd.f32 %v1905_v0, %v1904_v61  ;;  %v1834_v3 = vadd.f32 %v1833_v1, %v1832_v63  ;;  %v889_v45 = vadd.f32 %v1831_v62, %v2676_v42 }
  0xfb   :  { %v892_v52 = vadd.f32 %v1834_v3, %v2676_v42 }
  0xfd   :  { %v1907_v4 = vpop.f32.mrb[4].mxu1  ;;  %v1835_v5 = vpop.f32.mrb[4].mxu0 }
  0xfe   :  { %v1908_v6 = vpop.f32.mrb[5].mxu1  ;;  %v1836_v7 = vpop.f32.mrb[5].mxu0 }
  0xff   :  { %v2661_v8 = vadd.f32 %v1908_v6, %v1907_v4  ;;  %v1910_v9 = vpop.f32.mrb[6].mxu1  ;;  %v1837_v10 = vadd.f32 %v1836_v7, %v1835_v5  ;;  %v1838_v11 = vpop.f32.mrb[6].mxu0 }
 0x100   :  { %v1911_v12 = vpop.f32.mrb[7].mxu1  ;;  %v1839_v13 = vpop.f32.mrb[7].mxu0 }
 0x101   :  { %v2663_v14 = vadd.f32 %v1911_v12, %v1910_v9  ;;  %v1840_v15 = vadd.f32 %v1839_v13, %v1838_v11  ;;  %v897_v62 = vadd.f32 %v1837_v10, %v2676_v42 }
 0x103   :  { %v900_v3 = vadd.f32 %v1840_v15, %v2676_v42 }
 0x105   :  { %v1913_v16 = vpop.f32.mrb[8].mxu1  ;;  %v1841_v17 = vpop.f32.mrb[8].mxu0 }
 0x106   :  { %v1914_v18 = vpop.f32.mrb[9].mxu1  ;;  %v1842_v19 = vpop.f32.mrb[9].mxu0 }
 0x107   :  { %v2665_v20 = vadd.f32 %v1914_v18, %v1913_v16  ;;  %v1916_v21 = vpop.f32.mrb[10].mxu1  ;;  %v1843_v22 = vadd.f32 %v1842_v19, %v1841_v17  ;;  %v1844_v23 = vpop.f32.mrb[10].mxu0 }
 0x108   :  { %v1917_v24 = vpop.f32.mrb[11].mxu1  ;;  %v1845_v25 = vpop.f32.mrb[11].mxu0 }
 0x109   :  { %v2667_v26 = vadd.f32 %v1917_v24, %v1916_v21  ;;  %v1846_v27 = vadd.f32 %v1845_v25, %v1844_v23  ;;  %v905_v10 = vadd.f32 %v1843_v22, %v2676_v42 }
 0x10b   :  { %v908_v15 = vadd.f32 %v1846_v27, %v2676_v42 }
 0x10d   :  { %v1919_v28 = vpop.f32.mrb[12].mxu1  ;;  %v1847_v29 = vpop.f32.mrb[12].mxu0 }
 0x10e   :  { %v1920_v30 = vpop.f32.mrb[13].mxu1  ;;  %v1848_v31 = vpop.f32.mrb[13].mxu0 }
 0x10f   :  { %v2669_v32 = vadd.f32 %v1920_v30, %v1919_v28  ;;  %v1922_v33 = vpop.f32.mrb[14].mxu1  ;;  %v1849_v34 = vadd.f32 %v1848_v31, %v1847_v29  ;;  %v1850_v35 = vpop.f32.mrb[14].mxu0 }
 0x110   :  { %v1923_v36 = vpop.f32.mrb[15].mxu1  ;;  %v1851_v37 = vpop.f32.mrb[15].mxu0 }
 0x111   :  { %v2671_v38 = vadd.f32 %v1923_v36, %v1922_v33  ;;  %v1852_v39 = vadd.f32 %v1851_v37, %v1850_v35  ;;  %v913_v22 = vadd.f32 %v1849_v34, %v2676_v42 }
 0x113   :  { %v916_v27 = vadd.f32 %v1852_v39, %v2676_v42 }
 0x115   :  { %v1941_v40 = vpop.f32.mrb[16].mxu1  ;;  %v1853_v41 = vpop.f32.mrb[16].mxu0 }
 0x116   :  { %v1942_v43 = vpop.f32.mrb[17].mxu1  ;;  %v1854_v44 = vpop.f32.mrb[17].mxu0 }
 0x117   :  { %v1943_v46 = vadd.f32 %v1942_v43, %v1941_v40  ;;  %v1944_v47 = vpop.f32.mrb[18].mxu1  ;;  %v1855_v48 = vadd.f32 %v1854_v44, %v1853_v41  ;;  %v1856_v49 = vpop.f32.mrb[18].mxu0 }
 0x118   :  { %v1945_v50 = vpop.f32.mrb[19].mxu1  ;;  %v1857_v51 = vpop.f32.mrb[19].mxu0 }
 0x119   :  { %v1946_v53 = vadd.f32 %v1945_v50, %v1944_v47  ;;  %v1858_v54 = vadd.f32 %v1857_v51, %v1856_v49  ;;  %v2680_v55 = vadd.f32 %v1943_v46, %v889_v45  ;;  %v921_v34 = vadd.f32 %v1855_v48, %v2676_v42 }
 0x11b   :  { %v2682_v56 = vadd.f32 %v1946_v53, %v892_v52  ;;  %v924_v39 = vadd.f32 %v1858_v54, %v2676_v42 }
 0x11d   :  { %v1947_v57 = vpop.f32.mrb[20].mxu1  ;;  %v1859_v58 = vpop.f32.mrb[20].mxu0 }
 0x11e   :  { %v1948_v59 = vpop.f32.mrb[21].mxu1  ;;  %v1860_v61 = vpop.f32.mrb[21].mxu0 }
 0x11f   :  { %v1949_v63 = vadd.f32 %v1948_v59, %v1947_v57  ;;  %v1950_v0 = vpop.f32.mrb[22].mxu1  ;;  %v1861_v1 = vadd.f32 %v1860_v61, %v1859_v58  ;;  %v1862_v4 = vpop.f32.mrb[22].mxu0 }
 0x120   :  { %v1951_v5 = vpop.f32.mrb[23].mxu1  ;;  %v1863_v6 = vpop.f32.mrb[23].mxu0 }
 0x121   :  { %v1952_v7 = vadd.f32 %v1951_v5, %v1950_v0  ;;  %v1864_v9 = vadd.f32 %v1863_v6, %v1862_v4  ;;  %v2686_v11 = vadd.f32 %v1949_v63, %v897_v62  ;;  %v929_v48 = vadd.f32 %v1861_v1, %v2676_v42 }
 0x123   :  { %v2688_v12 = vadd.f32 %v1952_v7, %v900_v3 }
 0x125   :  { %v1953_v13 = vpop.f32.mrb[24].mxu1  ;;  %v1865_v16 = vpop.f32.mrb[24].mxu0 }
 0x126   :  { %v1954_v17 = vpop.f32.mrb[25].mxu1  ;;  %v1866_v18 = vpop.f32.mrb[25].mxu0 }
 0x127   :  { %v1955_v19 = vadd.f32 %v1954_v17, %v1953_v13  ;;  %v1956_v21 = vpop.f32.mrb[26].mxu1  ;;  %v1867_v23 = vadd.f32 %v1866_v18, %v1865_v16  ;;  %v1868_v24 = vpop.f32.mrb[26].mxu0 }
 0x128   :  { %v1957_v25 = vpop.f32.mrb[27].mxu1  ;;  %v1869_v28 = vpop.f32.mrb[27].mxu0 }
 0x129   :  { %v1958_v29 = vadd.f32 %v1957_v25, %v1956_v21  ;;  %v1870_v30 = vadd.f32 %v1869_v28, %v1868_v24  ;;  %v2692_v31 = vadd.f32 %v1955_v19, %v905_v10 }
 0x12b   :  { %v2694_v33 = vadd.f32 %v1958_v29, %v908_v15  ;;  %v932_v15 = vadd.f32 %v1864_v9, %v2676_v42 }
 0x12d   :  { %v1959_v35 = vpop.f32.mrb[28].mxu1  ;;  %v1871_v36 = vpop.f32.mrb[28].mxu0 }
 0x12e   :  { %v1960_v37 = vpop.f32.mrb[29].mxu1  ;;  %v1872_v40 = vpop.f32.mrb[29].mxu0 }
 0x12f   :  { %v1961_v41 = vadd.f32 %v1960_v37, %v1959_v35  ;;  %v1962_v43 = vpop.f32.mrb[30].mxu1  ;;  %v1873_v44 = vadd.f32 %v1872_v40, %v1871_v36  ;;  %v1874_v45 = vpop.f32.mrb[30].mxu0 }
 0x130   :  { %v1963_v46 = vpop.f32.mrb[31].mxu1  ;;  %v1875_v47 = vpop.f32.mrb[31].mxu0 }
 0x131   :  { %v1964_v49 = vadd.f32 %v1963_v46, %v1962_v43  ;;  %v1876_v50 = vadd.f32 %v1875_v47, %v1874_v45  ;;  %v2698_v51 = vadd.f32 %v1961_v41, %v913_v22  ;;  %v937_v43 = vadd.f32 %v1867_v23, %v2676_v42 }
 0x133   :  { %v2700_v52 = vadd.f32 %v1964_v49, %v916_v27 }
 0x135   :  { %v1965_v53 = vpop.f32.mrb[32].mxu1  ;;  %v1877_v57 = vpop.f32.mrb[32].mxu0 }
 0x136   :  { %v1966_v58 = vpop.f32.mrb[33].mxu1  ;;  %v1878_v59 = vpop.f32.mrb[33].mxu0 }
 0x137   :  { %v1967_v61 = vadd.f32 %v1966_v58, %v1965_v53  ;;  %v1968_v62 = vpop.f32.mrb[34].mxu1  ;;  %v1879_v63 = vadd.f32 %v1878_v59, %v1877_v57  ;;  %v1880_v0 = vpop.f32.mrb[34].mxu0  ;;  %v940_v53 = vadd.f32 %v1870_v30, %v2676_v42 }
 0x138   :  { %v1969_v4 = vpop.f32.mrb[35].mxu1  ;;  %v1881_v5 = vpop.f32.mrb[35].mxu0 }
 0x139   :  { %v1970_v6 = vadd.f32 %v1969_v4, %v1968_v62  ;;  %v2704_v3 = vadd.f32 %v1881_v5, %v1880_v0  ;;  %v2706_v7 = vadd.f32 %v1967_v61, %v921_v34  ;;  %v945_v4 = vadd.f32 %v1873_v44, %v2676_v42 }
 0x13b   :  { %v2708_v13 = vadd.f32 %v1970_v6, %v924_v39 }
 0x13d   :  { %v1971_v16 = vpop.f32.mrb[36].mxu1  ;;  %v1883_v17 = vpop.f32.mrb[36].mxu0 }
 0x13e   :  { %v1972_v18 = vpop.f32.mrb[37].mxu1  ;;  %v1884_v10 = vpop.f32.mrb[37].mxu0 }
 0x13f   :  { %v1973_v19 = vadd.f32 %v1972_v18, %v1971_v16  ;;  %v1974_v21 = vpop.f32.mrb[38].mxu1  ;;  %v2711_v24 = vadd.f32 %v1884_v10, %v1883_v17  ;;  %v1886_v25 = vpop.f32.mrb[38].mxu0  ;;  %v948_v18 = vadd.f32 %v1876_v50, %v2676_v42 }
 0x140   :  { %v1975_v28 = vpop.f32.mrb[39].mxu1  ;;  %v1887_v54 = vpop.f32.mrb[39].mxu0 }
 0x141   :  { %v1976_v29 = vadd.f32 %v1975_v28, %v1974_v21  ;;  %v2714_v35 = vadd.f32 %v1887_v54, %v1886_v25  ;;  %v2716_v36 = vadd.f32 %v1973_v19, %v929_v48 }
 0x143   :  { %v2718_v37 = vadd.f32 %v1976_v29, %v932_v15  ;;  %v953_v29 = vadd.f32 %v1879_v63, %v2676_v42 }
 0x145   :  { %v1977_v40 = vpop.f32.mrb[40].mxu1  ;;  %v1889_v22 = vpop.f32.mrb[40].mxu0 }
 0x146   :  { %v1978_v41 = vpop.f32.mrb[41].mxu1  ;;  %v1890_v1 = vpop.f32.mrb[41].mxu0 }
 0x147   :  { %v1979_v45 = vadd.f32 %v1978_v41, %v1977_v40  ;;  %v1980_v46 = vpop.f32.mrb[42].mxu1  ;;  %v2721_v47 = vadd.f32 %v1890_v1, %v1889_v22  ;;  %v1892_v27 = vpop.f32.mrb[42].mxu0 }
 0x148   :  { %v1981_v49 = vpop.f32.mrb[43].mxu1  ;;  %v1893_v9 = vpop.f32.mrb[43].mxu0 }
 0x149   :  { %v1982_v57 = vadd.f32 %v1981_v49, %v1980_v46  ;;  %v2724_v58 = vadd.f32 %v1893_v9, %v1892_v27  ;;  %v2726_v59 = vadd.f32 %v1979_v45, %v937_v43  ;;  %v956_v46 = vadd.f32 %v2704_v3, %v2676_v42 }
 0x14b   :  { %v2728_v34 = vadd.f32 %v1982_v57, %v940_v53 }
 0x14d   :  { %v1983_v61 = vpop.f32.mrb[44].mxu1  ;;  %v1895_v62 = vpop.f32.mrb[44].mxu0 }
 0x14e   :  { %v1984_v0 = vpop.f32.mrb[45].mxu1  ;;  %v1896_v23 = vpop.f32.mrb[45].mxu0 }
 0x14f   :  { %v1985_v5 = vadd.f32 %v1984_v0, %v1983_v61  ;;  %v1986_v39 = vpop.f32.mrb[46].mxu1  ;;  %v2731_v6 = vadd.f32 %v1896_v23, %v1895_v62  ;;  %v1898_v16 = vpop.f32.mrb[46].mxu0 }
 0x150   :  { %v1987_v17 = vpop.f32.mrb[47].mxu1  ;;  %v1899_v30 = vpop.f32.mrb[47].mxu0 }
 0x151   :  { %v1988_v10 = vadd.f32 %v1987_v17, %v1986_v39  ;;  %v2734_v48 = vadd.f32 %v1899_v30, %v1898_v16  ;;  %v2736_v19 = vadd.f32 %v1985_v5, %v945_v4  ;;  %v961_v4 = vadd.f32 %v2711_v24, %v2676_v42 }
 0x153   :  { %v2738_v21 = vadd.f32 %v1988_v10, %v948_v18 }
 0x155   :  { %v1989_v25 = vpop.f32.mrb[48].mxu1  ;;  %v2079_v28 = vpop.f32.mrb[48].mxu0 }
 0x156   :  { %v1219_v44 = vadd.f32 %v2079_v28, %v2686_v11  ;;  %v1990_v54 = vpop.f32.mrb[49].mxu1  ;;  %v1210_v15 = vpop.f32.mrb[49].mxu0 }
 0x157   :  { %v1991_v40 = vadd.f32 %v1990_v54, %v1989_v25  ;;  %v1211_v22 = vadd.f32 %v1210_v15, %v2680_v55  ;;  %v1992_v41 = vpop.f32.mrb[50].mxu1  ;;  %v2080_v50 = vpop.f32.mrb[50].mxu0 }
 0x158   :  { %v1222_v1 = vadd.f32 %v2080_v50, %v2688_v12  ;;  %v1993_v43 = vpop.f32.mrb[51].mxu1  ;;  %v1213_v45 = vpop.f32.mrb[51].mxu0  ;;  %v1339_v9 = vmax.f32 %v1219_v44, 0.0 }
 0x159   :  { %v1994_v27 = vadd.f32 %v1993_v43, %v1992_v41  ;;  %v1214_v49 = vadd.f32 %v1213_v45, %v2682_v56  ;;  %v2747_v11 = vadd.f32 %v1991_v40, %v953_v29  ;;  %v1337_v63 = vmax.f32 %v1211_v22, 0.0 }
 0x15a   :  { %v1340_v53 = vmax.f32 %v1222_v1, 0.0  ;;  %v969_v1 = vadd.f32 %v2721_v47, %v2676_v42 }
 0x15b   :  { %v1338_v57 = vmax.f32 %v1214_v49, 0.0  ;;  %v2749_v61 = vadd.f32 %v1994_v27, %v956_v46 }
 0x15c   :  { %v1726_v55 = vpack.c.bf16 %v1340_v53, %v1339_v9 }
 0x15d   :  { %v1721_v62 = vpack.c.bf16 %v1338_v57, %v1337_v63  ;;  %v1995_v0 = vpop.f32.mrb[52].mxu1  ;;  %v2083_v12 = vpop.f32.mrb[52].mxu0 }
 0x15e   :  { %1798 = vst [vmem:[%s2856_s3 + $0x8] sm:$0xff] %v1726_v55   ;;  %v1235_v3 = vadd.f32 %v2083_v12, %v2698_v51  ;;  %v1996_v23 = vpop.f32.mrb[53].mxu1  ;;  %v1226_v56 = vpop.f32.mrb[53].mxu0  ;;  %v964_v51 = vadd.f32 %v2714_v35, %v2676_v42 }
 0x15f   :  { %1722 = vst [vmem:[%s2856_s3] sm:$0xff] %v1721_v62   ;;  %v1997_v5 = vadd.f32 %v1996_v23, %v1995_v0  ;;  %v1227_v39 = vadd.f32 %v1226_v56, %v2692_v31  ;;  %v1998_v16 = vpop.f32.mrb[54].mxu1  ;;  %v2084_v17 = vpop.f32.mrb[54].mxu0 }
 0x160   :  { %v1238_v30 = vadd.f32 %v2084_v17, %v2700_v52  ;;  %v1999_v18 = vpop.f32.mrb[55].mxu1  ;;  %v1229_v10 = vpop.f32.mrb[55].mxu0  ;;  %v1343_v44 = vmax.f32 %v1235_v3, 0.0 }
 0x161   :  { %v2000_v25 = vadd.f32 %v1999_v18, %v1998_v16  ;;  %v1230_v28 = vadd.f32 %v1229_v10, %v2694_v33  ;;  %v2765_v24 = vadd.f32 %v1997_v5, %v961_v4  ;;  %v1341_v15 = vmax.f32 %v1227_v39, 0.0 }
 0x162   :  { %v1344_v54 = vmax.f32 %v1238_v30, 0.0  ;;  %v977_v5 = vadd.f32 %v2731_v6, %v2676_v42 }
 0x163   :  { %v1342_v29 = vmax.f32 %v1230_v28, 0.0  ;;  %v2767_v40 = vadd.f32 %v2000_v25, %v964_v51 }
 0x164   :  { %v1736_v31 = vpack.c.bf16 %v1344_v54, %v1343_v44 }
 0x165   :  { %v1731_v22 = vpack.c.bf16 %v1342_v29, %v1341_v15  ;;  %v2001_v41 = vpop.f32.mrb[56].mxu1  ;;  %v2087_v52 = vpop.f32.mrb[56].mxu0 }
 0x166   :  { %1800 = vst [vmem:[%s2856_s3 + $0x18] sm:$0xff] %v1736_v31   ;;  %v1251_v35 = vadd.f32 %v2087_v52, %v2716_v36  ;;  %v2002_v50 = vpop.f32.mrb[57].mxu1  ;;  %v1242_v33 = vpop.f32.mrb[57].mxu0  ;;  %v972_v36 = vadd.f32 %v2724_v58, %v2676_v42 }
 0x167   :  { %1799 = vst [vmem:[%s2856_s3 + $0x10] sm:$0xff] %v1731_v22   ;;  %v2003_v43 = vadd.f32 %v2002_v50, %v2001_v41  ;;  %v1243_v45 = vadd.f32 %v1242_v33, %v2706_v7  ;;  %v2004_v46 = vpop.f32.mrb[58].mxu1  ;;  %v2088_v27 = vpop.f32.mrb[58].mxu0 }
 0x168   :  { %v1254_v49 = vadd.f32 %v2088_v27, %v2718_v37  ;;  %v2005_v9 = vpop.f32.mrb[59].mxu1  ;;  %v1245_v53 = vpop.f32.mrb[59].mxu0  ;;  %v1347_v55 = vmax.f32 %v1251_v35, 0.0 }
 0x169   :  { %v2006_v63 = vadd.f32 %v2005_v9, %v2004_v46  ;;  %v1246_v57 = vadd.f32 %v1245_v53, %v2708_v13  ;;  %v2783_v47 = vadd.f32 %v2003_v43, %v969_v1  ;;  %v1345_v0 = vmax.f32 %v1243_v45, 0.0 }
 0x16a   :  { %v1348_v62 = vmax.f32 %v1254_v49, 0.0 }
 0x16b   :  { %v1346_v12 = vmax.f32 %v1246_v57, 0.0  ;;  %v2785_v3 = vadd.f32 %v2006_v63, %v972_v36 }
 0x16c   :  { %v1746_v7 = vpack.c.bf16 %v1348_v62, %v1347_v55 }
 0x16d   :  { %v1741_v23 = vpack.c.bf16 %v1346_v12, %v1345_v0  ;;  %v2007_v56 = vpop.f32.mrb[60].mxu1  ;;  %v2091_v37 = vpop.f32.mrb[60].mxu0 }
 0x16e   :  { %1802 = vst [vmem:[%s2856_s3 + $0x28] sm:$0xff] %v1746_v7   ;;  %v1267_v58 = vadd.f32 %v2091_v37, %v2736_v19  ;;  %v2008_v4 = vpop.f32.mrb[61].mxu1  ;;  %v1258_v13 = vpop.f32.mrb[61].mxu0  ;;  %v980_v19 = vadd.f32 %v2734_v48, %v2676_v42 }
 0x16f   :  { %1801 = vst [vmem:[%s2856_s3 + $0x20] sm:$0xff] %v1741_v23   ;;  %v2009_v39 = vadd.f32 %v2008_v4, %v2007_v56  ;;  %v1259_v16 = vadd.f32 %v1258_v13, %v2726_v59  ;;  %v2010_v17 = vpop.f32.mrb[62].mxu1  ;;  %v2092_v30 = vpop.f32.mrb[62].mxu0 }
 0x170   :  { %v1270_v18 = vadd.f32 %v2092_v30, %v2738_v21  ;;  %v2011_v10 = vpop.f32.mrb[63].mxu1  ;;  %v1261_v51 = vpop.f32.mrb[63].mxu0  ;;  %v1351_v44 = vmax.f32 %v1267_v58, 0.0 }
 0x171   :  { %v2012_v25 = vadd.f32 %v2011_v10, %v2010_v17  ;;  %v1262_v28 = vadd.f32 %v1261_v51, %v2728_v34  ;;  %v1138_v6 = vadd.f32 %v2009_v39, %v977_v5  ;;  %v1349_v15 = vmax.f32 %v1259_v16, 0.0 }
 0x172   :  { %v1352_v54 = vmax.f32 %v1270_v18, 0.0  ;;  %v985_v34 = vadd.f32 %v2657_v60, %v2676_v42  ;;  %v996_v39 = vadd.f32 %v2663_v14, %v2676_v42 }
 0x173   :  { %v1350_v29 = vmax.f32 %v1262_v28, 0.0  ;;  %v1141_v31 = vadd.f32 %v2012_v25, %v980_v19 }
 0x174   :  { %v1756_v22 = vpack.c.bf16 %v1352_v54, %v1351_v44 }
 0x175   :  { %v1751_v59 = vpack.c.bf16 %v1350_v29, %v1349_v15  ;;  %v2013_v41 = vpop.f32.mrb[64].mxu1  ;;  %v2095_v52 = vpop.f32.mrb[64].mxu0 }
 0x176   :  { %1804 = vst [vmem:[%s2856_s3 + $0x38] sm:$0xff] %v1756_v22   ;;  %v1283_v21 = vadd.f32 %v2095_v52, %v2765_v24  ;;  %v2014_v48 = vpop.f32.mrb[65].mxu1  ;;  %v1274_v35 = vpop.f32.mrb[65].mxu0  ;;  %v988_v24 = vadd.f32 %v2659_v2, %v2676_v42 }
 0x177   :  { %1803 = vst [vmem:[%s2856_s3 + $0x30] sm:$0xff] %v1751_v59   ;;  %v2015_v50 = vadd.f32 %v2014_v48, %v2013_v41  ;;  %v1275_v33 = vadd.f32 %v1274_v35, %v2747_v11  ;;  %v2016_v1 = vpop.f32.mrb[66].mxu1  ;;  %v2096_v43 = vpop.f32.mrb[66].mxu0 }
 0x178   :  { %v1286_v45 = vadd.f32 %v2096_v43, %v2767_v40  ;;  %v2017_v46 = vpop.f32.mrb[67].mxu1  ;;  %v1277_v27 = vpop.f32.mrb[67].mxu0  ;;  %v1355_v53 = vmax.f32 %v1283_v21, 0.0  ;;  %v1004_v21 = vadd.f32 %v2667_v26, %v2676_v42  ;;  %v1009_v26 = vadd.f32 %v2669_v32, %v2676_v42 }
 0x179   :  { %v2018_v49 = vadd.f32 %v2017_v46, %v2016_v1  ;;  %v1278_v9 = vadd.f32 %v1277_v27, %v2749_v61  ;;  %v1146_v60 = vadd.f32 %v2015_v50, %v985_v34  ;;  %v1353_v63 = vmax.f32 %v1275_v33, 0.0 }
 0x17a   :  { %v1356_v36 = vmax.f32 %v1286_v45, 0.0  ;;  %v993_v61 = vadd.f32 %v2661_v8, %v2676_v42 }
 0x17b   :  { %v1354_v57 = vmax.f32 %v1278_v9, 0.0  ;;  %v1149_v55 = vadd.f32 %v2018_v49, %v988_v24 }
 0x17c   :  { %v1766_v62 = vpack.c.bf16 %v1356_v36, %v1355_v53 }
 0x17d   :  { %v1761_v11 = vpack.c.bf16 %v1354_v57, %v1353_v63  ;;  %v2019_v0 = vpop.f32.mrb[68].mxu1  ;;  %v2099_v12 = vpop.f32.mrb[68].mxu0 }
 0x17e   :  { %1806 = vst [vmem:[%s2856_s3 + $0x48] sm:$0xff] %v1766_v62   ;;  %v1299_v40 = vadd.f32 %v2099_v12, %v1138_v6  ;;  %v2020_v7 = vpop.f32.mrb[69].mxu1  ;;  %v1290_v2 = vpop.f32.mrb[69].mxu0  ;;  %v1012_v62 = vadd.f32 %v2671_v38, %v2676_v42 }
 0x17f   :  { %1805 = vst [vmem:[%s2856_s3 + $0x40] sm:$0xff] %v1761_v11   ;;  %v2021_v23 = vadd.f32 %v2020_v7, %v2019_v0  ;;  %v1291_v56 = vadd.f32 %v1290_v2, %v2783_v47  ;;  %v2022_v37 = vpop.f32.mrb[70].mxu1  ;;  %v2100_v58 = vpop.f32.mrb[70].mxu0 }
 0x180   :  { %v1302_v4 = vadd.f32 %v2100_v58, %v1141_v31  ;;  %v2023_v13 = vpop.f32.mrb[71].mxu1  ;;  %v1293_v5 = vpop.f32.mrb[71].mxu0  ;;  %v1359_v8 = vmax.f32 %v1299_v40, 0.0 }
 0x181   :  { %v2024_v16 = vadd.f32 %v2023_v13, %v2022_v37  ;;  %v1294_v17 = vadd.f32 %v1293_v5, %v2785_v3  ;;  %v1154_v30 = vadd.f32 %v2021_v23, %v993_v61  ;;  %v1357_v10 = vmax.f32 %v1291_v56, 0.0 }
 0x182   :  { %v1360_v18 = vmax.f32 %v1302_v4, 0.0  ;;  %v1001_v3 = vadd.f32 %v2665_v20, %v2676_v42 }
 0x183   :  { %v1358_v51 = vmax.f32 %v1294_v17, 0.0  ;;  %v1157_v19 = vadd.f32 %v2024_v16, %v996_v39 }
 0x184   :  { %v1776_v25 = vpack.c.bf16 %v1360_v18, %v1359_v8 }
 0x185   :  { %v1771_v28 = vpack.c.bf16 %v1358_v51, %v1357_v10  ;;  %v2025_v47 = vpop.f32.mrb[72].mxu1  ;;  %v2103_v6 = vpop.f32.mrb[72].mxu0 }
 0x186   :  { %1808 = vst [vmem:[%s2856_s3 + $0x58] sm:$0xff] %v1776_v25   ;;  %v1315_v44 = vadd.f32 %v2103_v6, %v1154_v30  ;;  %v2026_v54 = vpop.f32.mrb[73].mxu1  ;;  %v1306_v14 = vpop.f32.mrb[73].mxu0 }
 0x187   :  { %1807 = vst [vmem:[%s2856_s3 + $0x50] sm:$0xff] %v1771_v28   ;;  %v2027_v15 = vadd.f32 %v2026_v54, %v2025_v47  ;;  %v1307_v29 = vadd.f32 %v1306_v14, %v1146_v60  ;;  %v2028_v31 = vpop.f32.mrb[74].mxu1  ;;  %v2104_v22 = vpop.f32.mrb[74].mxu0 }
 0x188   :  { %v1318_v59 = vadd.f32 %v2104_v22, %v1157_v19  ;;  %v2029_v41 = vpop.f32.mrb[75].mxu1  ;;  %v1309_v52 = vpop.f32.mrb[75].mxu0  ;;  %v1363_v50 = vmax.f32 %v1315_v44, 0.0 }
 0x189   :  { %v2030_v48 = vadd.f32 %v2029_v41, %v2028_v31  ;;  %v1310_v35 = vadd.f32 %v1309_v52, %v1149_v55  ;;  %v1162_v34 = vadd.f32 %v2027_v15, %v1001_v3  ;;  %v1361_v20 = vmax.f32 %v1307_v29, 0.0 }
 0x18a   :  { %v1364_v33 = vmax.f32 %v1318_v59, 0.0 }
 0x18b   :  { %v1362_v1 = vmax.f32 %v1310_v35, 0.0  ;;  %v1165_v43 = vadd.f32 %v2030_v48, %v1004_v21 }
 0x18c   :  { %v1786_v45 = vpack.c.bf16 %v1364_v33, %v1363_v50 }
 0x18d   :  { %v1781_v46 = vpack.c.bf16 %v1362_v1, %v1361_v20  ;;  %v2031_v27 = vpop.f32.mrb[76].mxu1  ;;  %v2107_v24 = vpop.f32.mrb[76].mxu0 }
 0x18e   :  { %1810 = vst [vmem:[%s2856_s3 + $0x68] sm:$0xff] %v1786_v45   ;;  %v2032_v49 = vpop.f32.mrb[77].mxu1  ;;  %v1322_v9 = vpop.f32.mrb[77].mxu0 }
 0x18f   :  { %1809 = vst [vmem:[%s2856_s3 + $0x60] sm:$0xff] %v1781_v46   ;;  %v2033_v60 = vadd.f32 %v2032_v49, %v2031_v27  ;;  %v1323_v53 = vadd.f32 %v1322_v9, %v1162_v34  ;;  %v2034_v36 = vpop.f32.mrb[78].mxu1  ;;  %v2108_v63 = vpop.f32.mrb[78].mxu0 }
 0x190   :  { %v2035_v57 = vpop.f32.mrb[79].mxu1  ;;  %v1325_v55 = vpop.f32.mrb[79].mxu0 }
 0x191   :  { %v1170_v11 = vadd.f32 %v2033_v60, %v1009_v26  ;;  %v2036_v0 = vadd.f32 %v2035_v57, %v2034_v36  ;;  %v1326_v12 = vadd.f32 %v1325_v55, %v1165_v43  ;;  %v1365_v7 = vmax.f32 %v1323_v53, 0.0 }
 0x193   :  { %v1331_v40 = vadd.f32 %v2107_v24, %v1170_v11  ;;  %v1173_v2 = vadd.f32 %v2036_v0, %v1012_v62  ;;  %v1366_v32 = vmax.f32 %v1326_v12, 0.0 }
 0x195   :  { %v1334_v61 = vadd.f32 %v2108_v63, %v1173_v2  ;;  %v1791_v23 = vpack.c.bf16 %v1366_v32, %v1365_v7  ;;  %v1367_v56 = vmax.f32 %v1331_v40, 0.0 }
 0x197   :  { %v1368_v37 = vmax.f32 %v1334_v61, 0.0  ;;  %1811 = vst [vmem:[%s2856_s3 + $0x70] sm:$0xff] %v1791_v23  }
 0x199   :  { %v1796_v58 = vpack.c.bf16 %v1368_v37, %v1367_v56 }
 0x19b   :  { %1812 = vst [vmem:[%s2856_s3 + $0x78] sm:$0xff] %v1796_v58  }

// kernel: dueling_forward.7
= control target key start
LH: loop header
LB: loop body
LE: loop exit
PB: predicated region body
PF: predicated region fallthrough
CT: control target
= control target key end

     0   :  { %s5905_s1 = inlined_call_operand.vmem [shape: bf16[3200,256], index: 1, kind: input, shape index: {}]   ;;  %s5906_s0 = inlined_call_operand.vmem [shape: bf16[16,3200], index: 0, kind: input, shape index: {}]   ;;  %s5907_s3 = inlined_call_operand.vmem [shape: bf16[256,128], index: 3, kind: input, shape index: {}]   ;;  %s5908_s2 = inlined_call_operand.vmem [shape: f32[1,256], index: 2, kind: input, shape index: {}]   ;;  %s5909_s4 = inlined_call_operand.vmem [shape: f32[1,128], index: 4, kind: input, shape index: {}]   ;;  %s5910_s5 = inlined_call_operand.vmem [shape: f32[16,128], index: 5, kind: output, shape index: {}]  }
   0x1   :  { %v3886_v0 = vld [vmem:[%s5905_s1 + $0x4] ss:$8 sps:$4 sm:$0xff]   ;;  %v3890_v2 = vld [vmem:[%s5905_s1] ss:$8 sps:$4 sm:$0xff]   ;;  %v3892_v4 = vld [vmem:[%s5905_s1 + $0x14] ss:$8 sps:$4 sm:$0xff]  }
   0x2   :  { %v3888_v1 = vld [vmem:[%s5905_s1 + $0x604] ss:$8 sps:$4 sm:$0xff]   ;;  %2585 = vmatprep.subr.bf16.mxu1 %v3886_v0  ;;  %v3891_v3 = vld [vmem:[%s5905_s1 + $0x600] ss:$8 sps:$4 sm:$0xff]   ;;  %v3894_v5 = vld [vmem:[%s5905_s1 + $0x614] ss:$8 sps:$4 sm:$0xff]  }
   0x3   :  { %2843 = vmatprep.subr.bf16.mxu0 %v3888_v1  ;;  %2586 = vmatpush1.bf16.msra.mxu1 %v3890_v2  ;;  %v3896_v6 = vld [vmem:[%s5905_s1 + $0x10] ss:$8 sps:$4 sm:$0xff]   ;;  %v3898_v8 = vld [vmem:[%s5905_s1 + $0x24] ss:$8 sps:$4 sm:$0xff]   ;;  %v3902_v10 = vld [vmem:[%s5905_s1 + $0x20] ss:$8 sps:$4 sm:$0xff]  }
   0x4   :  { %2844 = vmatpush1.bf16.msra.mxu0 %v3891_v3  ;;  %2587 = vmatprep.subr.bf16.mxu1 %v3892_v4  ;;  %v3897_v7 = vld [vmem:[%s5905_s1 + $0x610] ss:$8 sps:$4 sm:$0xff]   ;;  %v3900_v9 = vld [vmem:[%s5905_s1 + $0x624] ss:$8 sps:$4 sm:$0xff]   ;;  %v3903_v11 = vld [vmem:[%s5905_s1 + $0x620] ss:$8 sps:$4 sm:$0xff]  }
   0x5   :  { %2845 = vmatprep.subr.bf16.mxu0 %v3894_v5  ;;  %v3904_v12 = vld [vmem:[%s5905_s1 + $0x34] ss:$8 sps:$4 sm:$0xff]   ;;  %v3908_v14 = vld [vmem:[%s5905_s1 + $0x30] ss:$8 sps:$4 sm:$0xff]   ;;  %v3910_v16 = vld [vmem:[%s5905_s1 + $0x44] ss:$8 sps:$4 sm:$0xff]  }
   0x6   :  { %v3906_v13 = vld [vmem:[%s5905_s1 + $0x634] ss:$8 sps:$4 sm:$0xff]   ;;  %v3909_v15 = vld [vmem:[%s5905_s1 + $0x630] ss:$8 sps:$4 sm:$0xff]   ;;  %v3912_v17 = vld [vmem:[%s5905_s1 + $0x644] ss:$8 sps:$4 sm:$0xff]  }
   0x7   :  { %2588 = vmatpush1.bf16.msra.mxu1 %v3896_v6  ;;  %v3914_v18 = vld [vmem:[%s5905_s1 + $0x40] ss:$8 sps:$4 sm:$0xff]   ;;  %v3916_v20 = vld [vmem:[%s5905_s1 + $0x54] ss:$8 sps:$4 sm:$0xff]   ;;  %v3920_v22 = vld [vmem:[%s5905_s1 + $0x50] ss:$8 sps:$4 sm:$0xff]  }
   0x8   :  { %2846 = vmatpush1.bf16.msra.mxu0 %v3897_v7  ;;  %2589 = vmatprep.subr.bf16.mxu1 %v3898_v8  ;;  %v3915_v19 = vld [vmem:[%s5905_s1 + $0x640] ss:$8 sps:$4 sm:$0xff]   ;;  %v3918_v21 = vld [vmem:[%s5905_s1 + $0x654] ss:$8 sps:$4 sm:$0xff]   ;;  %v3921_v23 = vld [vmem:[%s5905_s1 + $0x650] ss:$8 sps:$4 sm:$0xff]  }
   0x9   :  { %2847 = vmatprep.subr.bf16.mxu0 %v3900_v9  ;;  %v3922_v24 = vld [vmem:[%s5905_s1 + $0x64] ss:$8 sps:$4 sm:$0xff]   ;;  %v3926_v26 = vld [vmem:[%s5905_s1 + $0x60] ss:$8 sps:$4 sm:$0xff]   ;;  %v3928_v28 = vld [vmem:[%s5905_s1 + $0x74] ss:$8 sps:$4 sm:$0xff]  }
   0xa   :  { %v3924_v25 = vld [vmem:[%s5905_s1 + $0x664] ss:$8 sps:$4 sm:$0xff]   ;;  %v3927_v27 = vld [vmem:[%s5905_s1 + $0x660] ss:$8 sps:$4 sm:$0xff]   ;;  %v3930_v29 = vld [vmem:[%s5905_s1 + $0x674] ss:$8 sps:$4 sm:$0xff]  }
   0xb   :  { %2590 = vmatpush1.bf16.msra.mxu1 %v3902_v10  ;;  %v3932_v30 = vld [vmem:[%s5905_s1 + $0x70] ss:$8 sps:$4 sm:$0xff]   ;;  %v3934_v32 = vld [vmem:[%s5905_s1 + $0x84] ss:$8 sps:$4 sm:$0xff]   ;;  %v3938_v34 = vld [vmem:[%s5905_s1 + $0x80] ss:$8 sps:$4 sm:$0xff]  }
   0xc   :  { %2848 = vmatpush1.bf16.msra.mxu0 %v3903_v11  ;;  %2591 = vmatprep.subr.bf16.mxu1 %v3904_v12  ;;  %v3933_v31 = vld [vmem:[%s5905_s1 + $0x670] ss:$8 sps:$4 sm:$0xff]   ;;  %v3936_v33 = vld [vmem:[%s5905_s1 + $0x684] ss:$8 sps:$4 sm:$0xff]   ;;  %v3939_v35 = vld [vmem:[%s5905_s1 + $0x680] ss:$8 sps:$4 sm:$0xff]  }
   0xd   :  { %2849 = vmatprep.subr.bf16.mxu0 %v3906_v13  ;;  %v3940_v36 = vld [vmem:[%s5905_s1 + $0x94] ss:$8 sps:$4 sm:$0xff]   ;;  %v3944_v38 = vld [vmem:[%s5905_s1 + $0x90] ss:$8 sps:$4 sm:$0xff]   ;;  %v3946_v40 = vld [vmem:[%s5905_s1 + $0xa4] ss:$8 sps:$4 sm:$0xff]  }
   0xe   :  { %v3942_v37 = vld [vmem:[%s5905_s1 + $0x694] ss:$8 sps:$4 sm:$0xff]   ;;  %v3945_v39 = vld [vmem:[%s5905_s1 + $0x690] ss:$8 sps:$4 sm:$0xff]   ;;  %v3948_v41 = vld [vmem:[%s5905_s1 + $0x6a4] ss:$8 sps:$4 sm:$0xff]  }
   0xf   :  { %2592 = vmatpush1.bf16.msra.mxu1 %v3908_v14  ;;  %v3950_v42 = vld [vmem:[%s5905_s1 + $0xa0] ss:$8 sps:$4 sm:$0xff]   ;;  %v3952_v44 = vld [vmem:[%s5905_s1 + $0xb4] ss:$8 sps:$4 sm:$0xff]   ;;  %v3956_v46 = vld [vmem:[%s5905_s1 + $0xb0] ss:$8 sps:$4 sm:$0xff]  }
  0x10   :  { %2850 = vmatpush1.bf16.msra.mxu0 %v3909_v15  ;;  %2593 = vmatprep.subr.bf16.mxu1 %v3910_v16  ;;  %v3951_v43 = vld [vmem:[%s5905_s1 + $0x6a0] ss:$8 sps:$4 sm:$0xff]   ;;  %v3954_v45 = vld [vmem:[%s5905_s1 + $0x6b4] ss:$8 sps:$4 sm:$0xff]   ;;  %v3957_v47 = vld [vmem:[%s5905_s1 + $0x6b0] ss:$8 sps:$4 sm:$0xff]  }
  0x11   :  { %2851 = vmatprep.subr.bf16.mxu0 %v3912_v17  ;;  %v3984_v48 = vld [vmem:[%s5906_s0 + $0x4] ss:$100 sps:$4 sm:$0xff]   ;;  %v3990_v51 = vld [vmem:[%s5906_s0 + $0x34] ss:$100 sps:$4 sm:$0xff]  }
  0x12   :  { %v3958_v49 = vld [vmem:[%s5905_s1 + $0xc4] ss:$8 sps:$4 sm:$0xff]   ;;  %2617 = vmatprep.mubr.bf16.mxu1 %v3984_v48  ;;  %v3962_v52 = vld [vmem:[%s5905_s1 + $0xc0] ss:$8 sps:$4 sm:$0xff]   ;;  %v3964_v54 = vld [vmem:[%s5905_s1 + $0xd4] ss:$8 sps:$4 sm:$0xff]   ;;  %2875 = vmatprep.mubr.bf16.mxu0 %v3990_v51 }
  0x13   :  { %2594 = vmatpush1.bf16.msra.mxu1 %v3914_v18  ;;  %v3960_v50 = vld [vmem:[%s5905_s1 + $0x6c4] ss:$8 sps:$4 sm:$0xff]   ;;  %v3963_v53 = vld [vmem:[%s5905_s1 + $0x6c0] ss:$8 sps:$4 sm:$0xff]   ;;  %v3966_v55 = vld [vmem:[%s5905_s1 + $0x6d4] ss:$8 sps:$4 sm:$0xff]  }
  0x14   :  { %2852 = vmatpush1.bf16.msra.mxu0 %v3915_v19  ;;  %2595 = vmatprep.subr.bf16.mxu1 %v3916_v20  ;;  %v3968_v56 = vld [vmem:[%s5905_s1 + $0xd0] ss:$8 sps:$4 sm:$0xff]   ;;  %v3970_v58 = vld [vmem:[%s5905_s1 + $0xe4] ss:$8 sps:$4 sm:$0xff]   ;;  %v3974_v60 = vld [vmem:[%s5905_s1 + $0xe0] ss:$8 sps:$4 sm:$0xff]  }
  0x15   :  { %2853 = vmatprep.subr.bf16.mxu0 %v3918_v21  ;;  %v3969_v57 = vld [vmem:[%s5905_s1 + $0x6d0] ss:$8 sps:$4 sm:$0xff]   ;;  %v3972_v59 = vld [vmem:[%s5905_s1 + $0x6e4] ss:$8 sps:$4 sm:$0xff]   ;;  %v3975_v61 = vld [vmem:[%s5905_s1 + $0x6e0] ss:$8 sps:$4 sm:$0xff]  }
  0x16   :  { %v3976_v62 = vld [vmem:[%s5905_s1 + $0xf4] ss:$8 sps:$4 sm:$0xff]   ;;  %v3980_v0 = vld [vmem:[%s5905_s1 + $0xf0] ss:$8 sps:$4 sm:$0xff]   ;;  %v3987_v2 = vld [vmem:[%s5905_s1 + $0x104] ss:$8 sps:$4 sm:$0xff]  }
  0x17   :  { %2596 = vmatpush1.bf16.msra.mxu1 %v3920_v22  ;;  %v3978_v63 = vld [vmem:[%s5905_s1 + $0x6f4] ss:$8 sps:$4 sm:$0xff]   ;;  %v3981_v1 = vld [vmem:[%s5905_s1 + $0x6f0] ss:$8 sps:$4 sm:$0xff]   ;;  %v3993_v3 = vld [vmem:[%s5905_s1 + $0x704] ss:$8 sps:$4 sm:$0xff]  }
  0x18   :  { %2854 = vmatpush1.bf16.msra.mxu0 %v3921_v23  ;;  %2597 = vmatprep.subr.bf16.mxu1 %v3922_v24  ;;  %v3982_v4 = vld [vmem:[%s5906_s0] ss:$100 sps:$4 sm:$0xff]   ;;  %v3988_v6 = vld [vmem:[%s5906_s0 + $0x30] ss:$100 sps:$4 sm:$0xff]  }
  0x19   :  { %2855 = vmatprep.subr.bf16.mxu0 %v3924_v25  ;;  %v3985_v5 = vld [vmem:[%s5905_s1 + $0x100] ss:$8 sps:$4 sm:$0xff]   ;;  %v3996_v8 = vld [vmem:[%s5905_s1 + $0x114] ss:$8 sps:$4 sm:$0xff]   ;;  %v3994_v10 = vld [vmem:[%s5905_s1 + $0x110] ss:$8 sps:$4 sm:$0xff]  }
  0x1a   :  { %v3991_v7 = vld [vmem:[%s5905_s1 + $0x700] ss:$8 sps:$4 sm:$0xff]   ;;  %v3999_v9 = vld [vmem:[%s5905_s1 + $0x714] ss:$8 sps:$4 sm:$0xff]   ;;  %v3997_v11 = vld [vmem:[%s5905_s1 + $0x710] ss:$8 sps:$4 sm:$0xff]  }
  0x1b   :  { %2598 = vmatpush1.bf16.msra.mxu1 %v3926_v26  ;;  %v4002_v12 = vld [vmem:[%s5905_s1 + $0x124] ss:$8 sps:$4 sm:$0xff]   ;;  %v4000_v14 = vld [vmem:[%s5905_s1 + $0x120] ss:$8 sps:$4 sm:$0xff]   ;;  %v4008_v16 = vld [vmem:[%s5905_s1 + $0x134] ss:$8 sps:$4 sm:$0xff]  }
  0x1c   :  { %2856 = vmatpush1.bf16.msra.mxu0 %v3927_v27  ;;  %2599 = vmatprep.subr.bf16.mxu1 %v3928_v28  ;;  %v4005_v13 = vld [vmem:[%s5905_s1 + $0x724] ss:$8 sps:$4 sm:$0xff]   ;;  %v4003_v15 = vld [vmem:[%s5905_s1 + $0x720] ss:$8 sps:$4 sm:$0xff]   ;;  %v4011_v17 = vld [vmem:[%s5905_s1 + $0x734] ss:$8 sps:$4 sm:$0xff]  }
  0x1d   :  { %2857 = vmatprep.subr.bf16.mxu0 %v3930_v29  ;;  %v4006_v18 = vld [vmem:[%s5905_s1 + $0x130] ss:$8 sps:$4 sm:$0xff]   ;;  %v4014_v20 = vld [vmem:[%s5905_s1 + $0x144] ss:$8 sps:$4 sm:$0xff]   ;;  %v4012_v22 = vld [vmem:[%s5905_s1 + $0x140] ss:$8 sps:$4 sm:$0xff]  }
  0x1e   :  { %v4009_v19 = vld [vmem:[%s5905_s1 + $0x730] ss:$8 sps:$4 sm:$0xff]   ;;  %v4017_v21 = vld [vmem:[%s5905_s1 + $0x744] ss:$8 sps:$4 sm:$0xff]   ;;  %v4015_v23 = vld [vmem:[%s5905_s1 + $0x740] ss:$8 sps:$4 sm:$0xff]  }
  0x1f   :  { %2600 = vmatpush1.bf16.msra.mxu1 %v3932_v30  ;;  %v4020_v24 = vld [vmem:[%s5905_s1 + $0x154] ss:$8 sps:$4 sm:$0xff]   ;;  %v4018_v26 = vld [vmem:[%s5905_s1 + $0x150] ss:$8 sps:$4 sm:$0xff]   ;;  %v4026_v28 = vld [vmem:[%s5905_s1 + $0x164] ss:$8 sps:$4 sm:$0xff]  }
  0x20   :  { %2858 = vmatpush1.bf16.msra.mxu0 %v3933_v31  ;;  %2601 = vmatprep.subr.bf16.mxu1 %v3934_v32  ;;  %v4023_v25 = vld [vmem:[%s5905_s1 + $0x754] ss:$8 sps:$4 sm:$0xff]   ;;  %v4021_v27 = vld [vmem:[%s5905_s1 + $0x750] ss:$8 sps:$4 sm:$0xff]   ;;  %v4029_v29 = vld [vmem:[%s5905_s1 + $0x764] ss:$8 sps:$4 sm:$0xff]  }
  0x21   :  { %2859 = vmatprep.subr.bf16.mxu0 %v3936_v33  ;;  %v4024_v30 = vld [vmem:[%s5905_s1 + $0x160] ss:$8 sps:$4 sm:$0xff]   ;;  %v4032_v32 = vld [vmem:[%s5905_s1 + $0x174] ss:$8 sps:$4 sm:$0xff]  }
  0x22   :  { %v4027_v31 = vld [vmem:[%s5905_s1 + $0x760] ss:$8 sps:$4 sm:$0xff]   ;;  %v4035_v33 = vld [vmem:[%s5905_s1 + $0x774] ss:$8 sps:$4 sm:$0xff]  }
  0x23   :  { %2602 = vmatpush1.bf16.msra.mxu1 %v3938_v34  ;;  %v4086_v34 = vld [vmem:[%s5906_s0 + $0xc] ss:$100 sps:$4 sm:$0xff]   ;;  %v4048_v48 = vld [vmem:[%s5905_s1 + $0x1a0] ss:$8 sps:$4 sm:$0xff]   ;;  %v4059_v51 = vld [vmem:[%s5905_s1 + $0x7b4] ss:$8 sps:$4 sm:$0xff]  }
  0x24   :  { %2860 = vmatpush1.bf16.msra.mxu0 %v3939_v35  ;;  %2603 = vmatprep.subr.bf16.mxu1 %v3940_v36  ;;  %v4030_v35 = vld [vmem:[%s5905_s1 + $0x170] ss:$8 sps:$4 sm:$0xff]  }
  0x25   :  { %2861 = vmatprep.subr.bf16.mxu0 %v3942_v37  ;;  %v4033_v36 = vld [vmem:[%s5905_s1 + $0x770] ss:$8 sps:$4 sm:$0xff]   ;;  %v4092_v37 = vld [vmem:[%s5906_s0 + $0x3c] ss:$100 sps:$4 sm:$0xff]  }
  0x27   :  { %2604 = vmatpush1.bf16.msra.mxu1 %v3944_v38  ;;  %v4038_v38 = vld [vmem:[%s5905_s1 + $0x184] ss:$8 sps:$4 sm:$0xff]  }
  0x28   :  { %2862 = vmatpush1.bf16.msra.mxu0 %v3945_v39  ;;  %2605 = vmatprep.subr.bf16.mxu1 %v3946_v40  ;;  %v4041_v39 = vld [vmem:[%s5905_s1 + $0x784] ss:$8 sps:$4 sm:$0xff]   ;;  %v4036_v40 = vld [vmem:[%s5905_s1 + $0x180] ss:$8 sps:$4 sm:$0xff]  }
  0x29   :  { %2863 = vmatprep.subr.bf16.mxu0 %v3948_v41  ;;  %v4039_v41 = vld [vmem:[%s5905_s1 + $0x780] ss:$8 sps:$4 sm:$0xff]  }
  0x2b   :  { %2606 = vmatpush1.bf16.msra.mxu1 %v3950_v42  ;;  %v4044_v42 = vld [vmem:[%s5905_s1 + $0x194] ss:$8 sps:$4 sm:$0xff]  }
  0x2c   :  { %2864 = vmatpush1.bf16.msra.mxu0 %v3951_v43  ;;  %2607 = vmatprep.subr.bf16.mxu1 %v3952_v44  ;;  %v4047_v43 = vld [vmem:[%s5905_s1 + $0x794] ss:$8 sps:$4 sm:$0xff]   ;;  %v4042_v44 = vld [vmem:[%s5905_s1 + $0x190] ss:$8 sps:$4 sm:$0xff]  }
  0x2d   :  { %2865 = vmatprep.subr.bf16.mxu0 %v3954_v45  ;;  %v4045_v45 = vld [vmem:[%s5905_s1 + $0x790] ss:$8 sps:$4 sm:$0xff]  }
  0x2f   :  { %2608 = vmatpush1.bf16.msra.mxu1 %v3956_v46  ;;  %v4050_v46 = vld [vmem:[%s5905_s1 + $0x1a4] ss:$8 sps:$4 sm:$0xff]  }
  0x30   :  { %2866 = vmatpush1.bf16.msra.mxu0 %v3957_v47  ;;  %2609 = vmatprep.subr.bf16.mxu1 %v3958_v49  ;;  %v4053_v47 = vld [vmem:[%s5905_s1 + $0x7a4] ss:$8 sps:$4 sm:$0xff]   ;;  %v4051_v49 = vld [vmem:[%s5905_s1 + $0x7a0] ss:$8 sps:$4 sm:$0xff]  }
  0x31   :  { %2867 = vmatprep.subr.bf16.mxu0 %v3960_v50  ;;  %v4056_v50 = vld [vmem:[%s5905_s1 + $0x1b4] ss:$8 sps:$4 sm:$0xff]  }
  0x33   :  { %2610 = vmatpush1.bf16.msra.mxu1 %v3962_v52  ;;  %v4054_v52 = vld [vmem:[%s5905_s1 + $0x1b0] ss:$8 sps:$4 sm:$0xff]  }
  0x34   :  { %2868 = vmatpush1.bf16.msra.mxu0 %v3963_v53  ;;  %2611 = vmatprep.subr.bf16.mxu1 %v3964_v54  ;;  %v4057_v53 = vld [vmem:[%s5905_s1 + $0x7b0] ss:$8 sps:$4 sm:$0xff]   ;;  %v4062_v54 = vld [vmem:[%s5905_s1 + $0x1c4] ss:$8 sps:$4 sm:$0xff]  }
  0x35   :  { %2869 = vmatprep.subr.bf16.mxu0 %v3966_v55  ;;  %v4065_v55 = vld [vmem:[%s5905_s1 + $0x7c4] ss:$8 sps:$4 sm:$0xff]  }
  0x37   :  { %2612 = vmatpush1.bf16.msra.mxu1 %v3968_v56  ;;  %v4060_v56 = vld [vmem:[%s5905_s1 + $0x1c0] ss:$8 sps:$4 sm:$0xff]  }
  0x38   :  { %2870 = vmatpush1.bf16.msra.mxu0 %v3969_v57  ;;  %2613 = vmatprep.subr.bf16.mxu1 %v3970_v58  ;;  %v4063_v57 = vld [vmem:[%s5905_s1 + $0x7c0] ss:$8 sps:$4 sm:$0xff]   ;;  %v4068_v58 = vld [vmem:[%s5905_s1 + $0x1d4] ss:$8 sps:$4 sm:$0xff]  }
  0x39   :  { %2871 = vmatprep.subr.bf16.mxu0 %v3972_v59  ;;  %v4071_v59 = vld [vmem:[%s5905_s1 + $0x7d4] ss:$8 sps:$4 sm:$0xff]  }
  0x3b   :  { %2614 = vmatpush1.bf16.msra.mxu1 %v3974_v60  ;;  %v4066_v60 = vld [vmem:[%s5905_s1 + $0x1d0] ss:$8 sps:$4 sm:$0xff]  }
  0x3c   :  { %2872 = vmatpush1.bf16.msra.mxu0 %v3975_v61  ;;  %2615 = vmatprep.subr.bf16.mxu1 %v3976_v62  ;;  %v4069_v61 = vld [vmem:[%s5905_s1 + $0x7d0] ss:$8 sps:$4 sm:$0xff]   ;;  %v4074_v62 = vld [vmem:[%s5905_s1 + $0x1e4] ss:$8 sps:$4 sm:$0xff]  }
  0x3d   :  { %2873 = vmatprep.subr.bf16.mxu0 %v3978_v63  ;;  %v4077_v63 = vld [vmem:[%s5905_s1 + $0x7e4] ss:$8 sps:$4 sm:$0xff]  }
  0x3f   :  { %2616 = vmatpush1.bf16.msra.mxu1 %v3980_v0  ;;  %v4072_v0 = vld [vmem:[%s5905_s1 + $0x1e0] ss:$8 sps:$4 sm:$0xff]  }
  0x40   :  { %2874 = vmatpush1.bf16.msra.mxu0 %v3981_v1  ;;  %2628 = vmatprep.subr.bf16.mxu1 %v3987_v2  ;;  %v4075_v1 = vld [vmem:[%s5905_s1 + $0x7e0] ss:$8 sps:$4 sm:$0xff]   ;;  %v4080_v2 = vld [vmem:[%s5905_s1 + $0x1f4] ss:$8 sps:$4 sm:$0xff]  }
  0x41   :  { %2886 = vmatprep.subr.bf16.mxu0 %v3993_v3  ;;  %v4083_v3 = vld [vmem:[%s5905_s1 + $0x7f4] ss:$8 sps:$4 sm:$0xff]  }
  0x42   :  { %2618 = vmatmul.mubr.bf16.vlgmr.msra.gmra.mrb[0].mxu1 %v3982_v4  ;;  %v4078_v4 = vld [vmem:[%s5905_s1 + $0x1f0] ss:$8 sps:$4 sm:$0xff]  }
  0x43   :  { %2876 = vmatmul.mubr.bf16.vlgmr.msra.gmra.mrb[0].mxu0 %v3988_v6  ;;  %2629 = vmatpush1.bf16.msra.mxu1 %v3985_v5  ;;  %v4081_v5 = vld [vmem:[%s5905_s1 + $0x7f0] ss:$8 sps:$4 sm:$0xff]   ;;  %v4089_v6 = vld [vmem:[%s5905_s1 + $0x204] ss:$8 sps:$4 sm:$0xff]  }
  0x44   :  { %2887 = vmatpush1.bf16.msra.mxu0 %v3991_v7  ;;  %2630 = vmatprep.subr.bf16.mxu1 %v3996_v8  ;;  %v4095_v7 = vld [vmem:[%s5905_s1 + $0x804] ss:$8 sps:$4 sm:$0xff]  }
  0x45   :  { %2888 = vmatprep.subr.bf16.mxu0 %v3999_v9  ;;  %2660 = vmatprep.mubr.bf16.mxu1 %v4086_v34  ;;  %v4084_v8 = vld [vmem:[%s5906_s0 + $0x8] ss:$100 sps:$4 sm:$0xff]  }
  0x46   :  { %2918 = vmatprep.mubr.bf16.mxu0 %v4092_v37  ;;  %v4087_v9 = vld [vmem:[%s5905_s1 + $0x200] ss:$8 sps:$4 sm:$0xff]   ;;  %v4128_v34 = vld [vmem:[%s5905_s1 + $0x264] ss:$8 sps:$4 sm:$0xff]  }
  0x47   :  { %2631 = vmatpush1.bf16.msra.mxu1 %v3994_v10  ;;  %v4090_v10 = vld [vmem:[%s5906_s0 + $0x38] ss:$100 sps:$4 sm:$0xff]   ;;  %v4129_v37 = vld [vmem:[%s5905_s1 + $0x860] ss:$8 sps:$4 sm:$0xff]  }
  0x48   :  { %2889 = vmatpush1.bf16.msra.mxu0 %v3997_v11  ;;  %2632 = vmatprep.subr.bf16.mxu1 %v4002_v12  ;;  %v4093_v11 = vld [vmem:[%s5905_s1 + $0x800] ss:$8 sps:$4 sm:$0xff]   ;;  %v4098_v12 = vld [vmem:[%s5905_s1 + $0x214] ss:$8 sps:$4 sm:$0xff]  }
  0x49   :  { %2890 = vmatprep.subr.bf16.mxu0 %v4005_v13  ;;  %v4101_v13 = vld [vmem:[%s5905_s1 + $0x814] ss:$8 sps:$4 sm:$0xff]  }
  0x4b   :  { %2633 = vmatpush1.bf16.msra.mxu1 %v4000_v14  ;;  %v4096_v14 = vld [vmem:[%s5905_s1 + $0x210] ss:$8 sps:$4 sm:$0xff]  }
  0x4c   :  { %2891 = vmatpush1.bf16.msra.mxu0 %v4003_v15  ;;  %2634 = vmatprep.subr.bf16.mxu1 %v4008_v16  ;;  %v4099_v15 = vld [vmem:[%s5905_s1 + $0x810] ss:$8 sps:$4 sm:$0xff]   ;;  %v4104_v16 = vld [vmem:[%s5905_s1 + $0x224] ss:$8 sps:$4 sm:$0xff]  }
  0x4d   :  { %2892 = vmatprep.subr.bf16.mxu0 %v4011_v17  ;;  %v4107_v17 = vld [vmem:[%s5905_s1 + $0x824] ss:$8 sps:$4 sm:$0xff]  }
  0x4f   :  { %2635 = vmatpush1.bf16.msra.mxu1 %v4006_v18  ;;  %v4102_v18 = vld [vmem:[%s5905_s1 + $0x220] ss:$8 sps:$4 sm:$0xff]  }
  0x50   :  { %2893 = vmatpush1.bf16.msra.mxu0 %v4009_v19  ;;  %2636 = vmatprep.subr.bf16.mxu1 %v4014_v20  ;;  %v4188_v19 = vld [vmem:[%s5906_s0 + $0x14] ss:$100 sps:$4 sm:$0xff]   ;;  %v4105_v20 = vld [vmem:[%s5905_s1 + $0x820] ss:$8 sps:$4 sm:$0xff]  }
  0x51   :  { %2894 = vmatprep.subr.bf16.mxu0 %v4017_v21  ;;  %v4110_v21 = vld [vmem:[%s5905_s1 + $0x234] ss:$8 sps:$4 sm:$0xff]  }
  0x53   :  { %2637 = vmatpush1.bf16.msra.mxu1 %v4012_v22  ;;  %v4113_v22 = vld [vmem:[%s5905_s1 + $0x834] ss:$8 sps:$4 sm:$0xff]  }
  0x54   :  { %2895 = vmatpush1.bf16.msra.mxu0 %v4015_v23  ;;  %2638 = vmatprep.subr.bf16.mxu1 %v4020_v24  ;;  %v4194_v23 = vld [vmem:[%s5906_s0 + $0x44] ss:$100 sps:$4 sm:$0xff]   ;;  %v4108_v24 = vld [vmem:[%s5905_s1 + $0x230] ss:$8 sps:$4 sm:$0xff]  }
  0x55   :  { %2896 = vmatprep.subr.bf16.mxu0 %v4023_v25  ;;  %v4111_v25 = vld [vmem:[%s5905_s1 + $0x830] ss:$8 sps:$4 sm:$0xff]  }
  0x57   :  { %2639 = vmatpush1.bf16.msra.mxu1 %v4018_v26  ;;  %v4116_v26 = vld [vmem:[%s5905_s1 + $0x244] ss:$8 sps:$4 sm:$0xff]  }
  0x58   :  { %2897 = vmatpush1.bf16.msra.mxu0 %v4021_v27  ;;  %2640 = vmatprep.subr.bf16.mxu1 %v4026_v28  ;;  %v4119_v27 = vld [vmem:[%s5905_s1 + $0x844] ss:$8 sps:$4 sm:$0xff]   ;;  %v4114_v28 = vld [vmem:[%s5905_s1 + $0x240] ss:$8 sps:$4 sm:$0xff]  }
  0x59   :  { %2898 = vmatprep.subr.bf16.mxu0 %v4029_v29  ;;  %v4117_v29 = vld [vmem:[%s5905_s1 + $0x840] ss:$8 sps:$4 sm:$0xff]  }
  0x5b   :  { %2641 = vmatpush1.bf16.msra.mxu1 %v4024_v30  ;;  %v4122_v30 = vld [vmem:[%s5905_s1 + $0x254] ss:$8 sps:$4 sm:$0xff]  }
  0x5c   :  { %2899 = vmatpush1.bf16.msra.mxu0 %v4027_v31  ;;  %2642 = vmatprep.subr.bf16.mxu1 %v4032_v32  ;;  %v4125_v31 = vld [vmem:[%s5905_s1 + $0x854] ss:$8 sps:$4 sm:$0xff]   ;;  %v4120_v32 = vld [vmem:[%s5905_s1 + $0x250] ss:$8 sps:$4 sm:$0xff]  }
  0x5d   :  { %2900 = vmatprep.subr.bf16.mxu0 %v4035_v33  ;;  %v4123_v33 = vld [vmem:[%s5905_s1 + $0x850] ss:$8 sps:$4 sm:$0xff]  }
  0x5f   :  { %2643 = vmatpush1.bf16.msra.mxu1 %v4030_v35  ;;  %v4131_v35 = vld [vmem:[%s5905_s1 + $0x864] ss:$8 sps:$4 sm:$0xff]  }
  0x60   :  { %2901 = vmatpush1.bf16.msra.mxu0 %v4033_v36  ;;  %2644 = vmatprep.subr.bf16.mxu1 %v4038_v38  ;;  %v4126_v36 = vld [vmem:[%s5905_s1 + $0x260] ss:$8 sps:$4 sm:$0xff]   ;;  %v4134_v38 = vld [vmem:[%s5905_s1 + $0x274] ss:$8 sps:$4 sm:$0xff]  }
  0x61   :  { %2902 = vmatprep.subr.bf16.mxu0 %v4041_v39  ;;  %v4137_v39 = vld [vmem:[%s5905_s1 + $0x874] ss:$8 sps:$4 sm:$0xff]  }
  0x63   :  { %2645 = vmatpush1.bf16.msra.mxu1 %v4036_v40  ;;  %v4132_v40 = vld [vmem:[%s5905_s1 + $0x270] ss:$8 sps:$4 sm:$0xff]  }
  0x64   :  { %2903 = vmatpush1.bf16.msra.mxu0 %v4039_v41  ;;  %2646 = vmatprep.subr.bf16.mxu1 %v4044_v42  ;;  %v4135_v41 = vld [vmem:[%s5905_s1 + $0x870] ss:$8 sps:$4 sm:$0xff]   ;;  %v4140_v42 = vld [vmem:[%s5905_s1 + $0x284] ss:$8 sps:$4 sm:$0xff]  }
  0x65   :  { %2904 = vmatprep.subr.bf16.mxu0 %v4047_v43  ;;  %v4143_v43 = vld [vmem:[%s5905_s1 + $0x884] ss:$8 sps:$4 sm:$0xff]  }
  0x67   :  { %2647 = vmatpush1.bf16.msra.mxu1 %v4042_v44  ;;  %v4138_v44 = vld [vmem:[%s5905_s1 + $0x280] ss:$8 sps:$4 sm:$0xff]  }
  0x68   :  { %2905 = vmatpush1.bf16.msra.mxu0 %v4045_v45  ;;  %2648 = vmatprep.subr.bf16.mxu1 %v4050_v46  ;;  %v4141_v45 = vld [vmem:[%s5905_s1 + $0x880] ss:$8 sps:$4 sm:$0xff]   ;;  %v4146_v46 = vld [vmem:[%s5905_s1 + $0x294] ss:$8 sps:$4 sm:$0xff]  }
  0x69   :  { %2906 = vmatprep.subr.bf16.mxu0 %v4053_v47  ;;  %v4149_v47 = vld [vmem:[%s5905_s1 + $0x894] ss:$8 sps:$4 sm:$0xff]  }
  0x6b   :  { %2649 = vmatpush1.bf16.msra.mxu1 %v4048_v48  ;;  %v4144_v48 = vld [vmem:[%s5905_s1 + $0x290] ss:$8 sps:$4 sm:$0xff]  }
  0x6c   :  { %2907 = vmatpush1.bf16.msra.mxu0 %v4051_v49  ;;  %2650 = vmatprep.subr.bf16.mxu1 %v4056_v50  ;;  %v4147_v49 = vld [vmem:[%s5905_s1 + $0x890] ss:$8 sps:$4 sm:$0xff]   ;;  %v4152_v50 = vld [vmem:[%s5905_s1 + $0x2a4] ss:$8 sps:$4 sm:$0xff]  }
  0x6d   :  { %2908 = vmatprep.subr.bf16.mxu0 %v4059_v51  ;;  %v4155_v51 = vld [vmem:[%s5905_s1 + $0x8a4] ss:$8 sps:$4 sm:$0xff]  }
  0x6f   :  { %2651 = vmatpush1.bf16.msra.mxu1 %v4054_v52  ;;  %v4150_v52 = vld [vmem:[%s5905_s1 + $0x2a0] ss:$8 sps:$4 sm:$0xff]  }
  0x70   :  { %2909 = vmatpush1.bf16.msra.mxu0 %v4057_v53  ;;  %2652 = vmatprep.subr.bf16.mxu1 %v4062_v54  ;;  %v4153_v53 = vld [vmem:[%s5905_s1 + $0x8a0] ss:$8 sps:$4 sm:$0xff]   ;;  %v4158_v54 = vld [vmem:[%s5905_s1 + $0x2b4] ss:$8 sps:$4 sm:$0xff]  }
  0x71   :  { %2910 = vmatprep.subr.bf16.mxu0 %v4065_v55  ;;  %v4161_v55 = vld [vmem:[%s5905_s1 + $0x8b4] ss:$8 sps:$4 sm:$0xff]  }
  0x73   :  { %2653 = vmatpush1.bf16.msra.mxu1 %v4060_v56  ;;  %v4156_v56 = vld [vmem:[%s5905_s1 + $0x2b0] ss:$8 sps:$4 sm:$0xff]  }
  0x74   :  { %2911 = vmatpush1.bf16.msra.mxu0 %v4063_v57  ;;  %2654 = vmatprep.subr.bf16.mxu1 %v4068_v58  ;;  %v4159_v57 = vld [vmem:[%s5905_s1 + $0x8b0] ss:$8 sps:$4 sm:$0xff]   ;;  %v4164_v58 = vld [vmem:[%s5905_s1 + $0x2c4] ss:$8 sps:$4 sm:$0xff]  }
  0x75   :  { %2912 = vmatprep.subr.bf16.mxu0 %v4071_v59  ;;  %v4167_v59 = vld [vmem:[%s5905_s1 + $0x8c4] ss:$8 sps:$4 sm:$0xff]  }
  0x77   :  { %2655 = vmatpush1.bf16.msra.mxu1 %v4066_v60  ;;  %v4162_v60 = vld [vmem:[%s5905_s1 + $0x2c0] ss:$8 sps:$4 sm:$0xff]  }
  0x78   :  { %2913 = vmatpush1.bf16.msra.mxu0 %v4069_v61  ;;  %2656 = vmatprep.subr.bf16.mxu1 %v4074_v62  ;;  %v4165_v61 = vld [vmem:[%s5905_s1 + $0x8c0] ss:$8 sps:$4 sm:$0xff]   ;;  %v4170_v62 = vld [vmem:[%s5905_s1 + $0x2d4] ss:$8 sps:$4 sm:$0xff]  }
  0x79   :  { %2914 = vmatprep.subr.bf16.mxu0 %v4077_v63  ;;  %v4173_v63 = vld [vmem:[%s5905_s1 + $0x8d4] ss:$8 sps:$4 sm:$0xff]  }
  0x7b   :  { %2657 = vmatpush1.bf16.msra.mxu1 %v4072_v0  ;;  %v4168_v0 = vld [vmem:[%s5905_s1 + $0x2d0] ss:$8 sps:$4 sm:$0xff]  }
  0x7c   :  { %2915 = vmatpush1.bf16.msra.mxu0 %v4075_v1  ;;  %2658 = vmatprep.subr.bf16.mxu1 %v4080_v2  ;;  %v4171_v1 = vld [vmem:[%s5905_s1 + $0x8d0] ss:$8 sps:$4 sm:$0xff]   ;;  %v4176_v2 = vld [vmem:[%s5905_s1 + $0x2e4] ss:$8 sps:$4 sm:$0xff]  }
  0x7d   :  { %2916 = vmatprep.subr.bf16.mxu0 %v4083_v3  ;;  %v4179_v3 = vld [vmem:[%s5905_s1 + $0x8e4] ss:$8 sps:$4 sm:$0xff]  }
  0x7f   :  { %2659 = vmatpush1.bf16.msra.mxu1 %v4078_v4  ;;  %v4174_v4 = vld [vmem:[%s5905_s1 + $0x2e0] ss:$8 sps:$4 sm:$0xff]  }
  0x80   :  { %2917 = vmatpush1.bf16.msra.mxu0 %v4081_v5  ;;  %2671 = vmatprep.subr.bf16.mxu1 %v4089_v6  ;;  %v4177_v5 = vld [vmem:[%s5905_s1 + $0x8e0] ss:$8 sps:$4 sm:$0xff]   ;;  %v4182_v6 = vld [vmem:[%s5905_s1 + $0x2f4] ss:$8 sps:$4 sm:$0xff]  }
  0x81   :  { %2929 = vmatprep.subr.bf16.mxu0 %v4095_v7  ;;  %v4185_v7 = vld [vmem:[%s5905_s1 + $0x8f4] ss:$8 sps:$4 sm:$0xff]  }
  0x82   :  { %2661 = vmatmul.mubr.bf16.vlgmr.msra.gmra.mrb[0].mxu1 %v4084_v8  ;;  %v4180_v8 = vld [vmem:[%s5905_s1 + $0x2f0] ss:$8 sps:$4 sm:$0xff]  }
  0x83   :  { %2919 = vmatmul.mubr.bf16.vlgmr.msra.gmra.mrb[0].mxu0 %v4090_v10  ;;  %2672 = vmatpush1.bf16.msra.mxu1 %v4087_v9  ;;  %v4183_v9 = vld [vmem:[%s5905_s1 + $0x8f0] ss:$8 sps:$4 sm:$0xff]   ;;  %v4191_v10 = vld [vmem:[%s5905_s1 + $0x304] ss:$8 sps:$4 sm:$0xff]  }
  0x84   :  { %2930 = vmatpush1.bf16.msra.mxu0 %v4093_v11  ;;  %2673 = vmatprep.subr.bf16.mxu1 %v4098_v12  ;;  %v4197_v11 = vld [vmem:[%s5905_s1 + $0x904] ss:$8 sps:$4 sm:$0xff]   ;;  %v4186_v12 = vld [vmem:[%s5906_s0 + $0x10] ss:$100 sps:$4 sm:$0xff]  }
  0x85   :  { %2931 = vmatprep.subr.bf16.mxu0 %v4101_v13  ;;  %2703 = vmatprep.mubr.bf16.mxu1 %v4188_v19  ;;  %v4189_v13 = vld [vmem:[%s5905_s1 + $0x300] ss:$8 sps:$4 sm:$0xff]   ;;  %v4296_v19 = vld [vmem:[%s5906_s0 + $0x4c] ss:$100 sps:$4 sm:$0xff]  }
  0x86   :  { %2961 = vmatprep.mubr.bf16.mxu0 %v4194_v23  ;;  %v4209_v23 = vld [vmem:[%s5905_s1 + $0x924] ss:$8 sps:$4 sm:$0xff]  }
  0x87   :  { %2674 = vmatpush1.bf16.msra.mxu1 %v4096_v14  ;;  %v4192_v14 = vld [vmem:[%s5906_s0 + $0x40] ss:$100 sps:$4 sm:$0xff]  }
  0x88   :  { %2932 = vmatpush1.bf16.msra.mxu0 %v4099_v15  ;;  %2675 = vmatprep.subr.bf16.mxu1 %v4104_v16  ;;  %v4195_v15 = vld [vmem:[%s5905_s1 + $0x900] ss:$8 sps:$4 sm:$0xff]   ;;  %v4200_v16 = vld [vmem:[%s5905_s1 + $0x314] ss:$8 sps:$4 sm:$0xff]  }
  0x89   :  { %2933 = vmatprep.subr.bf16.mxu0 %v4107_v17  ;;  %v4203_v17 = vld [vmem:[%s5905_s1 + $0x914] ss:$8 sps:$4 sm:$0xff]  }
  0x8b   :  { %2676 = vmatpush1.bf16.msra.mxu1 %v4102_v18  ;;  %v4290_v18 = vld [vmem:[%s5906_s0 + $0x1c] ss:$100 sps:$4 sm:$0xff]  }
  0x8c   :  { %2934 = vmatpush1.bf16.msra.mxu0 %v4105_v20  ;;  %2677 = vmatprep.subr.bf16.mxu1 %v4110_v21  ;;  %v4198_v20 = vld [vmem:[%s5905_s1 + $0x310] ss:$8 sps:$4 sm:$0xff]  }
  0x8d   :  { %2935 = vmatprep.subr.bf16.mxu0 %v4113_v22  ;;  %v4201_v21 = vld [vmem:[%s5905_s1 + $0x910] ss:$8 sps:$4 sm:$0xff]   ;;  %v4206_v22 = vld [vmem:[%s5905_s1 + $0x324] ss:$8 sps:$4 sm:$0xff]  }
  0x8f   :  { %2678 = vmatpush1.bf16.msra.mxu1 %v4108_v24  ;;  %v4204_v24 = vld [vmem:[%s5905_s1 + $0x320] ss:$8 sps:$4 sm:$0xff]  }
  0x90   :  { %2936 = vmatpush1.bf16.msra.mxu0 %v4111_v25  ;;  %2679 = vmatprep.subr.bf16.mxu1 %v4116_v26  ;;  %v4207_v25 = vld [vmem:[%s5905_s1 + $0x920] ss:$8 sps:$4 sm:$0xff]   ;;  %v4212_v26 = vld [vmem:[%s5905_s1 + $0x334] ss:$8 sps:$4 sm:$0xff]  }
  0x91   :  { %2937 = vmatprep.subr.bf16.mxu0 %v4119_v27  ;;  %v4215_v27 = vld [vmem:[%s5905_s1 + $0x934] ss:$8 sps:$4 sm:$0xff]  }
  0x93   :  { %2680 = vmatpush1.bf16.msra.mxu1 %v4114_v28  ;;  %v4210_v28 = vld [vmem:[%s5905_s1 + $0x330] ss:$8 sps:$4 sm:$0xff]  }
  0x94   :  { %2938 = vmatpush1.bf16.msra.mxu0 %v4117_v29  ;;  %2681 = vmatprep.subr.bf16.mxu1 %v4122_v30  ;;  %v4213_v29 = vld [vmem:[%s5905_s1 + $0x930] ss:$8 sps:$4 sm:$0xff]   ;;  %v4218_v30 = vld [vmem:[%s5905_s1 + $0x344] ss:$8 sps:$4 sm:$0xff]  }
  0x95   :  { %2939 = vmatprep.subr.bf16.mxu0 %v4125_v31  ;;  %v4221_v31 = vld [vmem:[%s5905_s1 + $0x944] ss:$8 sps:$4 sm:$0xff]  }
  0x97   :  { %2682 = vmatpush1.bf16.msra.mxu1 %v4120_v32  ;;  %v4216_v32 = vld [vmem:[%s5905_s1 + $0x340] ss:$8 sps:$4 sm:$0xff]  }
  0x98   :  { %2940 = vmatpush1.bf16.msra.mxu0 %v4123_v33  ;;  %2683 = vmatprep.subr.bf16.mxu1 %v4128_v34  ;;  %v4219_v33 = vld [vmem:[%s5905_s1 + $0x940] ss:$8 sps:$4 sm:$0xff]   ;;  %v4224_v34 = vld [vmem:[%s5905_s1 + $0x354] ss:$8 sps:$4 sm:$0xff]  }
  0x99   :  { %2941 = vmatprep.subr.bf16.mxu0 %v4131_v35  ;;  %v4227_v35 = vld [vmem:[%s5905_s1 + $0x954] ss:$8 sps:$4 sm:$0xff]  }
  0x9b   :  { %2684 = vmatpush1.bf16.msra.mxu1 %v4126_v36  ;;  %v4222_v36 = vld [vmem:[%s5905_s1 + $0x350] ss:$8 sps:$4 sm:$0xff]  }
  0x9c   :  { %2942 = vmatpush1.bf16.msra.mxu0 %v4129_v37  ;;  %2685 = vmatprep.subr.bf16.mxu1 %v4134_v38  ;;  %v4225_v37 = vld [vmem:[%s5905_s1 + $0x950] ss:$8 sps:$4 sm:$0xff]   ;;  %v4230_v38 = vld [vmem:[%s5905_s1 + $0x364] ss:$8 sps:$4 sm:$0xff]  }
  0x9d   :  { %2943 = vmatprep.subr.bf16.mxu0 %v4137_v39  ;;  %v4233_v39 = vld [vmem:[%s5905_s1 + $0x964] ss:$8 sps:$4 sm:$0xff]  }
  0x9f   :  { %2686 = vmatpush1.bf16.msra.mxu1 %v4132_v40  ;;  %v4228_v40 = vld [vmem:[%s5905_s1 + $0x360] ss:$8 sps:$4 sm:$0xff]  }
  0xa0   :  { %2944 = vmatpush1.bf16.msra.mxu0 %v4135_v41  ;;  %2687 = vmatprep.subr.bf16.mxu1 %v4140_v42  ;;  %v4231_v41 = vld [vmem:[%s5905_s1 + $0x960] ss:$8 sps:$4 sm:$0xff]   ;;  %v4236_v42 = vld [vmem:[%s5905_s1 + $0x374] ss:$8 sps:$4 sm:$0xff]  }
  0xa1   :  { %2945 = vmatprep.subr.bf16.mxu0 %v4143_v43  ;;  %v4239_v43 = vld [vmem:[%s5905_s1 + $0x974] ss:$8 sps:$4 sm:$0xff]  }
  0xa3   :  { %2688 = vmatpush1.bf16.msra.mxu1 %v4138_v44  ;;  %v4234_v44 = vld [vmem:[%s5905_s1 + $0x370] ss:$8 sps:$4 sm:$0xff]  }
  0xa4   :  { %2946 = vmatpush1.bf16.msra.mxu0 %v4141_v45  ;;  %2689 = vmatprep.subr.bf16.mxu1 %v4146_v46  ;;  %v4237_v45 = vld [vmem:[%s5905_s1 + $0x970] ss:$8 sps:$4 sm:$0xff]   ;;  %v4242_v46 = vld [vmem:[%s5905_s1 + $0x384] ss:$8 sps:$4 sm:$0xff]  }
  0xa5   :  { %2947 = vmatprep.subr.bf16.mxu0 %v4149_v47  ;;  %v4245_v47 = vld [vmem:[%s5905_s1 + $0x984] ss:$8 sps:$4 sm:$0xff]  }
  0xa7   :  { %2690 = vmatpush1.bf16.msra.mxu1 %v4144_v48  ;;  %v4240_v48 = vld [vmem:[%s5905_s1 + $0x380] ss:$8 sps:$4 sm:$0xff]  }
  0xa8   :  { %2948 = vmatpush1.bf16.msra.mxu0 %v4147_v49  ;;  %2691 = vmatprep.subr.bf16.mxu1 %v4152_v50  ;;  %v4243_v49 = vld [vmem:[%s5905_s1 + $0x980] ss:$8 sps:$4 sm:$0xff]   ;;  %v4248_v50 = vld [vmem:[%s5905_s1 + $0x394] ss:$8 sps:$4 sm:$0xff]  }
  0xa9   :  { %2949 = vmatprep.subr.bf16.mxu0 %v4155_v51  ;;  %v4251_v51 = vld [vmem:[%s5905_s1 + $0x994] ss:$8 sps:$4 sm:$0xff]  }
  0xab   :  { %2692 = vmatpush1.bf16.msra.mxu1 %v4150_v52  ;;  %v4246_v52 = vld [vmem:[%s5905_s1 + $0x390] ss:$8 sps:$4 sm:$0xff]  }
  0xac   :  { %2950 = vmatpush1.bf16.msra.mxu0 %v4153_v53  ;;  %2693 = vmatprep.subr.bf16.mxu1 %v4158_v54  ;;  %v4249_v53 = vld [vmem:[%s5905_s1 + $0x990] ss:$8 sps:$4 sm:$0xff]   ;;  %v4254_v54 = vld [vmem:[%s5905_s1 + $0x3a4] ss:$8 sps:$4 sm:$0xff]  }
  0xad   :  { %2951 = vmatprep.subr.bf16.mxu0 %v4161_v55  ;;  %v4257_v55 = vld [vmem:[%s5905_s1 + $0x9a4] ss:$8 sps:$4 sm:$0xff]  }
  0xaf   :  { %2694 = vmatpush1.bf16.msra.mxu1 %v4156_v56  ;;  %v4252_v56 = vld [vmem:[%s5905_s1 + $0x3a0] ss:$8 sps:$4 sm:$0xff]  }
  0xb0   :  { %2952 = vmatpush1.bf16.msra.mxu0 %v4159_v57  ;;  %2695 = vmatprep.subr.bf16.mxu1 %v4164_v58  ;;  %v4255_v57 = vld [vmem:[%s5905_s1 + $0x9a0] ss:$8 sps:$4 sm:$0xff]   ;;  %v4260_v58 = vld [vmem:[%s5905_s1 + $0x3b4] ss:$8 sps:$4 sm:$0xff]  }
  0xb1   :  { %2953 = vmatprep.subr.bf16.mxu0 %v4167_v59  ;;  %v4263_v59 = vld [vmem:[%s5905_s1 + $0x9b4] ss:$8 sps:$4 sm:$0xff]  }
  0xb3   :  { %2696 = vmatpush1.bf16.msra.mxu1 %v4162_v60  ;;  %v4258_v60 = vld [vmem:[%s5905_s1 + $0x3b0] ss:$8 sps:$4 sm:$0xff]  }
  0xb4   :  { %2954 = vmatpush1.bf16.msra.mxu0 %v4165_v61  ;;  %2697 = vmatprep.subr.bf16.mxu1 %v4170_v62  ;;  %v4261_v61 = vld [vmem:[%s5905_s1 + $0x9b0] ss:$8 sps:$4 sm:$0xff]   ;;  %v4266_v62 = vld [vmem:[%s5905_s1 + $0x3c4] ss:$8 sps:$4 sm:$0xff]  }
  0xb5   :  { %2955 = vmatprep.subr.bf16.mxu0 %v4173_v63  ;;  %v4269_v63 = vld [vmem:[%s5905_s1 + $0x9c4] ss:$8 sps:$4 sm:$0xff]  }
  0xb7   :  { %2698 = vmatpush1.bf16.msra.mxu1 %v4168_v0  ;;  %v4264_v0 = vld [vmem:[%s5905_s1 + $0x3c0] ss:$8 sps:$4 sm:$0xff]  }
  0xb8   :  { %2956 = vmatpush1.bf16.msra.mxu0 %v4171_v1  ;;  %2699 = vmatprep.subr.bf16.mxu1 %v4176_v2  ;;  %v4267_v1 = vld [vmem:[%s5905_s1 + $0x9c0] ss:$8 sps:$4 sm:$0xff]   ;;  %v4272_v2 = vld [vmem:[%s5905_s1 + $0x3d4] ss:$8 sps:$4 sm:$0xff]  }
  0xb9   :  { %2957 = vmatprep.subr.bf16.mxu0 %v4179_v3  ;;  %v4275_v3 = vld [vmem:[%s5905_s1 + $0x9d4] ss:$8 sps:$4 sm:$0xff]  }
  0xbb   :  { %2700 = vmatpush1.bf16.msra.mxu1 %v4174_v4  ;;  %v4270_v4 = vld [vmem:[%s5905_s1 + $0x3d0] ss:$8 sps:$4 sm:$0xff]  }
  0xbc   :  { %2958 = vmatpush1.bf16.msra.mxu0 %v4177_v5  ;;  %2701 = vmatprep.subr.bf16.mxu1 %v4182_v6  ;;  %v4273_v5 = vld [vmem:[%s5905_s1 + $0x9d0] ss:$8 sps:$4 sm:$0xff]   ;;  %v4278_v6 = vld [vmem:[%s5905_s1 + $0x3e4] ss:$8 sps:$4 sm:$0xff]  }
  0xbd   :  { %2959 = vmatprep.subr.bf16.mxu0 %v4185_v7  ;;  %v4281_v7 = vld [vmem:[%s5905_s1 + $0x9e4] ss:$8 sps:$4 sm:$0xff]  }
  0xbf   :  { %2702 = vmatpush1.bf16.msra.mxu1 %v4180_v8  ;;  %v4276_v8 = vld [vmem:[%s5905_s1 + $0x3e0] ss:$8 sps:$4 sm:$0xff]  }
  0xc0   :  { %2960 = vmatpush1.bf16.msra.mxu0 %v4183_v9  ;;  %2714 = vmatprep.subr.bf16.mxu1 %v4191_v10  ;;  %v4279_v9 = vld [vmem:[%s5905_s1 + $0x9e0] ss:$8 sps:$4 sm:$0xff]   ;;  %v4284_v10 = vld [vmem:[%s5905_s1 + $0x3f4] ss:$8 sps:$4 sm:$0xff]  }
  0xc1   :  { %2972 = vmatprep.subr.bf16.mxu0 %v4197_v11  ;;  %v4287_v11 = vld [vmem:[%s5905_s1 + $0x9f4] ss:$8 sps:$4 sm:$0xff]  }
  0xc2   :  { %2704 = vmatmul.mubr.bf16.vlgmr.msra.gmra.mrb[0].mxu1 %v4186_v12  ;;  %v4282_v12 = vld [vmem:[%s5905_s1 + $0x3f0] ss:$8 sps:$4 sm:$0xff]  }
  0xc3   :  { %2962 = vmatmul.mubr.bf16.vlgmr.msra.gmra.mrb[0].mxu0 %v4192_v14  ;;  %2715 = vmatpush1.bf16.msra.mxu1 %v4189_v13  ;;  %v4285_v13 = vld [vmem:[%s5905_s1 + $0x9f0] ss:$8 sps:$4 sm:$0xff]   ;;  %v4293_v14 = vld [vmem:[%s5905_s1 + $0x404] ss:$8 sps:$4 sm:$0xff]  }
  0xc4   :  { %2973 = vmatpush1.bf16.msra.mxu0 %v4195_v15  ;;  %2716 = vmatprep.subr.bf16.mxu1 %v4200_v16  ;;  %v4299_v15 = vld [vmem:[%s5905_s1 + $0xa04] ss:$8 sps:$4 sm:$0xff]   ;;  %v4288_v16 = vld [vmem:[%s5906_s0 + $0x18] ss:$100 sps:$4 sm:$0xff]  }
  0xc5   :  { %2974 = vmatprep.subr.bf16.mxu0 %v4203_v17  ;;  %2746 = vmatprep.mubr.bf16.mxu1 %v4290_v18  ;;  %v4291_v17 = vld [vmem:[%s5905_s1 + $0x400] ss:$8 sps:$4 sm:$0xff]  }
  0xc6   :  { %3004 = vmatprep.mubr.bf16.mxu0 %v4296_v19  ;;  %v4294_v18 = vld [vmem:[%s5906_s0 + $0x48] ss:$100 sps:$4 sm:$0xff]  }
  0xc7   :  { %2717 = vmatpush1.bf16.msra.mxu1 %v4198_v20  ;;  %v4297_v19 = vld [vmem:[%s5905_s1 + $0xa00] ss:$8 sps:$4 sm:$0xff]   ;;  %v4302_v20 = vld [vmem:[%s5905_s1 + $0x414] ss:$8 sps:$4 sm:$0xff]  }
  0xc8   :  { %2975 = vmatpush1.bf16.msra.mxu0 %v4201_v21  ;;  %2718 = vmatprep.subr.bf16.mxu1 %v4206_v22  ;;  %v4305_v21 = vld [vmem:[%s5905_s1 + $0xa14] ss:$8 sps:$4 sm:$0xff]   ;;  %v4392_v22 = vld [vmem:[%s5906_s0 + $0x24] ss:$100 sps:$4 sm:$0xff]  }
  0xc9   :  { %2976 = vmatprep.subr.bf16.mxu0 %v4209_v23  ;;  %v4398_v23 = vld [vmem:[%s5906_s0 + $0x54] ss:$100 sps:$4 sm:$0xff]  }
  0xcb   :  { %2719 = vmatpush1.bf16.msra.mxu1 %v4204_v24  ;;  %v4300_v24 = vld [vmem:[%s5905_s1 + $0x410] ss:$8 sps:$4 sm:$0xff]  }
  0xcc   :  { %2977 = vmatpush1.bf16.msra.mxu0 %v4207_v25  ;;  %2720 = vmatprep.subr.bf16.mxu1 %v4212_v26  ;;  %v4303_v25 = vld [vmem:[%s5905_s1 + $0xa10] ss:$8 sps:$4 sm:$0xff]   ;;  %v4308_v26 = vld [vmem:[%s5905_s1 + $0x424] ss:$8 sps:$4 sm:$0xff]  }
  0xcd   :  { %2978 = vmatprep.subr.bf16.mxu0 %v4215_v27  ;;  %v4311_v27 = vld [vmem:[%s5905_s1 + $0xa24] ss:$8 sps:$4 sm:$0xff]  }
  0xcf   :  { %2721 = vmatpush1.bf16.msra.mxu1 %v4210_v28  ;;  %v4306_v28 = vld [vmem:[%s5905_s1 + $0x420] ss:$8 sps:$4 sm:$0xff]  }
  0xd0   :  { %2979 = vmatpush1.bf16.msra.mxu0 %v4213_v29  ;;  %2722 = vmatprep.subr.bf16.mxu1 %v4218_v30  ;;  %v4309_v29 = vld [vmem:[%s5905_s1 + $0xa20] ss:$8 sps:$4 sm:$0xff]   ;;  %v4314_v30 = vld [vmem:[%s5905_s1 + $0x434] ss:$8 sps:$4 sm:$0xff]  }
  0xd1   :  { %2980 = vmatprep.subr.bf16.mxu0 %v4221_v31  ;;  %v4317_v31 = vld [vmem:[%s5905_s1 + $0xa34] ss:$8 sps:$4 sm:$0xff]  }
  0xd3   :  { %2723 = vmatpush1.bf16.msra.mxu1 %v4216_v32  ;;  %v4312_v32 = vld [vmem:[%s5905_s1 + $0x430] ss:$8 sps:$4 sm:$0xff]  }
  0xd4   :  { %2981 = vmatpush1.bf16.msra.mxu0 %v4219_v33  ;;  %2724 = vmatprep.subr.bf16.mxu1 %v4224_v34  ;;  %v4315_v33 = vld [vmem:[%s5905_s1 + $0xa30] ss:$8 sps:$4 sm:$0xff]   ;;  %v4320_v34 = vld [vmem:[%s5905_s1 + $0x444] ss:$8 sps:$4 sm:$0xff]  }
  0xd5   :  { %2982 = vmatprep.subr.bf16.mxu0 %v4227_v35  ;;  %v4323_v35 = vld [vmem:[%s5905_s1 + $0xa44] ss:$8 sps:$4 sm:$0xff]  }
  0xd7   :  { %2725 = vmatpush1.bf16.msra.mxu1 %v4222_v36  ;;  %v4318_v36 = vld [vmem:[%s5905_s1 + $0x440] ss:$8 sps:$4 sm:$0xff]  }
  0xd8   :  { %2983 = vmatpush1.bf16.msra.mxu0 %v4225_v37  ;;  %2726 = vmatprep.subr.bf16.mxu1 %v4230_v38  ;;  %v4321_v37 = vld [vmem:[%s5905_s1 + $0xa40] ss:$8 sps:$4 sm:$0xff]   ;;  %v4326_v38 = vld [vmem:[%s5905_s1 + $0x454] ss:$8 sps:$4 sm:$0xff]  }
  0xd9   :  { %2984 = vmatprep.subr.bf16.mxu0 %v4233_v39  ;;  %v4329_v39 = vld [vmem:[%s5905_s1 + $0xa54] ss:$8 sps:$4 sm:$0xff]  }
  0xdb   :  { %2727 = vmatpush1.bf16.msra.mxu1 %v4228_v40  ;;  %v4324_v40 = vld [vmem:[%s5905_s1 + $0x450] ss:$8 sps:$4 sm:$0xff]  }
  0xdc   :  { %2985 = vmatpush1.bf16.msra.mxu0 %v4231_v41  ;;  %2728 = vmatprep.subr.bf16.mxu1 %v4236_v42  ;;  %v4327_v41 = vld [vmem:[%s5905_s1 + $0xa50] ss:$8 sps:$4 sm:$0xff]   ;;  %v4332_v42 = vld [vmem:[%s5905_s1 + $0x464] ss:$8 sps:$4 sm:$0xff]  }
  0xdd   :  { %2986 = vmatprep.subr.bf16.mxu0 %v4239_v43  ;;  %v4335_v43 = vld [vmem:[%s5905_s1 + $0xa64] ss:$8 sps:$4 sm:$0xff]  }
  0xdf   :  { %2729 = vmatpush1.bf16.msra.mxu1 %v4234_v44  ;;  %v4330_v44 = vld [vmem:[%s5905_s1 + $0x460] ss:$8 sps:$4 sm:$0xff]  }
  0xe0   :  { %2987 = vmatpush1.bf16.msra.mxu0 %v4237_v45  ;;  %2730 = vmatprep.subr.bf16.mxu1 %v4242_v46  ;;  %v4333_v45 = vld [vmem:[%s5905_s1 + $0xa60] ss:$8 sps:$4 sm:$0xff]   ;;  %v4338_v46 = vld [vmem:[%s5905_s1 + $0x474] ss:$8 sps:$4 sm:$0xff]  }
  0xe1   :  { %2988 = vmatprep.subr.bf16.mxu0 %v4245_v47  ;;  %v4341_v47 = vld [vmem:[%s5905_s1 + $0xa74] ss:$8 sps:$4 sm:$0xff]  }
  0xe3   :  { %2731 = vmatpush1.bf16.msra.mxu1 %v4240_v48  ;;  %v4336_v48 = vld [vmem:[%s5905_s1 + $0x470] ss:$8 sps:$4 sm:$0xff]  }
  0xe4   :  { %2989 = vmatpush1.bf16.msra.mxu0 %v4243_v49  ;;  %2732 = vmatprep.subr.bf16.mxu1 %v4248_v50  ;;  %v4339_v49 = vld [vmem:[%s5905_s1 + $0xa70] ss:$8 sps:$4 sm:$0xff]   ;;  %v4344_v50 = vld [vmem:[%s5905_s1 + $0x484] ss:$8 sps:$4 sm:$0xff]  }
  0xe5   :  { %2990 = vmatprep.subr.bf16.mxu0 %v4251_v51  ;;  %v4347_v51 = vld [vmem:[%s5905_s1 + $0xa84] ss:$8 sps:$4 sm:$0xff]  }
  0xe7   :  { %2733 = vmatpush1.bf16.msra.mxu1 %v4246_v52  ;;  %v4342_v52 = vld [vmem:[%s5905_s1 + $0x480] ss:$8 sps:$4 sm:$0xff]  }
  0xe8   :  { %2991 = vmatpush1.bf16.msra.mxu0 %v4249_v53  ;;  %2734 = vmatprep.subr.bf16.mxu1 %v4254_v54  ;;  %v4345_v53 = vld [vmem:[%s5905_s1 + $0xa80] ss:$8 sps:$4 sm:$0xff]   ;;  %v4350_v54 = vld [vmem:[%s5905_s1 + $0x494] ss:$8 sps:$4 sm:$0xff]  }
  0xe9   :  { %2992 = vmatprep.subr.bf16.mxu0 %v4257_v55  ;;  %v4353_v55 = vld [vmem:[%s5905_s1 + $0xa94] ss:$8 sps:$4 sm:$0xff]  }
  0xeb   :  { %2735 = vmatpush1.bf16.msra.mxu1 %v4252_v56  ;;  %v4348_v56 = vld [vmem:[%s5905_s1 + $0x490] ss:$8 sps:$4 sm:$0xff]  }
  0xec   :  { %2993 = vmatpush1.bf16.msra.mxu0 %v4255_v57  ;;  %2736 = vmatprep.subr.bf16.mxu1 %v4260_v58  ;;  %v4351_v57 = vld [vmem:[%s5905_s1 + $0xa90] ss:$8 sps:$4 sm:$0xff]   ;;  %v4356_v58 = vld [vmem:[%s5905_s1 + $0x4a4] ss:$8 sps:$4 sm:$0xff]  }
  0xed   :  { %2994 = vmatprep.subr.bf16.mxu0 %v4263_v59  ;;  %v4359_v59 = vld [vmem:[%s5905_s1 + $0xaa4] ss:$8 sps:$4 sm:$0xff]  }
  0xef   :  { %2737 = vmatpush1.bf16.msra.mxu1 %v4258_v60  ;;  %v4354_v60 = vld [vmem:[%s5905_s1 + $0x4a0] ss:$8 sps:$4 sm:$0xff]  }
  0xf0   :  { %2995 = vmatpush1.bf16.msra.mxu0 %v4261_v61  ;;  %2738 = vmatprep.subr.bf16.mxu1 %v4266_v62  ;;  %v4357_v61 = vld [vmem:[%s5905_s1 + $0xaa0] ss:$8 sps:$4 sm:$0xff]   ;;  %v4362_v62 = vld [vmem:[%s5905_s1 + $0x4b4] ss:$8 sps:$4 sm:$0xff]  }
  0xf1   :  { %2996 = vmatprep.subr.bf16.mxu0 %v4269_v63  ;;  %v4365_v63 = vld [vmem:[%s5905_s1 + $0xab4] ss:$8 sps:$4 sm:$0xff]  }
  0xf3   :  { %2739 = vmatpush1.bf16.msra.mxu1 %v4264_v0  ;;  %v4360_v0 = vld [vmem:[%s5905_s1 + $0x4b0] ss:$8 sps:$4 sm:$0xff]  }
  0xf4   :  { %2997 = vmatpush1.bf16.msra.mxu0 %v4267_v1  ;;  %2740 = vmatprep.subr.bf16.mxu1 %v4272_v2  ;;  %v4363_v1 = vld [vmem:[%s5905_s1 + $0xab0] ss:$8 sps:$4 sm:$0xff]   ;;  %v4368_v2 = vld [vmem:[%s5905_s1 + $0x4c4] ss:$8 sps:$4 sm:$0xff]  }
  0xf5   :  { %2998 = vmatprep.subr.bf16.mxu0 %v4275_v3  ;;  %v4371_v3 = vld [vmem:[%s5905_s1 + $0xac4] ss:$8 sps:$4 sm:$0xff]  }
  0xf7   :  { %2741 = vmatpush1.bf16.msra.mxu1 %v4270_v4  ;;  %v4366_v4 = vld [vmem:[%s5905_s1 + $0x4c0] ss:$8 sps:$4 sm:$0xff]  }
  0xf8   :  { %2999 = vmatpush1.bf16.msra.mxu0 %v4273_v5  ;;  %2742 = vmatprep.subr.bf16.mxu1 %v4278_v6  ;;  %v4369_v5 = vld [vmem:[%s5905_s1 + $0xac0] ss:$8 sps:$4 sm:$0xff]   ;;  %v4374_v6 = vld [vmem:[%s5905_s1 + $0x4d4] ss:$8 sps:$4 sm:$0xff]  }
  0xf9   :  { %3000 = vmatprep.subr.bf16.mxu0 %v4281_v7  ;;  %v4377_v7 = vld [vmem:[%s5905_s1 + $0xad4] ss:$8 sps:$4 sm:$0xff]  }
  0xfb   :  { %2743 = vmatpush1.bf16.msra.mxu1 %v4276_v8  ;;  %v4372_v8 = vld [vmem:[%s5905_s1 + $0x4d0] ss:$8 sps:$4 sm:$0xff]  }
  0xfc   :  { %3001 = vmatpush1.bf16.msra.mxu0 %v4279_v9  ;;  %2744 = vmatprep.subr.bf16.mxu1 %v4284_v10  ;;  %v4375_v9 = vld [vmem:[%s5905_s1 + $0xad0] ss:$8 sps:$4 sm:$0xff]   ;;  %v4380_v10 = vld [vmem:[%s5905_s1 + $0x4e4] ss:$8 sps:$4 sm:$0xff]  }
  0xfd   :  { %3002 = vmatprep.subr.bf16.mxu0 %v4287_v11  ;;  %v4383_v11 = vld [vmem:[%s5905_s1 + $0xae4] ss:$8 sps:$4 sm:$0xff]  }
  0xff   :  { %2745 = vmatpush1.bf16.msra.mxu1 %v4282_v12  ;;  %v4378_v12 = vld [vmem:[%s5905_s1 + $0x4e0] ss:$8 sps:$4 sm:$0xff]  }
 0x100   :  { %3003 = vmatpush1.bf16.msra.mxu0 %v4285_v13  ;;  %2757 = vmatprep.subr.bf16.mxu1 %v4293_v14  ;;  %v4381_v13 = vld [vmem:[%s5905_s1 + $0xae0] ss:$8 sps:$4 sm:$0xff]   ;;  %v4386_v14 = vld [vmem:[%s5905_s1 + $0x4f4] ss:$8 sps:$4 sm:$0xff]  }
 0x101   :  { %3015 = vmatprep.subr.bf16.mxu0 %v4299_v15  ;;  %v4389_v15 = vld [vmem:[%s5905_s1 + $0xaf4] ss:$8 sps:$4 sm:$0xff]  }
 0x102   :  { %2747 = vmatmul.mubr.bf16.vlgmr.msra.gmra.mrb[0].mxu1 %v4288_v16  ;;  %v4384_v16 = vld [vmem:[%s5905_s1 + $0x4f0] ss:$8 sps:$4 sm:$0xff]  }
 0x103   :  { %3005 = vmatmul.mubr.bf16.vlgmr.msra.gmra.mrb[0].mxu0 %v4294_v18  ;;  %2758 = vmatpush1.bf16.msra.mxu1 %v4291_v17  ;;  %v4387_v17 = vld [vmem:[%s5905_s1 + $0xaf0] ss:$8 sps:$4 sm:$0xff]   ;;  %v4395_v18 = vld [vmem:[%s5905_s1 + $0x504] ss:$8 sps:$4 sm:$0xff]  }
 0x104   :  { %3016 = vmatpush1.bf16.msra.mxu0 %v4297_v19  ;;  %2759 = vmatprep.subr.bf16.mxu1 %v4302_v20  ;;  %v4401_v19 = vld [vmem:[%s5905_s1 + $0xb04] ss:$8 sps:$4 sm:$0xff]  }
 0x105   :  { %3017 = vmatprep.subr.bf16.mxu0 %v4305_v21  ;;  %2789 = vmatprep.mubr.bf16.mxu1 %v4392_v22  ;;  %v4390_v20 = vld [vmem:[%s5906_s0 + $0x20] ss:$100 sps:$4 sm:$0xff]   ;;  %v4396_v21 = vld [vmem:[%s5906_s0 + $0x50] ss:$100 sps:$4 sm:$0xff]  }
 0x106   :  { %3047 = vmatprep.mubr.bf16.mxu0 %v4398_v23  ;;  %v4393_v22 = vld [vmem:[%s5905_s1 + $0x500] ss:$8 sps:$4 sm:$0xff]  }
 0x107   :  { %2760 = vmatpush1.bf16.msra.mxu1 %v4300_v24  ;;  %v4399_v23 = vld [vmem:[%s5905_s1 + $0xb00] ss:$8 sps:$4 sm:$0xff]   ;;  %v4404_v24 = vld [vmem:[%s5905_s1 + $0x514] ss:$8 sps:$4 sm:$0xff]  }
 0x108   :  { %3018 = vmatpush1.bf16.msra.mxu0 %v4303_v25  ;;  %2761 = vmatprep.subr.bf16.mxu1 %v4308_v26  ;;  %v4407_v25 = vld [vmem:[%s5905_s1 + $0xb14] ss:$8 sps:$4 sm:$0xff]   ;;  %v4494_v26 = vld [vmem:[%s5906_s0 + $0x2c] ss:$100 sps:$4 sm:$0xff]  }
 0x109   :  { %3019 = vmatprep.subr.bf16.mxu0 %v4311_v27  ;;  %v4497_v27 = vld [vmem:[%s5906_s0 + $0x5c] ss:$100 sps:$4 sm:$0xff]  }
 0x10b   :  { %2762 = vmatpush1.bf16.msra.mxu1 %v4306_v28  ;;  %v4402_v28 = vld [vmem:[%s5905_s1 + $0x510] ss:$8 sps:$4 sm:$0xff]  }
 0x10c   :  { %3020 = vmatpush1.bf16.msra.mxu0 %v4309_v29  ;;  %2763 = vmatprep.subr.bf16.mxu1 %v4314_v30  ;;  %v4405_v29 = vld [vmem:[%s5905_s1 + $0xb10] ss:$8 sps:$4 sm:$0xff]   ;;  %v4410_v30 = vld [vmem:[%s5905_s1 + $0x524] ss:$8 sps:$4 sm:$0xff]  }
 0x10d   :  { %3021 = vmatprep.subr.bf16.mxu0 %v4317_v31  ;;  %v4413_v31 = vld [vmem:[%s5905_s1 + $0xb24] ss:$8 sps:$4 sm:$0xff]  }
 0x10f   :  { %2764 = vmatpush1.bf16.msra.mxu1 %v4312_v32  ;;  %v4408_v32 = vld [vmem:[%s5905_s1 + $0x520] ss:$8 sps:$4 sm:$0xff]  }
 0x110   :  { %3022 = vmatpush1.bf16.msra.mxu0 %v4315_v33  ;;  %2765 = vmatprep.subr.bf16.mxu1 %v4320_v34  ;;  %v4411_v33 = vld [vmem:[%s5905_s1 + $0xb20] ss:$8 sps:$4 sm:$0xff]   ;;  %v4416_v34 = vld [vmem:[%s5905_s1 + $0x534] ss:$8 sps:$4 sm:$0xff]  }
 0x111   :  { %3023 = vmatprep.subr.bf16.mxu0 %v4323_v35  ;;  %v4419_v35 = vld [vmem:[%s5905_s1 + $0xb34] ss:$8 sps:$4 sm:$0xff]  }
 0x113   :  { %2766 = vmatpush1.bf16.msra.mxu1 %v4318_v36  ;;  %v4414_v36 = vld [vmem:[%s5905_s1 + $0x530] ss:$8 sps:$4 sm:$0xff]  }
 0x114   :  { %3024 = vmatpush1.bf16.msra.mxu0 %v4321_v37  ;;  %2767 = vmatprep.subr.bf16.mxu1 %v4326_v38  ;;  %v4417_v37 = vld [vmem:[%s5905_s1 + $0xb30] ss:$8 sps:$4 sm:$0xff]   ;;  %v4422_v38 = vld [vmem:[%s5905_s1 + $0x544] ss:$8 sps:$4 sm:$0xff]  }
 0x115   :  { %3025 = vmatprep.subr.bf16.mxu0 %v4329_v39  ;;  %v4425_v39 = vld [vmem:[%s5905_s1 + $0xb44] ss:$8 sps:$4 sm:$0xff]  }
 0x117   :  { %2768 = vmatpush1.bf16.msra.mxu1 %v4324_v40  ;;  %v4420_v40 = vld [vmem:[%s5905_s1 + $0x540] ss:$8 sps:$4 sm:$0xff]  }
 0x118   :  { %3026 = vmatpush1.bf16.msra.mxu0 %v4327_v41  ;;  %2769 = vmatprep.subr.bf16.mxu1 %v4332_v42  ;;  %v4423_v41 = vld [vmem:[%s5905_s1 + $0xb40] ss:$8 sps:$4 sm:$0xff]   ;;  %v4428_v42 = vld [vmem:[%s5905_s1 + $0x554] ss:$8 sps:$4 sm:$0xff]  }
 0x119   :  { %3027 = vmatprep.subr.bf16.mxu0 %v4335_v43  ;;  %v4431_v43 = vld [vmem:[%s5905_s1 + $0xb54] ss:$8 sps:$4 sm:$0xff]  }
 0x11b   :  { %2770 = vmatpush1.bf16.msra.mxu1 %v4330_v44  ;;  %v4426_v44 = vld [vmem:[%s5905_s1 + $0x550] ss:$8 sps:$4 sm:$0xff]  }
 0x11c   :  { %3028 = vmatpush1.bf16.msra.mxu0 %v4333_v45  ;;  %2771 = vmatprep.subr.bf16.mxu1 %v4338_v46  ;;  %v4429_v45 = vld [vmem:[%s5905_s1 + $0xb50] ss:$8 sps:$4 sm:$0xff]   ;;  %v4434_v46 = vld [vmem:[%s5905_s1 + $0x564] ss:$8 sps:$4 sm:$0xff]  }
 0x11d   :  { %3029 = vmatprep.subr.bf16.mxu0 %v4341_v47  ;;  %v4437_v47 = vld [vmem:[%s5905_s1 + $0xb64] ss:$8 sps:$4 sm:$0xff]  }
 0x11f   :  { %2772 = vmatpush1.bf16.msra.mxu1 %v4336_v48  ;;  %v4432_v48 = vld [vmem:[%s5905_s1 + $0x560] ss:$8 sps:$4 sm:$0xff]  }
 0x120   :  { %3030 = vmatpush1.bf16.msra.mxu0 %v4339_v49  ;;  %2773 = vmatprep.subr.bf16.mxu1 %v4344_v50  ;;  %v4435_v49 = vld [vmem:[%s5905_s1 + $0xb60] ss:$8 sps:$4 sm:$0xff]   ;;  %v4440_v50 = vld [vmem:[%s5905_s1 + $0x574] ss:$8 sps:$4 sm:$0xff]  }
 0x121   :  { %3031 = vmatprep.subr.bf16.mxu0 %v4347_v51  ;;  %v4443_v51 = vld [vmem:[%s5905_s1 + $0xb74] ss:$8 sps:$4 sm:$0xff]  }
 0x123   :  { %2774 = vmatpush1.bf16.msra.mxu1 %v4342_v52  ;;  %v4438_v52 = vld [vmem:[%s5905_s1 + $0x570] ss:$8 sps:$4 sm:$0xff]  }
 0x124   :  { %3032 = vmatpush1.bf16.msra.mxu0 %v4345_v53  ;;  %2775 = vmatprep.subr.bf16.mxu1 %v4350_v54  ;;  %v4441_v53 = vld [vmem:[%s5905_s1 + $0xb70] ss:$8 sps:$4 sm:$0xff]   ;;  %v4446_v54 = vld [vmem:[%s5905_s1 + $0x584] ss:$8 sps:$4 sm:$0xff]  }
 0x125   :  { %3033 = vmatprep.subr.bf16.mxu0 %v4353_v55  ;;  %v4449_v55 = vld [vmem:[%s5905_s1 + $0xb84] ss:$8 sps:$4 sm:$0xff]  }
 0x127   :  { %2776 = vmatpush1.bf16.msra.mxu1 %v4348_v56  ;;  %v4444_v56 = vld [vmem:[%s5905_s1 + $0x580] ss:$8 sps:$4 sm:$0xff]  }
 0x128   :  { %3034 = vmatpush1.bf16.msra.mxu0 %v4351_v57  ;;  %2777 = vmatprep.subr.bf16.mxu1 %v4356_v58  ;;  %v4447_v57 = vld [vmem:[%s5905_s1 + $0xb80] ss:$8 sps:$4 sm:$0xff]   ;;  %v4452_v58 = vld [vmem:[%s5905_s1 + $0x594] ss:$8 sps:$4 sm:$0xff]  }
 0x129   :  { %3035 = vmatprep.subr.bf16.mxu0 %v4359_v59  ;;  %v4455_v59 = vld [vmem:[%s5905_s1 + $0xb94] ss:$8 sps:$4 sm:$0xff]  }
 0x12b   :  { %2778 = vmatpush1.bf16.msra.mxu1 %v4354_v60  ;;  %v4450_v60 = vld [vmem:[%s5905_s1 + $0x590] ss:$8 sps:$4 sm:$0xff]  }
 0x12c   :  { %3036 = vmatpush1.bf16.msra.mxu0 %v4357_v61  ;;  %2779 = vmatprep.subr.bf16.mxu1 %v4362_v62  ;;  %v4453_v61 = vld [vmem:[%s5905_s1 + $0xb90] ss:$8 sps:$4 sm:$0xff]   ;;  %v4458_v62 = vld [vmem:[%s5905_s1 + $0x5a4] ss:$8 sps:$4 sm:$0xff]  }
 0x12d   :  { %3037 = vmatprep.subr.bf16.mxu0 %v4365_v63  ;;  %v4461_v63 = vld [vmem:[%s5905_s1 + $0xba4] ss:$8 sps:$4 sm:$0xff]  }
 0x12f   :  { %2780 = vmatpush1.bf16.msra.mxu1 %v4360_v0  ;;  %v4456_v0 = vld [vmem:[%s5905_s1 + $0x5a0] ss:$8 sps:$4 sm:$0xff]  }
 0x130   :  { %3038 = vmatpush1.bf16.msra.mxu0 %v4363_v1  ;;  %2781 = vmatprep.subr.bf16.mxu1 %v4368_v2  ;;  %v4459_v1 = vld [vmem:[%s5905_s1 + $0xba0] ss:$8 sps:$4 sm:$0xff]   ;;  %v4464_v2 = vld [vmem:[%s5905_s1 + $0x5b4] ss:$8 sps:$4 sm:$0xff]  }
 0x131   :  { %3039 = vmatprep.subr.bf16.mxu0 %v4371_v3  ;;  %v4467_v3 = vld [vmem:[%s5905_s1 + $0xbb4] ss:$8 sps:$4 sm:$0xff]  }
 0x133   :  { %2782 = vmatpush1.bf16.msra.mxu1 %v4366_v4  ;;  %v4462_v4 = vld [vmem:[%s5905_s1 + $0x5b0] ss:$8 sps:$4 sm:$0xff]  }
 0x134   :  { %3040 = vmatpush1.bf16.msra.mxu0 %v4369_v5  ;;  %2783 = vmatprep.subr.bf16.mxu1 %v4374_v6  ;;  %v4465_v5 = vld [vmem:[%s5905_s1 + $0xbb0] ss:$8 sps:$4 sm:$0xff]   ;;  %v4470_v6 = vld [vmem:[%s5905_s1 + $0x5c4] ss:$8 sps:$4 sm:$0xff]  }
 0x135   :  { %3041 = vmatprep.subr.bf16.mxu0 %v4377_v7  ;;  %v4473_v7 = vld [vmem:[%s5905_s1 + $0xbc4] ss:$8 sps:$4 sm:$0xff]  }
 0x137   :  { %2784 = vmatpush1.bf16.msra.mxu1 %v4372_v8  ;;  %v4468_v8 = vld [vmem:[%s5905_s1 + $0x5c0] ss:$8 sps:$4 sm:$0xff]  }
 0x138   :  { %3042 = vmatpush1.bf16.msra.mxu0 %v4375_v9  ;;  %2785 = vmatprep.subr.bf16.mxu1 %v4380_v10  ;;  %v4471_v9 = vld [vmem:[%s5905_s1 + $0xbc0] ss:$8 sps:$4 sm:$0xff]   ;;  %v4476_v10 = vld [vmem:[%s5905_s1 + $0x5d4] ss:$8 sps:$4 sm:$0xff]  }
 0x139   :  { %3043 = vmatprep.subr.bf16.mxu0 %v4383_v11  ;;  %v4479_v11 = vld [vmem:[%s5905_s1 + $0xbd4] ss:$8 sps:$4 sm:$0xff]  }
 0x13b   :  { %2786 = vmatpush1.bf16.msra.mxu1 %v4378_v12  ;;  %v4474_v12 = vld [vmem:[%s5905_s1 + $0x5d0] ss:$8 sps:$4 sm:$0xff]  }
 0x13c   :  { %3044 = vmatpush1.bf16.msra.mxu0 %v4381_v13  ;;  %2787 = vmatprep.subr.bf16.mxu1 %v4386_v14  ;;  %v4477_v13 = vld [vmem:[%s5905_s1 + $0xbd0] ss:$8 sps:$4 sm:$0xff]   ;;  %v4482_v14 = vld [vmem:[%s5905_s1 + $0x5e4] ss:$8 sps:$4 sm:$0xff]  }
 0x13d   :  { %3045 = vmatprep.subr.bf16.mxu0 %v4389_v15  ;;  %v4485_v15 = vld [vmem:[%s5905_s1 + $0xbe4] ss:$8 sps:$4 sm:$0xff]  }
 0x13f   :  { %2788 = vmatpush1.bf16.msra.mxu1 %v4384_v16  ;;  %v4480_v16 = vld [vmem:[%s5905_s1 + $0x5e0] ss:$8 sps:$4 sm:$0xff]  }
 0x140   :  { %3046 = vmatpush1.bf16.msra.mxu0 %v4387_v17  ;;  %2800 = vmatprep.subr.bf16.mxu1 %v4395_v18  ;;  %v4483_v17 = vld [vmem:[%s5905_s1 + $0xbe0] ss:$8 sps:$4 sm:$0xff]   ;;  %v4488_v18 = vld [vmem:[%s5905_s1 + $0x5f4] ss:$8 sps:$4 sm:$0xff]  }
 0x141   :  { %3058 = vmatprep.subr.bf16.mxu0 %v4401_v19  ;;  %v4491_v19 = vld [vmem:[%s5905_s1 + $0xbf4] ss:$8 sps:$4 sm:$0xff]  }
 0x142   :  { %2790 = vmatmul.mubr.bf16.vlgmr.msra.gmra.mrb[0].mxu1 %v4390_v20  ;;  %v4486_v20 = vld [vmem:[%s5905_s1 + $0x5f0] ss:$8 sps:$4 sm:$0xff]  }
 0x143   :  { %3048 = vmatmul.mubr.bf16.vlgmr.msra.gmra.mrb[0].mxu0 %v4396_v21  ;;  %2801 = vmatpush1.bf16.msra.mxu1 %v4393_v22  ;;  %v4489_v21 = vld [vmem:[%s5905_s1 + $0xbf0] ss:$8 sps:$4 sm:$0xff]   ;;  %v4500_v22 = vld [vmem:[%s5905_s1 + $0xc04] ss:$8 sps:$4 sm:$0xff]  }
 0x144   :  { %3059 = vmatpush1.bf16.msra.mxu0 %v4399_v23  ;;  %2802 = vmatprep.subr.bf16.mxu1 %v4404_v24  ;;  %v4492_v23 = vld [vmem:[%s5906_s0 + $0x28] ss:$100 sps:$4 sm:$0xff]   ;;  %v4495_v24 = vld [vmem:[%s5906_s0 + $0x58] ss:$100 sps:$4 sm:$0xff]  }
 0x145   :  { %3060 = vmatprep.subr.bf16.mxu0 %v4407_v25  ;;  %2832 = vmatprep.mubr.bf16.mxu1 %v4494_v26  ;;  %v4498_v25 = vld [vmem:[%s5905_s1 + $0xc00] ss:$8 sps:$4 sm:$0xff]   ;;  %v4503_v26 = vld [vmem:[%s5905_s1 + $0xc14] ss:$8 sps:$4 sm:$0xff]  }
 0x146   :  { %3090 = vmatprep.mubr.bf16.mxu0 %v4497_v27  ;;  %v4501_v27 = vld [vmem:[%s5905_s1 + $0xc10] ss:$8 sps:$4 sm:$0xff]  }
 0x147   :  { %2803 = vmatpush1.bf16.msra.mxu1 %v4402_v28  ;;  %v4539_v28 = vmov 0  }
 0x148   :  { %3061 = vmatpush1.bf16.msra.mxu0 %v4405_v29  ;;  %2804 = vmatprep.subr.bf16.mxu1 %v4410_v30  ;;  %v4506_v29 = vld [vmem:[%s5905_s1 + $0xc24] ss:$8 sps:$4 sm:$0xff]   ;;  %v4504_v30 = vld [vmem:[%s5905_s1 + $0xc20] ss:$8 sps:$4 sm:$0xff]  }
 0x149   :  { %3062 = vmatprep.subr.bf16.mxu0 %v4413_v31  ;;  %v4509_v31 = vld [vmem:[%s5905_s1 + $0xc34] ss:$8 sps:$4 sm:$0xff]  }
 0x14b   :  { %2805 = vmatpush1.bf16.msra.mxu1 %v4408_v32  ;;  %v4507_v32 = vld [vmem:[%s5905_s1 + $0xc30] ss:$8 sps:$4 sm:$0xff]  }
 0x14c   :  { %3063 = vmatpush1.bf16.msra.mxu0 %v4411_v33  ;;  %2806 = vmatprep.subr.bf16.mxu1 %v4416_v34  ;;  %v4512_v33 = vld [vmem:[%s5905_s1 + $0xc44] ss:$8 sps:$4 sm:$0xff]   ;;  %v4510_v34 = vld [vmem:[%s5905_s1 + $0xc40] ss:$8 sps:$4 sm:$0xff]  }
 0x14d   :  { %3064 = vmatprep.subr.bf16.mxu0 %v4419_v35  ;;  %v4515_v35 = vld [vmem:[%s5905_s1 + $0xc54] ss:$8 sps:$4 sm:$0xff]  }
 0x14f   :  { %2807 = vmatpush1.bf16.msra.mxu1 %v4414_v36  ;;  %v4513_v36 = vld [vmem:[%s5905_s1 + $0xc50] ss:$8 sps:$4 sm:$0xff]  }
 0x150   :  { %3065 = vmatpush1.bf16.msra.mxu0 %v4417_v37  ;;  %2808 = vmatprep.subr.bf16.mxu1 %v4422_v38  ;;  %v4518_v37 = vld [vmem:[%s5905_s1 + $0xc64] ss:$8 sps:$4 sm:$0xff]   ;;  %v4516_v38 = vld [vmem:[%s5905_s1 + $0xc60] ss:$8 sps:$4 sm:$0xff]  }
 0x151   :  { %3066 = vmatprep.subr.bf16.mxu0 %v4425_v39  ;;  %v4521_v39 = vld [vmem:[%s5905_s1 + $0xc74] ss:$8 sps:$4 sm:$0xff]  }
 0x153   :  { %2809 = vmatpush1.bf16.msra.mxu1 %v4420_v40  ;;  %v4519_v40 = vld [vmem:[%s5905_s1 + $0xc70] ss:$8 sps:$4 sm:$0xff]  }
 0x154   :  { %3067 = vmatpush1.bf16.msra.mxu0 %v4423_v41  ;;  %2810 = vmatprep.subr.bf16.mxu1 %v4428_v42  ;;  %v4522_v41 = vld [vmem:[%s5906_s0 + $0x60] ss:$100 sps:$4 sm:$0xff]  }
 0x155   :  { %3068 = vmatprep.subr.bf16.mxu0 %v4431_v43  ;;  %v4523_v42 = vld [vmem:[%s5907_s3 + $0x40] sm:$0xff]  }
 0x156   :  { %v4524_v43 = vld [vmem:[%s5907_s3] sm:$0xff]  }
 0x157   :  { %2811 = vmatpush1.bf16.msra.mxu1 %v4426_v44  ;;  %v4525_v44 = vld [vmem:[%s5907_s3 + $0x48] sm:$0xff]  }
 0x158   :  { %3069 = vmatpush1.bf16.msra.mxu0 %v4429_v45  ;;  %2812 = vmatprep.subr.bf16.mxu1 %v4434_v46  ;;  %v4526_v45 = vld [vmem:[%s5907_s3 + $0x8] sm:$0xff]   ;;  %v4527_v46 = vld [vmem:[%s5907_s3 + $0x50] sm:$0xff]  }
 0x159   :  { %3070 = vmatprep.subr.bf16.mxu0 %v4437_v47  ;;  %v4528_v47 = vld [vmem:[%s5907_s3 + $0x10] sm:$0xff]  }
 0x15b   :  { %2813 = vmatpush1.bf16.msra.mxu1 %v4432_v48  ;;  %v4529_v48 = vld [vmem:[%s5907_s3 + $0x58] sm:$0xff]  }
 0x15c   :  { %3071 = vmatpush1.bf16.msra.mxu0 %v4435_v49  ;;  %2814 = vmatprep.subr.bf16.mxu1 %v4440_v50  ;;  %v4530_v49 = vld [vmem:[%s5907_s3 + $0x18] sm:$0xff]   ;;  %v4531_v50 = vld [vmem:[%s5907_s3 + $0x60] sm:$0xff]  }
 0x15d   :  { %3072 = vmatprep.subr.bf16.mxu0 %v4443_v51  ;;  %v4532_v51 = vld [vmem:[%s5907_s3 + $0x20] sm:$0xff]  }
 0x15f   :  { %2815 = vmatpush1.bf16.msra.mxu1 %v4438_v52  ;;  %v4533_v52 = vld [vmem:[%s5907_s3 + $0x68] sm:$0xff]  }
 0x160   :  { %3073 = vmatpush1.bf16.msra.mxu0 %v4441_v53  ;;  %2816 = vmatprep.subr.bf16.mxu1 %v4446_v54  ;;  %v4534_v53 = vld [vmem:[%s5907_s3 + $0x28] sm:$0xff]   ;;  %v4535_v54 = vld [vmem:[%s5907_s3 + $0x70] sm:$0xff]  }
 0x161   :  { %3074 = vmatprep.subr.bf16.mxu0 %v4449_v55  ;;  %v4536_v55 = vld [vmem:[%s5907_s3 + $0x30] sm:$0xff]  }
 0x163   :  { %2817 = vmatpush1.bf16.msra.mxu1 %v4444_v56  ;;  %v4537_v56 = vld [vmem:[%s5907_s3 + $0x78] sm:$0xff]  }
 0x164   :  { %3075 = vmatpush1.bf16.msra.mxu0 %v4447_v57  ;;  %2818 = vmatprep.subr.bf16.mxu1 %v4452_v58  ;;  %v4538_v57 = vld [vmem:[%s5907_s3 + $0x38] sm:$0xff]  }
 0x165   :  { %3076 = vmatprep.subr.bf16.mxu0 %v4455_v59 }
 0x167   :  { %2819 = vmatpush1.bf16.msra.mxu1 %v4450_v60 }
 0x168   :  { %3077 = vmatpush1.bf16.msra.mxu0 %v4453_v61  ;;  %2820 = vmatprep.subr.bf16.mxu1 %v4458_v62  ;;  %v449_v62 = vlaneseq }
 0x169   :  { %3078 = vmatprep.subr.bf16.mxu0 %v4461_v63 }
 0x16a   :  { %v450_v63 = vshrl.u32 %v449_v62, 7 }
 0x16b   :  { %2821 = vmatpush1.bf16.msra.mxu1 %v4456_v0 }
 0x16c   :  { %3079 = vmatpush1.bf16.msra.mxu0 %v4459_v1  ;;  %2822 = vmatprep.subr.bf16.mxu1 %v4464_v2  ;;  %v451_v0 = vsub.s32 0, %v450_v63  ;;  %v447_v1 = vld [vmem:[%s5908_s2] sm:$0x3]  ;;  %v455_v2 = vsub.s32 1, %v450_v63  ;;  %vm3331_vm0 = vcmp.lt.s32.totalorder %v450_v63, 2 }
 0x16d   :  { %3080 = vmatprep.subr.bf16.mxu0 %v4467_v3 }
 0x16e   :  { %v452_v3 = vrot.slane %v447_v1, %v451_v0 }
 0x16f   :  { %2823 = vmatpush1.bf16.msra.mxu1 %v4462_v4  ;;  %v456_v4 = vrot.slane %v447_v1, %v455_v2 }
 0x170   :  { %3081 = vmatpush1.bf16.msra.mxu0 %v4465_v5  ;;  %2824 = vmatprep.subr.bf16.mxu1 %v4470_v6 }
 0x171   :  { %3082 = vmatprep.subr.bf16.mxu0 %v4473_v7 }
 0x173   :  { %2825 = vmatpush1.bf16.msra.mxu1 %v4468_v8 }
 0x174   :  { %3083 = vmatpush1.bf16.msra.mxu0 %v4471_v9  ;;  %2826 = vmatprep.subr.bf16.mxu1 %v4476_v10 }
 0x175   :  { %3084 = vmatprep.subr.bf16.mxu0 %v4479_v11 }
 0x177   :  { %2827 = vmatpush1.bf16.msra.mxu1 %v4474_v12 }
 0x178   :  { %3085 = vmatpush1.bf16.msra.mxu0 %v4477_v13  ;;  %2828 = vmatprep.subr.bf16.mxu1 %v4482_v14 }
 0x179   :  { %3086 = vmatprep.subr.bf16.mxu0 %v4485_v15 }
 0x17b   :  { %2829 = vmatpush1.bf16.msra.mxu1 %v4480_v16 }
 0x17c   :  { %3087 = vmatpush1.bf16.msra.mxu0 %v4483_v17  ;;  %2830 = vmatprep.subr.bf16.mxu1 %v4488_v18 }
 0x17d   :  { %3088 = vmatprep.subr.bf16.mxu0 %v4491_v19 }
 0x17f   :  { %2831 = vmatpush1.bf16.msra.mxu1 %v4486_v20 }
 0x180   :  { %3089 = vmatpush1.bf16.msra.mxu0 %v4489_v21  ;;  %3809 = vmatprep.subr.bf16.mxu1 %v4523_v42 }
 0x181   :  { %3101 = vmatprep.subr.bf16.mxu0 %v4500_v22 }
 0x182   :  { %2833 = vmatmul.mubr.bf16.vlgmr.msra.gmra.mrb[0].mxu1 %v4492_v23  ;;  %v3330_v23 = vand.u32 127, %v449_v62 }
 0x183   :  { %3091 = vmatmul.mubr.bf16.vlgmr.msra.gmra.mrb[0].mxu0 %v4495_v24  ;;  %3810 = vmatpush3.bf16.msra.mxu1 %v4524_v43 }
 0x184   :  { %3102 = vmatpush1.bf16.msra.mxu0 %v4498_v25  ;;  %3133 = vmatprep.mubr.bf16.mxu0 %v4539_v28  ;;  %vm3333_vm1 = vcmp.lt.s32.totalorder %v3330_v23, 4  ;;  %v3792_v25 = vld [vmem:[%s5909_s4] ss:$0 sm:$0xff]  ;;  %vm3349_vm3 = vcmp.eq.s32.totalorder %v3330_v23, 4 }
 0x185   :  { %3103 = vmatprep.subr.bf16.mxu0 %v4503_v26  ;;  %3811 = vmatprep.subr.bf16.mxu1 %v4525_v44  ;;  %vm3334_vm2 = vmand %vm3331_vm0, %vm3333_vm1 }
 0x187   :  { %3812 = vmatpush3.bf16.msra.mxu1 %v4526_v45 }
 0x188   :  { %3104 = vmatpush1.bf16.msra.mxu0 %v4501_v27  ;;  %3813 = vmatprep.subr.bf16.mxu1 %v4527_v46 }
 0x189   :  { %3105 = vmatprep.subr.bf16.mxu0 %v4506_v29 }
 0x18b   :  { %3814 = vmatpush3.bf16.msra.mxu1 %v4528_v47 }
 0x18c   :  { %3106 = vmatpush1.bf16.msra.mxu0 %v4504_v30  ;;  %3815 = vmatprep.subr.bf16.mxu1 %v4529_v48 }
 0x18d   :  { %3107 = vmatprep.subr.bf16.mxu0 %v4509_v31 }
 0x18f   :  { %3816 = vmatpush3.bf16.msra.mxu1 %v4530_v49 }
 0x190   :  { %3108 = vmatpush1.bf16.msra.mxu0 %v4507_v32  ;;  %3817 = vmatprep.subr.bf16.mxu1 %v4531_v50 }
 0x191   :  { %3109 = vmatprep.subr.bf16.mxu0 %v4512_v33 }
 0x193   :  { %3818 = vmatpush3.bf16.msra.mxu1 %v4532_v51 }
 0x194   :  { %3110 = vmatpush1.bf16.msra.mxu0 %v4510_v34  ;;  %3819 = vmatprep.subr.bf16.mxu1 %v4533_v52 }
 0x195   :  { %3111 = vmatprep.subr.bf16.mxu0 %v4515_v35 }
 0x197   :  { %3820 = vmatpush3.bf16.msra.mxu1 %v4534_v53 }
 0x198   :  { %3112 = vmatpush1.bf16.msra.mxu0 %v4513_v36  ;;  %3821 = vmatprep.subr.bf16.mxu1 %v4535_v54 }
 0x199   :  { %3113 = vmatprep.subr.bf16.mxu0 %v4518_v37 }
 0x19b   :  { %3822 = vmatpush3.bf16.msra.mxu1 %v4536_v55 }
 0x19c   :  { %3114 = vmatpush1.bf16.msra.mxu0 %v4516_v38  ;;  %3823 = vmatprep.subr.bf16.mxu1 %v4537_v56 }
 0x19d   :  { %3115 = vmatprep.subr.bf16.mxu0 %v4521_v39 }
 0x19f   :  { %3824 = vmatpush3.bf16.msra.mxu1 %v4538_v57 }
 0x1a0   :  { %3116 = vmatpush1.bf16.msra.mxu0 %v4519_v40 }
 0x1a3   :  { %3134 = vmatmul.mubr.bf16.vlgmr.msra.gmra.mrb[0].mxu0 %v4522_v41 }
 0x255   :  { %v2834_v58 = vpop.f32.mrb[0].mxu1 }
 0x256   :  { %v2836_v59 = vpop.f32.mrb[1].mxu1  ;;  %v3831_v5 = vadd.f32 %v2834_v58, %v452_v3 }
 0x257   :  { %v2838_v60 = vpop.f32.mrb[2].mxu1  ;;  %v3833_v6 = vadd.f32 %v2836_v59, %v456_v4 }
 0x258   :  { %v2840_v61 = vpop.f32.mrb[3].mxu1  ;;  %v3835_v8 = vadd.f32 %v2838_v60, %v452_v3 }
 0x259   :  { %v3837_v11 = vadd.f32 %v2840_v61, %v456_v4 }
 0x276   :  { %v3135_v7 = vpop.f32.mrb[0].mxu0 }
 0x277   :  { %v3832_v9 = vadd.f32 %v3831_v5, %v3135_v7  ;;  %v3137_v10 = vpop.f32.mrb[1].mxu0 }
 0x278   :  { %v3834_v12 = vadd.f32 %v3833_v6, %v3137_v10  ;;  %v3139_v13 = vpop.f32.mrb[2].mxu0 }
 0x279   :  { %v3836_v14 = vadd.f32 %v3835_v8, %v3139_v13  ;;  %v3141_v15 = vpop.f32.mrb[3].mxu0  ;;  %v3144_v17 = vmax.f32 %v3832_v9, 0.0 }
 0x27a   :  { %v3838_v16 = vadd.f32 %v3837_v11, %v3141_v15  ;;  %v3145_v19 = vmax.f32 %v3834_v12, 0.0 }
 0x27b   :  { %v3146_v18 = vmax.f32 %v3836_v14, 0.0 }
 0x27c   :  { %v3147_v20 = vmax.f32 %v3838_v16, 0.0 }
 0x27d   :  { %v3148_v21 = vpack.c.bf16 %v3146_v18, %v3144_v17 }
 0x27e   :  { %v3149_v22 = vpack.c.bf16 %v3147_v20, %v3145_v19 }
 0x280   :  { %3317 = vmatprep.mubr.bf16.mxu1 %v3149_v22 }
 0x281   :  { %3318 = vmatmul.mubr.bf16.vlgmr.msra.gmra.mrb[4].mxu1 %v3148_v21 }
 0x354   :  { %v3825_v24 = vpop.f32.mrb[4].mxu1 }
 0x355   :  { %v3826_v26 = vpop.f32.mrb[5].mxu1 }
 0x356   :  { %v3827_v27 = vadd.f32 %v3826_v26, %v3825_v24  ;;  %v3828_v28 = vpop.f32.mrb[6].mxu1 }
 0x357   :  { %v3829_v29 = vpop.f32.mrb[7].mxu1 }
 0x358   :  { %v3320_v30 = vadd.f32 %v3827_v27, %v3792_v25  ;;  %v3830_v31 = vadd.f32 %v3829_v29, %v3828_v28 }
 0x35a   :  { %v3336_v32 = vsel %vm3334_vm2, %v3320_v30, 0.0  ;;  %v3323_v33 = vadd.f32 %v3830_v31, %v3792_v25  ;;  %v3350_v35 = vsel %vm3349_vm3, %v3320_v30, 0.0 }
 0x35b   :  { %3339 = vadd.xlane.f32.xlu0 %v3336_v32 }
 0x35c   :  { %v3351_v34 = vsel %vm3349_vm3, %v3323_v33, 0.0 }
 0x35d   :  { %3354 = vadd.xlane.f32.xlu1 %v3351_v34 }
 0x35f   :  { %3352 = vadd.xlane.f32.xlu0 %v3350_v35 }
 0x3e8   :  { %v3340_v36 = vpop.xlane.xlu0 %3339 }
 0x3e9   :  { %v3341_v37 = vrot.slane %v3340_v36, 4 }
 0x3ea   :  { %v3355_v46 = vpop.xlane.xlu1 %3354 }
 0x3eb   :  { %v3342_v38 = vadd.f32 %v3341_v37, %v3340_v36 }
 0x3ec   :  { %v3353_v47 = vpop.xlane.xlu0 %3352 }
 0x3ed   :  { %v3343_v39 = vrot.slane %v3342_v38, 2 }
 0x3ef   :  { %v3344_v40 = vadd.f32 %v3343_v39, %v3342_v38 }
 0x3f1   :  { %v3345_v41 = vrot.slane %v3344_v40, 1 }
 0x3f3   :  { %v3346_v42 = vadd.f32 %v3345_v41, %v3344_v40 }
 0x3f5   :  { %3883 = vpush %v3346_v42 }
 0x426   :  { %s3884_s4 = spop %3883 }
 0x427   :  { %s3348_s24 = smul.f32 0.125, %s3884_s4 }
 0x429   :  { %v3356_v43 = vstv %s3348_s24 }
 0x42a   :  { %v3357_v44 = vsub.f32 %v3320_v30, %v3356_v43  ;;  %v3358_v45 = vsub.f32 %v3323_v33, %v3356_v43 }
 0x42c   :  { %v3359_v48 = vadd.f32 %v3357_v44, %v3353_v47  ;;  %v3360_v49 = vadd.f32 %v3358_v45, %v3355_v46 }
 0x42e   :  { %3361 = vst [vmem:[%s5910_s5] sm:$0xff] %v3359_v48  ;;  %3362 = vst [vmem:[%s5910_s5 + $0x8] sm:$0xff] %v3360_v49 }

</bundles_post_ra>
